<compile_context>
chip_gen: v6e
topology: v6e:2x2x1
jax: 0.10.0
libtpu: 0.0.40
codegen_flags: <defaults>
</compile_context>

<pallas_src>
import functools

import jax
import jax.numpy as jnp
from jax import lax
from jax.experimental import pallas as pl
from jax.experimental.pallas import tpu as pltpu


def _round_up(x, m):
    return (x + m - 1) // m * m


def _choose_tiles(mp128, cin, cout8, vmem_budget_bytes=16 * 1024 * 1024):
    """Pick (cout_tile, mode_tile).

    mode_tile is a multiple of 128 dividing mp128*128; cout_tile is a multiple
    of 8 dividing cout8.  Prefer the largest work-per-step (cout_tile *
    mode_tile) whose double-buffered VMEM footprint fits the budget, while
    keeping the 2 accumulator planes within ~16 vregs (no register spills).
    """
    best = (8, 128)
    best_score = (-1, -1)
    for q in range(1, mp128 + 1):
        if mp128 % q:
            continue
        tm = 128 * q
        for tc in range(8, cout8 + 1, 8):
            if cout8 % tc:
                continue
            if 2 * tc * tm > 16 * 1024:        # accumulator stays in vregs
                continue
            act = 2 * (2 * cin * tm) * 4       # double-buffered activations
            wgt = 2 * (2 * cin * tc * tm) * 4  # double-buffered weights (2 planes)
            out = 2 * (2 * tc * tm) * 4        # double-buffered outputs
            if act + wgt + out > vmem_budget_bytes:
                continue
            score = (tc * tm, tc)              # tie-break: bigger cout tile
            if score > best_score:
                best_score = score
                best = (tc, tm)
    return best


def _compl_mix_kernel(a_ref, w_ref, o_ref, *, cin):
    """Complex 'bim,iom->bom' for one (mode tile, cout tile, batch element).

    a_ref: (2, 1, Cin, TM)      [a_r, a_i]   (modes on lanes)
    w_ref: (2, Cin, TCout, TM)  [w_r, w_i]
    o_ref: (2, 1, TCout, TM)    [o_r, o_i]
    """
    tc = w_ref.shape[2]
    tm = w_ref.shape[3]

    init = (jnp.zeros((1, tc, tm), jnp.float32),
            jnp.zeros((1, tc, tm), jnp.float32))

    def body(i, carry):
        acc_r, acc_i = carry
        a_r = a_ref[0, :, pl.ds(i, 1), :]        # (1, 1, TM)
        a_i = a_ref[1, :, pl.ds(i, 1), :]        # (1, 1, TM)
        w_r = w_ref[0, pl.ds(i, 1), :, :]        # (1, TCout, TM)
        w_i = w_ref[1, pl.ds(i, 1), :, :]        # (1, TCout, TM)
        # Plain 4-multiply complex product: same VALU op count as Gauss on a
        # VPU without FMA, but only 2 weight planes of memory traffic.
        acc_r = acc_r + (a_r * w_r - a_i * w_i)
        acc_i = acc_i + (a_r * w_i + a_i * w_r)
        return acc_r, acc_i

    # Full unroll for small channel counts (all slice starts become static);
    # partial unroll for wide channels to bound code size.
    unroll = True if cin <= 32 else 8
    acc_r, acc_i = lax.fori_loop(0, cin, body, init, unroll=unroll)

    # Single store per output plane from the register accumulator.
    o_ref[0] = acc_r
    o_ref[1] = acc_i


def compl_mix_pallas(a, w, *, cout_tile, mode_tile):
    """a: (2, B, Cin, Mp) f32, w: (2, Cin, Cout8, Mp) f32 -> (2, B, Cout8, Mp)."""
    _, B, Cin, Mp = a.shape
    Cout8 = w.shape[2]
    assert Mp % mode_tile == 0 and Cout8 % cout_tile == 0
    num_mt = Mp // mode_tile
    num_ct = Cout8 // cout_tile

    kernel = functools.partial(_compl_mix_kernel, cin=Cin)
    return pl.pallas_call(
        kernel,
        out_shape=jax.ShapeDtypeStruct((2, B, Cout8, Mp), jnp.float32),
        grid_spec=pltpu.PrefetchScalarGridSpec(
            num_scalar_prefetch=0,
            # Batch innermost: the weight block index is constant along it, so
            # the (large) weight tile stays VMEM-resident across the batch.
            grid=(num_mt, num_ct, B),
            in_specs=[
                pl.BlockSpec((2, 1, Cin, mode_tile),
                             lambda mt, ct, b: (0, b, 0, mt)),
                pl.BlockSpec((2, Cin, cout_tile, mode_tile),
                             lambda mt, ct, b: (0, 0, ct, mt)),
            ],
            out_specs=pl.BlockSpec((2, 1, cout_tile, mode_tile),
                                   lambda mt, ct, b: (0, b, ct, mt)),
        ),
        compiler_params=pltpu.CompilerParams(
            dimension_semantics=("parallel", "parallel", "parallel")),
    )(a, w)


def spectral_conv2d(x, weights1, weights2, modes1, modes2):
    """Forward pass of SpectralConv2d.  x: (B, Cin, H, W) float32 (NCHW).

    Assumes 2*modes1 <= H and modes2 <= W//2 + 1 (same implicit assumption as
    the PyTorch module: the two retained spectrum corners do not overlap).
    """
    B, Cin, H, W = x.shape
    Cout = weights1.shape[1]
    Wf = W // 2 + 1
    assert 2 * modes1 <= H and modes2 <= Wf
    M = modes1 * modes2
    M2 = 2 * M

    # TODO(synk): rfft2/irfft2 have no Pallas TPU primitive; they stay in XLA.
    x_ft = jnp.fft.rfft2(x)                                       # (B, Cin, H, Wf) c64

    # Gather both retained corner blocks, flatten the mode axes onto the last
    # (lane) dimension, split into real/imag planes stacked on a leading axis.
    sel = jnp.concatenate(
        [x_ft[:, :, :modes1, :modes2], x_ft[:, :, H - modes1:, :modes2]],
        axis=2).reshape(B, Cin, M2)
    a = jnp.stack([jnp.real(sel), jnp.imag(sel)], axis=0).astype(jnp.float32)

    w_sel = jnp.concatenate([weights1, weights2], axis=2).reshape(Cin, Cout, M2)
    w = jnp.stack([jnp.real(w_sel).astype(jnp.float32),
                   jnp.imag(w_sel).astype(jnp.float32)], axis=0)  # (2, Cin, Cout, M2)

    # Lane-dense padding of the flattened mode axis (multiple of 128) and
    # sublane padding of Cout (multiple of 8) so the kernel can tile it.
    Mp = _round_up(M2, 128)
    Cout8 = _round_up(Cout, 8)
    cout_tile, mode_tile = _choose_tiles(Mp // 128, Cin, Cout8)
    if Mp > M2:
        a = jnp.pad(a, ((0, 0), (0, 0), (0, 0), (0, Mp - M2)))
    if Mp > M2 or Cout8 > Cout:
        w = jnp.pad(w, ((0, 0), (0, 0), (0, Cout8 - Cout), (0, Mp - M2)))

    o = compl_mix_pallas(a, w, cout_tile=cout_tile, mode_tile=mode_tile)

    o_c = lax.complex(o[0, :, :Cout, :M2], o[1, :, :Cout, :M2])   # (B, Cout, 2M) c64
    o_c = o_c.reshape(B, Cout, 2 * modes1, modes2)

    # Re-embed the mixed modes into the full (H, Wf) spectrum with a single
    # concat + pad instead of zeros + two scatters.
    mid = jnp.zeros((B, Cout, H - 2 * modes1, modes2), dtype=o_c.dtype)
    out_ft = jnp.concatenate(
        [o_c[:, :, :modes1, :], mid, o_c[:, :, modes1:, :]], axis=2)
    out_ft = jnp.pad(out_ft, ((0, 0), (0, 0), (0, 0), (0, Wf - modes2)))

    return jnp.fft.irfft2(out_ft, s=(H, W))                       # (B, Cout, H, W) f32


def spectral_conv2d_reference(x, weights1, weights2, modes1, modes2):
    """Pure-JAX reference mirroring the PyTorch module exactly."""
    B, Cin, H, W = x.shape
    Cout = weights1.shape[1]
    Wf = W // 2 + 1
    x_ft = jnp.fft.rfft2(x)
    out_ft = jnp.zeros((B, Cout, H, Wf), dtype=jnp.complex64)
    out_ft = out_ft.at[:, :, :modes1, :modes2].set(
        jnp.einsum("bixy,ioxy->boxy", x_ft[:, :, :modes1, :modes2], weights1))
    out_ft = out_ft.at[:, :, H - modes1:, :modes2].set(
        jnp.einsum("bixy,ioxy->boxy", x_ft[:, :, H - modes1:, :modes2], weights2))
    return jnp.fft.irfft2(out_ft, s=(H, W))


def _make_weights(key, cin, cout, m1, m2):
    """torch.rand on a cfloat parameter draws uniform [0,1) real & imag parts."""
    k1, k2 = jax.random.split(key)
    scale = 1.0 / (cin * cout)
    shape = (cin, cout, m1, m2)
    w = scale * (jax.random.uniform(k1, shape, dtype=jnp.float32)
                 + 1j * jax.random.uniform(k2, shape, dtype=jnp.float32))
    return w.astype(jnp.complex64)


def _run_case(key, B, Cin, Cout, H, W, modes1, modes2):
    kw1, kw2, kx = jax.random.split(key, 3)
    weights1 = _make_weights(kw1, Cin, Cout, modes1, modes2)
    weights2 = _make_weights(kw2, Cin, Cout, modes1, modes2)
    x = jax.random.normal(kx, (B, Cin, H, W), dtype=jnp.float32)

    fwd = jax.jit(functools.partial(spectral_conv2d, modes1=modes1, modes2=modes2))
    out = jax.block_until_ready(fwd(x, weights1, weights2))
    ref = jax.block_until_ready(
        spectral_conv2d_reference(x, weights1, weights2, modes1, modes2))

    assert out.shape == (B, Cout, H, W), out.shape
    max_err = float(jnp.max(jnp.abs(out - ref)))
    assert jnp.allclose(out, ref, rtol=1e-4, atol=1e-5), max_err


if __name__ == "__main__":
    key = jax.random.PRNGKey(0)
    k1, k2 = jax.random.split(key)

    # Case 1: exercises the mode-axis lane padding path (2*8*6 = 96 -> 128).
    _run_case(k1, B=2, Cin=32, Cout=32, H=32, W=32, modes1=8, modes2=6)

    # Case 2: exercises the output-channel tiling path (Cout=128 -> 2 tiles of 64).
    _run_case(k2, B=2, Cin=16, Cout=128, H=32, W=32, modes1=8, modes2=8)

    print("KERNEL_OK")
</pallas_src>

<mosaic_0001>
module attributes {stable_mosaic.version = 11 : i64} {
  func.func @_compl_mix_kernel(%arg0: i32, %arg1: i32, %arg2: i32, %arg3: memref<2x1x32x128xf32, #tpu.memory_space<vmem>>, %arg4: memref<2x32x32x128xf32, #tpu.memory_space<vmem>>, %arg5: memref<2x1x32x128xf32, #tpu.memory_space<vmem>>) attributes {dimension_semantics = [#tpu.dimension_semantics<parallel>, #tpu.dimension_semantics<parallel>, #tpu.dimension_semantics<parallel>], iteration_bounds = array<i64: 1, 1, 2>, scalar_prefetch = 0 : i64, scratch_operands = 0 : i64, tpu.core_type = #tpu.core_type<tc>, window_params = [{transform_indices = @transform_0, window_bounds = array<i64: 2, 1, 32, 128>}, {transform_indices = @transform_1, window_bounds = array<i64: 2, 32, 32, 128>}, {transform_indices = @transform_2, window_bounds = array<i64: 2, 1, 32, 128>}]} {
    %cst = arith.constant 0.000000e+00 : f32
    %0 = vector.broadcast %cst : f32 to vector<1x32x128xf32>
    %cst_0 = arith.constant 0.000000e+00 : f32
    %1 = vector.broadcast %cst_0 : f32 to vector<1x32x128xf32>
    %c0_i32 = arith.constant 0 : i32
    %c0 = arith.constant 0 : index
    %c0_1 = arith.constant 0 : index
    %2 = arith.index_cast %c0_i32 : i32 to index
    %c0_2 = arith.constant 0 : index
    %3 = vector.load %arg3[%c0, %c0_1, %2, %c0_2] : memref<2x1x32x128xf32, #tpu.memory_space<vmem>>, vector<1x1x1x128xf32>
    %4 = vector.shape_cast %3 : vector<1x1x1x128xf32> to vector<1x1x128xf32>
    %c1 = arith.constant 1 : index
    %c0_3 = arith.constant 0 : index
    %5 = arith.index_cast %c0_i32 : i32 to index
    %c0_4 = arith.constant 0 : index
    %6 = vector.load %arg3[%c1, %c0_3, %5, %c0_4] : memref<2x1x32x128xf32, #tpu.memory_space<vmem>>, vector<1x1x1x128xf32>
    %7 = vector.shape_cast %6 : vector<1x1x1x128xf32> to vector<1x1x128xf32>
    %c0_5 = arith.constant 0 : index
    %8 = arith.index_cast %c0_i32 : i32 to index
    %c0_6 = arith.constant 0 : index
    %c0_7 = arith.constant 0 : index
    %9 = vector.load %arg4[%c0_5, %8, %c0_6, %c0_7] : memref<2x32x32x128xf32, #tpu.memory_space<vmem>>, vector<1x1x32x128xf32>
    %10 = vector.shape_cast %9 : vector<1x1x32x128xf32> to vector<1x32x128xf32>
    %c1_8 = arith.constant 1 : index
    %11 = arith.index_cast %c0_i32 : i32 to index
    %c0_9 = arith.constant 0 : index
    %c0_10 = arith.constant 0 : index
    %12 = vector.load %arg4[%c1_8, %11, %c0_9, %c0_10] : memref<2x32x32x128xf32, #tpu.memory_space<vmem>>, vector<1x1x32x128xf32>
    %13 = vector.shape_cast %12 : vector<1x1x32x128xf32> to vector<1x32x128xf32>
    %14 = vector.broadcast %4 : vector<1x1x128xf32> to vector<1x32x128xf32>
    %15 = arith.mulf %14, %10 : vector<1x32x128xf32>
    %16 = vector.broadcast %7 : vector<1x1x128xf32> to vector<1x32x128xf32>
    %17 = arith.mulf %16, %13 : vector<1x32x128xf32>
    %18 = arith.subf %15, %17 : vector<1x32x128xf32>
    %19 = arith.addf %0, %18 : vector<1x32x128xf32>
    %20 = vector.broadcast %4 : vector<1x1x128xf32> to vector<1x32x128xf32>
    %21 = arith.mulf %20, %13 : vector<1x32x128xf32>
    %22 = vector.broadcast %7 : vector<1x1x128xf32> to vector<1x32x128xf32>
    %23 = arith.mulf %22, %10 : vector<1x32x128xf32>
    %24 = arith.addf %21, %23 : vector<1x32x128xf32>
    %25 = arith.addf %1, %24 : vector<1x32x128xf32>
    %c1_i32 = arith.constant 1 : i32
    %c0_11 = arith.constant 0 : index
    %c0_12 = arith.constant 0 : index
    %26 = arith.index_cast %c1_i32 : i32 to index
    %c0_13 = arith.constant 0 : index
    %27 = vector.load %arg3[%c0_11, %c0_12, %26, %c0_13] : memref<2x1x32x128xf32, #tpu.memory_space<vmem>>, vector<1x1x1x128xf32>
    %28 = vector.shape_cast %27 : vector<1x1x1x128xf32> to vector<1x1x128xf32>
    %c1_14 = arith.constant 1 : index
    %c0_15 = arith.constant 0 : index
    %29 = arith.index_cast %c1_i32 : i32 to index
    %c0_16 = arith.constant 0 : index
    %30 = vector.load %arg3[%c1_14, %c0_15, %29, %c0_16] : memref<2x1x32x128xf32, #tpu.memory_space<vmem>>, vector<1x1x1x128xf32>
    %31 = vector.shape_cast %30 : vector<1x1x1x128xf32> to vector<1x1x128xf32>
    %c0_17 = arith.constant 0 : index
    %32 = arith.index_cast %c1_i32 : i32 to index
    %c0_18 = arith.constant 0 : index
    %c0_19 = arith.constant 0 : index
    %33 = vector.load %arg4[%c0_17, %32, %c0_18, %c0_19] : memref<2x32x32x128xf32, #tpu.memory_space<vmem>>, vector<1x1x32x128xf32>
    %34 = vector.shape_cast %33 : vector<1x1x32x128xf32> to vector<1x32x128xf32>
    %c1_20 = arith.constant 1 : index
    %35 = arith.index_cast %c1_i32 : i32 to index
    %c0_21 = arith.constant 0 : index
    %c0_22 = arith.constant 0 : index
    %36 = vector.load %arg4[%c1_20, %35, %c0_21, %c0_22] : memref<2x32x32x128xf32, #tpu.memory_space<vmem>>, vector<1x1x32x128xf32>
    %37 = vector.shape_cast %36 : vector<1x1x32x128xf32> to vector<1x32x128xf32>
    %38 = vector.broadcast %28 : vector<1x1x128xf32> to vector<1x32x128xf32>
    %39 = arith.mulf %38, %34 : vector<1x32x128xf32>
    %40 = vector.broadcast %31 : vector<1x1x128xf32> to vector<1x32x128xf32>
    %41 = arith.mulf %40, %37 : vector<1x32x128xf32>
    %42 = arith.subf %39, %41 : vector<1x32x128xf32>
    %43 = arith.addf %19, %42 : vector<1x32x128xf32>
    %44 = vector.broadcast %28 : vector<1x1x128xf32> to vector<1x32x128xf32>
    %45 = arith.mulf %44, %37 : vector<1x32x128xf32>
    %46 = vector.broadcast %31 : vector<1x1x128xf32> to vector<1x32x128xf32>
    %47 = arith.mulf %46, %34 : vector<1x32x128xf32>
    %48 = arith.addf %45, %47 : vector<1x32x128xf32>
    %49 = arith.addf %25, %48 : vector<1x32x128xf32>
    %c2_i32 = arith.constant 2 : i32
    %c0_23 = arith.constant 0 : index
    %c0_24 = arith.constant 0 : index
    %50 = arith.index_cast %c2_i32 : i32 to index
    %c0_25 = arith.constant 0 : index
    %51 = vector.load %arg3[%c0_23, %c0_24, %50, %c0_25] : memref<2x1x32x128xf32, #tpu.memory_space<vmem>>, vector<1x1x1x128xf32>
    %52 = vector.shape_cast %51 : vector<1x1x1x128xf32> to vector<1x1x128xf32>
    %c1_26 = arith.constant 1 : index
    %c0_27 = arith.constant 0 : index
    %53 = arith.index_cast %c2_i32 : i32 to index
    %c0_28 = arith.constant 0 : index
    %54 = vector.load %arg3[%c1_26, %c0_27, %53, %c0_28] : memref<2x1x32x128xf32, #tpu.memory_space<vmem>>, vector<1x1x1x128xf32>
    %55 = vector.shape_cast %54 : vector<1x1x1x128xf32> to vector<1x1x128xf32>
    %c0_29 = arith.constant 0 : index
    %56 = arith.index_cast %c2_i32 : i32 to index
    %c0_30 = arith.constant 0 : index
    %c0_31 = arith.constant 0 : index
    %57 = vector.load %arg4[%c0_29, %56, %c0_30, %c0_31] : memref<2x32x32x128xf32, #tpu.memory_space<vmem>>, vector<1x1x32x128xf32>
    %58 = vector.shape_cast %57 : vector<1x1x32x128xf32> to vector<1x32x128xf32>
    %c1_32 = arith.constant 1 : index
    %59 = arith.index_cast %c2_i32 : i32 to index
    %c0_33 = arith.constant 0 : index
    %c0_34 = arith.constant 0 : index
    %60 = vector.load %arg4[%c1_32, %59, %c0_33, %c0_34] : memref<2x32x32x128xf32, #tpu.memory_space<vmem>>, vector<1x1x32x128xf32>
    %61 = vector.shape_cast %60 : vector<1x1x32x128xf32> to vector<1x32x128xf32>
    %62 = vector.broadcast %52 : vector<1x1x128xf32> to vector<1x32x128xf32>
    %63 = arith.mulf %62, %58 : vector<1x32x128xf32>
    %64 = vector.broadcast %55 : vector<1x1x128xf32> to vector<1x32x128xf32>
    %65 = arith.mulf %64, %61 : vector<1x32x128xf32>
    %66 = arith.subf %63, %65 : vector<1x32x128xf32>
    %67 = arith.addf %43, %66 : vector<1x32x128xf32>
    %68 = vector.broadcast %52 : vector<1x1x128xf32> to vector<1x32x128xf32>
    %69 = arith.mulf %68, %61 : vector<1x32x128xf32>
    %70 = vector.broadcast %55 : vector<1x1x128xf32> to vector<1x32x128xf32>
    %71 = arith.mulf %70, %58 : vector<1x32x128xf32>
    %72 = arith.addf %69, %71 : vector<1x32x128xf32>
    %73 = arith.addf %49, %72 : vector<1x32x128xf32>
    %c3_i32 = arith.constant 3 : i32
    %c0_35 = arith.constant 0 : index
    %c0_36 = arith.constant 0 : index
    %74 = arith.index_cast %c3_i32 : i32 to index
    %c0_37 = arith.constant 0 : index
    %75 = vector.load %arg3[%c0_35, %c0_36, %74, %c0_37] : memref<2x1x32x128xf32, #tpu.memory_space<vmem>>, vector<1x1x1x128xf32>
    %76 = vector.shape_cast %75 : vector<1x1x1x128xf32> to vector<1x1x128xf32>
    %c1_38 = arith.constant 1 : index
    %c0_39 = arith.constant 0 : index
    %77 = arith.index_cast %c3_i32 : i32 to index
    %c0_40 = arith.constant 0 : index
    %78 = vector.load %arg3[%c1_38, %c0_39, %77, %c0_40] : memref<2x1x32x128xf32, #tpu.memory_space<vmem>>, vector<1x1x1x128xf32>
    %79 = vector.shape_cast %78 : vector<1x1x1x128xf32> to vector<1x1x128xf32>
    %c0_41 = arith.constant 0 : index
    %80 = arith.index_cast %c3_i32 : i32 to index
    %c0_42 = arith.constant 0 : index
    %c0_43 = arith.constant 0 : index
    %81 = vector.load %arg4[%c0_41, %80, %c0_42, %c0_43] : memref<2x32x32x128xf32, #tpu.memory_space<vmem>>, vector<1x1x32x128xf32>
    %82 = vector.shape_cast %81 : vector<1x1x32x128xf32> to vector<1x32x128xf32>
    %c1_44 = arith.constant 1 : index
    %83 = arith.index_cast %c3_i32 : i32 to index
    %c0_45 = arith.constant 0 : index
    %c0_46 = arith.constant 0 : index
    %84 = vector.load %arg4[%c1_44, %83, %c0_45, %c0_46] : memref<2x32x32x128xf32, #tpu.memory_space<vmem>>, vector<1x1x32x128xf32>
    %85 = vector.shape_cast %84 : vector<1x1x32x128xf32> to vector<1x32x128xf32>
    %86 = vector.broadcast %76 : vector<1x1x128xf32> to vector<1x32x128xf32>
    %87 = arith.mulf %86, %82 : vector<1x32x128xf32>
    %88 = vector.broadcast %79 : vector<1x1x128xf32> to vector<1x32x128xf32>
    %89 = arith.mulf %88, %85 : vector<1x32x128xf32>
    %90 = arith.subf %87, %89 : vector<1x32x128xf32>
    %91 = arith.addf %67, %90 : vector<1x32x128xf32>
    %92 = vector.broadcast %76 : vector<1x1x128xf32> to vector<1x32x128xf32>
    %93 = arith.mulf %92, %85 : vector<1x32x128xf32>
    %94 = vector.broadcast %79 : vector<1x1x128xf32> to vector<1x32x128xf32>
    %95 = arith.mulf %94, %82 : vector<1x32x128xf32>
    %96 = arith.addf %93, %95 : vector<1x32x128xf32>
    %97 = arith.addf %73, %96 : vector<1x32x128xf32>
    %c4_i32 = arith.constant 4 : i32
    %c0_47 = arith.constant 0 : index
    %c0_48 = arith.constant 0 : index
    %98 = arith.index_cast %c4_i32 : i32 to index
    %c0_49 = arith.constant 0 : index
    %99 = vector.load %arg3[%c0_47, %c0_48, %98, %c0_49] : memref<2x1x32x128xf32, #tpu.memory_space<vmem>>, vector<1x1x1x128xf32>
    %100 = vector.shape_cast %99 : vector<1x1x1x128xf32> to vector<1x1x128xf32>
    %c1_50 = arith.constant 1 : index
    %c0_51 = arith.constant 0 : index
    %101 = arith.index_cast %c4_i32 : i32 to index
    %c0_52 = arith.constant 0 : index
    %102 = vector.load %arg3[%c1_50, %c0_51, %101, %c0_52] : memref<2x1x32x128xf32, #tpu.memory_space<vmem>>, vector<1x1x1x128xf32>
    %103 = vector.shape_cast %102 : vector<1x1x1x128xf32> to vector<1x1x128xf32>
    %c0_53 = arith.constant 0 : index
    %104 = arith.index_cast %c4_i32 : i32 to index
    %c0_54 = arith.constant 0 : index
    %c0_55 = arith.constant 0 : index
    %105 = vector.load %arg4[%c0_53, %104, %c0_54, %c0_55] : memref<2x32x32x128xf32, #tpu.memory_space<vmem>>, vector<1x1x32x128xf32>
    %106 = vector.shape_cast %105 : vector<1x1x32x128xf32> to vector<1x32x128xf32>
    %c1_56 = arith.constant 1 : index
    %107 = arith.index_cast %c4_i32 : i32 to index
    %c0_57 = arith.constant 0 : index
    %c0_58 = arith.constant 0 : index
    %108 = vector.load %arg4[%c1_56, %107, %c0_57, %c0_58] : memref<2x32x32x128xf32, #tpu.memory_space<vmem>>, vector<1x1x32x128xf32>
    %109 = vector.shape_cast %108 : vector<1x1x32x128xf32> to vector<1x32x128xf32>
    %110 = vector.broadcast %100 : vector<1x1x128xf32> to vector<1x32x128xf32>
    %111 = arith.mulf %110, %106 : vector<1x32x128xf32>
    %112 = vector.broadcast %103 : vector<1x1x128xf32> to vector<1x32x128xf32>
    %113 = arith.mulf %112, %109 : vector<1x32x128xf32>
    %114 = arith.subf %111, %113 : vector<1x32x128xf32>
    %115 = arith.addf %91, %114 : vector<1x32x128xf32>
    %116 = vector.broadcast %100 : vector<1x1x128xf32> to vector<1x32x128xf32>
    %117 = arith.mulf %116, %109 : vector<1x32x128xf32>
    %118 = vector.broadcast %103 : vector<1x1x128xf32> to vector<1x32x128xf32>
    %119 = arith.mulf %118, %106 : vector<1x32x128xf32>
    %120 = arith.addf %117, %119 : vector<1x32x128xf32>
    %121 = arith.addf %97, %120 : vector<1x32x128xf32>
    %c5_i32 = arith.constant 5 : i32
    %c0_59 = arith.constant 0 : index
    %c0_60 = arith.constant 0 : index
    %122 = arith.index_cast %c5_i32 : i32 to index
    %c0_61 = arith.constant 0 : index
    %123 = vector.load %arg3[%c0_59, %c0_60, %122, %c0_61] : memref<2x1x32x128xf32, #tpu.memory_space<vmem>>, vector<1x1x1x128xf32>
    %124 = vector.shape_cast %123 : vector<1x1x1x128xf32> to vector<1x1x128xf32>
    %c1_62 = arith.constant 1 : index
    %c0_63 = arith.constant 0 : index
    %125 = arith.index_cast %c5_i32 : i32 to index
    %c0_64 = arith.constant 0 : index
    %126 = vector.load %arg3[%c1_62, %c0_63, %125, %c0_64] : memref<2x1x32x128xf32, #tpu.memory_space<vmem>>, vector<1x1x1x128xf32>
    %127 = vector.shape_cast %126 : vector<1x1x1x128xf32> to vector<1x1x128xf32>
    %c0_65 = arith.constant 0 : index
    %128 = arith.index_cast %c5_i32 : i32 to index
    %c0_66 = arith.constant 0 : index
    %c0_67 = arith.constant 0 : index
    %129 = vector.load %arg4[%c0_65, %128, %c0_66, %c0_67] : memref<2x32x32x128xf32, #tpu.memory_space<vmem>>, vector<1x1x32x128xf32>
    %130 = vector.shape_cast %129 : vector<1x1x32x128xf32> to vector<1x32x128xf32>
    %c1_68 = arith.constant 1 : index
    %131 = arith.index_cast %c5_i32 : i32 to index
    %c0_69 = arith.constant 0 : index
    %c0_70 = arith.constant 0 : index
    %132 = vector.load %arg4[%c1_68, %131, %c0_69, %c0_70] : memref<2x32x32x128xf32, #tpu.memory_space<vmem>>, vector<1x1x32x128xf32>
    %133 = vector.shape_cast %132 : vector<1x1x32x128xf32> to vector<1x32x128xf32>
    %134 = vector.broadcast %124 : vector<1x1x128xf32> to vector<1x32x128xf32>
    %135 = arith.mulf %134, %130 : vector<1x32x128xf32>
    %136 = vector.broadcast %127 : vector<1x1x128xf32> to vector<1x32x128xf32>
    %137 = arith.mulf %136, %133 : vector<1x32x128xf32>
    %138 = arith.subf %135, %137 : vector<1x32x128xf32>
    %139 = arith.addf %115, %138 : vector<1x32x128xf32>
    %140 = vector.broadcast %124 : vector<1x1x128xf32> to vector<1x32x128xf32>
    %141 = arith.mulf %140, %133 : vector<1x32x128xf32>
    %142 = vector.broadcast %127 : vector<1x1x128xf32> to vector<1x32x128xf32>
    %143 = arith.mulf %142, %130 : vector<1x32x128xf32>
    %144 = arith.addf %141, %143 : vector<1x32x128xf32>
    %145 = arith.addf %121, %144 : vector<1x32x128xf32>
    %c6_i32 = arith.constant 6 : i32
    %c0_71 = arith.constant 0 : index
    %c0_72 = arith.constant 0 : index
    %146 = arith.index_cast %c6_i32 : i32 to index
    %c0_73 = arith.constant 0 : index
    %147 = vector.load %arg3[%c0_71, %c0_72, %146, %c0_73] : memref<2x1x32x128xf32, #tpu.memory_space<vmem>>, vector<1x1x1x128xf32>
    %148 = vector.shape_cast %147 : vector<1x1x1x128xf32> to vector<1x1x128xf32>
    %c1_74 = arith.constant 1 : index
    %c0_75 = arith.constant 0 : index
    %149 = arith.index_cast %c6_i32 : i32 to index
    %c0_76 = arith.constant 0 : index
    %150 = vector.load %arg3[%c1_74, %c0_75, %149, %c0_76] : memref<2x1x32x128xf32, #tpu.memory_space<vmem>>, vector<1x1x1x128xf32>
    %151 = vector.shape_cast %150 : vector<1x1x1x128xf32> to vector<1x1x128xf32>
    %c0_77 = arith.constant 0 : index
    %152 = arith.index_cast %c6_i32 : i32 to index
    %c0_78 = arith.constant 0 : index
    %c0_79 = arith.constant 0 : index
    %153 = vector.load %arg4[%c0_77, %152, %c0_78, %c0_79] : memref<2x32x32x128xf32, #tpu.memory_space<vmem>>, vector<1x1x32x128xf32>
    %154 = vector.shape_cast %153 : vector<1x1x32x128xf32> to vector<1x32x128xf32>
    %c1_80 = arith.constant 1 : index
    %155 = arith.index_cast %c6_i32 : i32 to index
    %c0_81 = arith.constant 0 : index
    %c0_82 = arith.constant 0 : index
    %156 = vector.load %arg4[%c1_80, %155, %c0_81, %c0_82] : memref<2x32x32x128xf32, #tpu.memory_space<vmem>>, vector<1x1x32x128xf32>
    %157 = vector.shape_cast %156 : vector<1x1x32x128xf32> to vector<1x32x128xf32>
    %158 = vector.broadcast %148 : vector<1x1x128xf32> to vector<1x32x128xf32>
    %159 = arith.mulf %158, %154 : vector<1x32x128xf32>
    %160 = vector.broadcast %151 : vector<1x1x128xf32> to vector<1x32x128xf32>
    %161 = arith.mulf %160, %157 : vector<1x32x128xf32>
    %162 = arith.subf %159, %161 : vector<1x32x128xf32>
    %163 = arith.addf %139, %162 : vector<1x32x128xf32>
    %164 = vector.broadcast %148 : vector<1x1x128xf32> to vector<1x32x128xf32>
    %165 = arith.mulf %164, %157 : vector<1x32x128xf32>
    %166 = vector.broadcast %151 : vector<1x1x128xf32> to vector<1x32x128xf32>
    %167 = arith.mulf %166, %154 : vector<1x32x128xf32>
    %168 = arith.addf %165, %167 : vector<1x32x128xf32>
    %169 = arith.addf %145, %168 : vector<1x32x128xf32>
    %c7_i32 = arith.constant 7 : i32
    %c0_83 = arith.constant 0 : index
    %c0_84 = arith.constant 0 : index
    %170 = arith.index_cast %c7_i32 : i32 to index
    %c0_85 = arith.constant 0 : index
    %171 = vector.load %arg3[%c0_83, %c0_84, %170, %c0_85] : memref<2x1x32x128xf32, #tpu.memory_space<vmem>>, vector<1x1x1x128xf32>
    %172 = vector.shape_cast %171 : vector<1x1x1x128xf32> to vector<1x1x128xf32>
    %c1_86 = arith.constant 1 : index
    %c0_87 = arith.constant 0 : index
    %173 = arith.index_cast %c7_i32 : i32 to index
    %c0_88 = arith.constant 0 : index
    %174 = vector.load %arg3[%c1_86, %c0_87, %173, %c0_88] : memref<2x1x32x128xf32, #tpu.memory_space<vmem>>, vector<1x1x1x128xf32>
    %175 = vector.shape_cast %174 : vector<1x1x1x128xf32> to vector<1x1x128xf32>
    %c0_89 = arith.constant 0 : index
    %176 = arith.index_cast %c7_i32 : i32 to index
    %c0_90 = arith.constant 0 : index
    %c0_91 = arith.constant 0 : index
    %177 = vector.load %arg4[%c0_89, %176, %c0_90, %c0_91] : memref<2x32x32x128xf32, #tpu.memory_space<vmem>>, vector<1x1x32x128xf32>
    %178 = vector.shape_cast %177 : vector<1x1x32x128xf32> to vector<1x32x128xf32>
    %c1_92 = arith.constant 1 : index
    %179 = arith.index_cast %c7_i32 : i32 to index
    %c0_93 = arith.constant 0 : index
    %c0_94 = arith.constant 0 : index
    %180 = vector.load %arg4[%c1_92, %179, %c0_93, %c0_94] : memref<2x32x32x128xf32, #tpu.memory_space<vmem>>, vector<1x1x32x128xf32>
    %181 = vector.shape_cast %180 : vector<1x1x32x128xf32> to vector<1x32x128xf32>
    %182 = vector.broadcast %172 : vector<1x1x128xf32> to vector<1x32x128xf32>
    %183 = arith.mulf %182, %178 : vector<1x32x128xf32>
    %184 = vector.broadcast %175 : vector<1x1x128xf32> to vector<1x32x128xf32>
    %185 = arith.mulf %184, %181 : vector<1x32x128xf32>
    %186 = arith.subf %183, %185 : vector<1x32x128xf32>
    %187 = arith.addf %163, %186 : vector<1x32x128xf32>
    %188 = vector.broadcast %172 : vector<1x1x128xf32> to vector<1x32x128xf32>
    %189 = arith.mulf %188, %181 : vector<1x32x128xf32>
    %190 = vector.broadcast %175 : vector<1x1x128xf32> to vector<1x32x128xf32>
    %191 = arith.mulf %190, %178 : vector<1x32x128xf32>
    %192 = arith.addf %189, %191 : vector<1x32x128xf32>
    %193 = arith.addf %169, %192 : vector<1x32x128xf32>
    %c8_i32 = arith.constant 8 : i32
    %c0_95 = arith.constant 0 : index
    %c0_96 = arith.constant 0 : index
    %194 = arith.index_cast %c8_i32 : i32 to index
    %c0_97 = arith.constant 0 : index
    %195 = vector.load %arg3[%c0_95, %c0_96, %194, %c0_97] : memref<2x1x32x128xf32, #tpu.memory_space<vmem>>, vector<1x1x1x128xf32>
    %196 = vector.shape_cast %195 : vector<1x1x1x128xf32> to vector<1x1x128xf32>
    %c1_98 = arith.constant 1 : index
    %c0_99 = arith.constant 0 : index
    %197 = arith.index_cast %c8_i32 : i32 to index
    %c0_100 = arith.constant 0 : index
    %198 = vector.load %arg3[%c1_98, %c0_99, %197, %c0_100] : memref<2x1x32x128xf32, #tpu.memory_space<vmem>>, vector<1x1x1x128xf32>
    %199 = vector.shape_cast %198 : vector<1x1x1x128xf32> to vector<1x1x128xf32>
    %c0_101 = arith.constant 0 : index
    %200 = arith.index_cast %c8_i32 : i32 to index
    %c0_102 = arith.constant 0 : index
    %c0_103 = arith.constant 0 : index
    %201 = vector.load %arg4[%c0_101, %200, %c0_102, %c0_103] : memref<2x32x32x128xf32, #tpu.memory_space<vmem>>, vector<1x1x32x128xf32>
    %202 = vector.shape_cast %201 : vector<1x1x32x128xf32> to vector<1x32x128xf32>
    %c1_104 = arith.constant 1 : index
    %203 = arith.index_cast %c8_i32 : i32 to index
    %c0_105 = arith.constant 0 : index
    %c0_106 = arith.constant 0 : index
    %204 = vector.load %arg4[%c1_104, %203, %c0_105, %c0_106] : memref<2x32x32x128xf32, #tpu.memory_space<vmem>>, vector<1x1x32x128xf32>
    %205 = vector.shape_cast %204 : vector<1x1x32x128xf32> to vector<1x32x128xf32>
    %206 = vector.broadcast %196 : vector<1x1x128xf32> to vector<1x32x128xf32>
    %207 = arith.mulf %206, %202 : vector<1x32x128xf32>
    %208 = vector.broadcast %199 : vector<1x1x128xf32> to vector<1x32x128xf32>
    %209 = arith.mulf %208, %205 : vector<1x32x128xf32>
    %210 = arith.subf %207, %209 : vector<1x32x128xf32>
    %211 = arith.addf %187, %210 : vector<1x32x128xf32>
    %212 = vector.broadcast %196 : vector<1x1x128xf32> to vector<1x32x128xf32>
    %213 = arith.mulf %212, %205 : vector<1x32x128xf32>
    %214 = vector.broadcast %199 : vector<1x1x128xf32> to vector<1x32x128xf32>
    %215 = arith.mulf %214, %202 : vector<1x32x128xf32>
    %216 = arith.addf %213, %215 : vector<1x32x128xf32>
    %217 = arith.addf %193, %216 : vector<1x32x128xf32>
    %c9_i32 = arith.constant 9 : i32
    %c0_107 = arith.constant 0 : index
    %c0_108 = arith.constant 0 : index
    %218 = arith.index_cast %c9_i32 : i32 to index
    %c0_109 = arith.constant 0 : index
    %219 = vector.load %arg3[%c0_107, %c0_108, %218, %c0_109] : memref<2x1x32x128xf32, #tpu.memory_space<vmem>>, vector<1x1x1x128xf32>
    %220 = vector.shape_cast %219 : vector<1x1x1x128xf32> to vector<1x1x128xf32>
    %c1_110 = arith.constant 1 : index
    %c0_111 = arith.constant 0 : index
    %221 = arith.index_cast %c9_i32 : i32 to index
    %c0_112 = arith.constant 0 : index
    %222 = vector.load %arg3[%c1_110, %c0_111, %221, %c0_112] : memref<2x1x32x128xf32, #tpu.memory_space<vmem>>, vector<1x1x1x128xf32>
    %223 = vector.shape_cast %222 : vector<1x1x1x128xf32> to vector<1x1x128xf32>
    %c0_113 = arith.constant 0 : index
    %224 = arith.index_cast %c9_i32 : i32 to index
    %c0_114 = arith.constant 0 : index
    %c0_115 = arith.constant 0 : index
    %225 = vector.load %arg4[%c0_113, %224, %c0_114, %c0_115] : memref<2x32x32x128xf32, #tpu.memory_space<vmem>>, vector<1x1x32x128xf32>
    %226 = vector.shape_cast %225 : vector<1x1x32x128xf32> to vector<1x32x128xf32>
    %c1_116 = arith.constant 1 : index
    %227 = arith.index_cast %c9_i32 : i32 to index
    %c0_117 = arith.constant 0 : index
    %c0_118 = arith.constant 0 : index
    %228 = vector.load %arg4[%c1_116, %227, %c0_117, %c0_118] : memref<2x32x32x128xf32, #tpu.memory_space<vmem>>, vector<1x1x32x128xf32>
    %229 = vector.shape_cast %228 : vector<1x1x32x128xf32> to vector<1x32x128xf32>
    %230 = vector.broadcast %220 : vector<1x1x128xf32> to vector<1x32x128xf32>
    %231 = arith.mulf %230, %226 : vector<1x32x128xf32>
    %232 = vector.broadcast %223 : vector<1x1x128xf32> to vector<1x32x128xf32>
    %233 = arith.mulf %232, %229 : vector<1x32x128xf32>
    %234 = arith.subf %231, %233 : vector<1x32x128xf32>
    %235 = arith.addf %211, %234 : vector<1x32x128xf32>
    %236 = vector.broadcast %220 : vector<1x1x128xf32> to vector<1x32x128xf32>
    %237 = arith.mulf %236, %229 : vector<1x32x128xf32>
    %238 = vector.broadcast %223 : vector<1x1x128xf32> to vector<1x32x128xf32>
    %239 = arith.mulf %238, %226 : vector<1x32x128xf32>
    %240 = arith.addf %237, %239 : vector<1x32x128xf32>
    %241 = arith.addf %217, %240 : vector<1x32x128xf32>
    %c10_i32 = arith.constant 10 : i32
    %c0_119 = arith.constant 0 : index
    %c0_120 = arith.constant 0 : index
    %242 = arith.index_cast %c10_i32 : i32 to index
    %c0_121 = arith.constant 0 : index
    %243 = vector.load %arg3[%c0_119, %c0_120, %242, %c0_121] : memref<2x1x32x128xf32, #tpu.memory_space<vmem>>, vector<1x1x1x128xf32>
    %244 = vector.shape_cast %243 : vector<1x1x1x128xf32> to vector<1x1x128xf32>
    %c1_122 = arith.constant 1 : index
    %c0_123 = arith.constant 0 : index
    %245 = arith.index_cast %c10_i32 : i32 to index
    %c0_124 = arith.constant 0 : index
    %246 = vector.load %arg3[%c1_122, %c0_123, %245, %c0_124] : memref<2x1x32x128xf32, #tpu.memory_space<vmem>>, vector<1x1x1x128xf32>
    %247 = vector.shape_cast %246 : vector<1x1x1x128xf32> to vector<1x1x128xf32>
    %c0_125 = arith.constant 0 : index
    %248 = arith.index_cast %c10_i32 : i32 to index
    %c0_126 = arith.constant 0 : index
    %c0_127 = arith.constant 0 : index
    %249 = vector.load %arg4[%c0_125, %248, %c0_126, %c0_127] : memref<2x32x32x128xf32, #tpu.memory_space<vmem>>, vector<1x1x32x128xf32>
    %250 = vector.shape_cast %249 : vector<1x1x32x128xf32> to vector<1x32x128xf32>
    %c1_128 = arith.constant 1 : index
    %251 = arith.index_cast %c10_i32 : i32 to index
    %c0_129 = arith.constant 0 : index
    %c0_130 = arith.constant 0 : index
    %252 = vector.load %arg4[%c1_128, %251, %c0_129, %c0_130] : memref<2x32x32x128xf32, #tpu.memory_space<vmem>>, vector<1x1x32x128xf32>
    %253 = vector.shape_cast %252 : vector<1x1x32x128xf32> to vector<1x32x128xf32>
    %254 = vector.broadcast %244 : vector<1x1x128xf32> to vector<1x32x128xf32>
    %255 = arith.mulf %254, %250 : vector<1x32x128xf32>
    %256 = vector.broadcast %247 : vector<1x1x128xf32> to vector<1x32x128xf32>
    %257 = arith.mulf %256, %253 : vector<1x32x128xf32>
    %258 = arith.subf %255, %257 : vector<1x32x128xf32>
    %259 = arith.addf %235, %258 : vector<1x32x128xf32>
    %260 = vector.broadcast %244 : vector<1x1x128xf32> to vector<1x32x128xf32>
    %261 = arith.mulf %260, %253 : vector<1x32x128xf32>
    %262 = vector.broadcast %247 : vector<1x1x128xf32> to vector<1x32x128xf32>
    %263 = arith.mulf %262, %250 : vector<1x32x128xf32>
    %264 = arith.addf %261, %263 : vector<1x32x128xf32>
    %265 = arith.addf %241, %264 : vector<1x32x128xf32>
    %c11_i32 = arith.constant 11 : i32
    %c0_131 = arith.constant 0 : index
    %c0_132 = arith.constant 0 : index
    %266 = arith.index_cast %c11_i32 : i32 to index
    %c0_133 = arith.constant 0 : index
    %267 = vector.load %arg3[%c0_131, %c0_132, %266, %c0_133] : memref<2x1x32x128xf32, #tpu.memory_space<vmem>>, vector<1x1x1x128xf32>
    %268 = vector.shape_cast %267 : vector<1x1x1x128xf32> to vector<1x1x128xf32>
    %c1_134 = arith.constant 1 : index
    %c0_135 = arith.constant 0 : index
    %269 = arith.index_cast %c11_i32 : i32 to index
    %c0_136 = arith.constant 0 : index
    %270 = vector.load %arg3[%c1_134, %c0_135, %269, %c0_136] : memref<2x1x32x128xf32, #tpu.memory_space<vmem>>, vector<1x1x1x128xf32>
    %271 = vector.shape_cast %270 : vector<1x1x1x128xf32> to vector<1x1x128xf32>
    %c0_137 = arith.constant 0 : index
    %272 = arith.index_cast %c11_i32 : i32 to index
    %c0_138 = arith.constant 0 : index
    %c0_139 = arith.constant 0 : index
    %273 = vector.load %arg4[%c0_137, %272, %c0_138, %c0_139] : memref<2x32x32x128xf32, #tpu.memory_space<vmem>>, vector<1x1x32x128xf32>
    %274 = vector.shape_cast %273 : vector<1x1x32x128xf32> to vector<1x32x128xf32>
    %c1_140 = arith.constant 1 : index
    %275 = arith.index_cast %c11_i32 : i32 to index
    %c0_141 = arith.constant 0 : index
    %c0_142 = arith.constant 0 : index
    %276 = vector.load %arg4[%c1_140, %275, %c0_141, %c0_142] : memref<2x32x32x128xf32, #tpu.memory_space<vmem>>, vector<1x1x32x128xf32>
    %277 = vector.shape_cast %276 : vector<1x1x32x128xf32> to vector<1x32x128xf32>
    %278 = vector.broadcast %268 : vector<1x1x128xf32> to vector<1x32x128xf32>
    %279 = arith.mulf %278, %274 : vector<1x32x128xf32>
    %280 = vector.broadcast %271 : vector<1x1x128xf32> to vector<1x32x128xf32>
    %281 = arith.mulf %280, %277 : vector<1x32x128xf32>
    %282 = arith.subf %279, %281 : vector<1x32x128xf32>
    %283 = arith.addf %259, %282 : vector<1x32x128xf32>
    %284 = vector.broadcast %268 : vector<1x1x128xf32> to vector<1x32x128xf32>
    %285 = arith.mulf %284, %277 : vector<1x32x128xf32>
    %286 = vector.broadcast %271 : vector<1x1x128xf32> to vector<1x32x128xf32>
    %287 = arith.mulf %286, %274 : vector<1x32x128xf32>
    %288 = arith.addf %285, %287 : vector<1x32x128xf32>
    %289 = arith.addf %265, %288 : vector<1x32x128xf32>
    %c12_i32 = arith.constant 12 : i32
    %c0_143 = arith.constant 0 : index
    %c0_144 = arith.constant 0 : index
    %290 = arith.index_cast %c12_i32 : i32 to index
    %c0_145 = arith.constant 0 : index
    %291 = vector.load %arg3[%c0_143, %c0_144, %290, %c0_145] : memref<2x1x32x128xf32, #tpu.memory_space<vmem>>, vector<1x1x1x128xf32>
    %292 = vector.shape_cast %291 : vector<1x1x1x128xf32> to vector<1x1x128xf32>
    %c1_146 = arith.constant 1 : index
    %c0_147 = arith.constant 0 : index
    %293 = arith.index_cast %c12_i32 : i32 to index
    %c0_148 = arith.constant 0 : index
    %294 = vector.load %arg3[%c1_146, %c0_147, %293, %c0_148] : memref<2x1x32x128xf32, #tpu.memory_space<vmem>>, vector<1x1x1x128xf32>
    %295 = vector.shape_cast %294 : vector<1x1x1x128xf32> to vector<1x1x128xf32>
    %c0_149 = arith.constant 0 : index
    %296 = arith.index_cast %c12_i32 : i32 to index
    %c0_150 = arith.constant 0 : index
    %c0_151 = arith.constant 0 : index
    %297 = vector.load %arg4[%c0_149, %296, %c0_150, %c0_151] : memref<2x32x32x128xf32, #tpu.memory_space<vmem>>, vector<1x1x32x128xf32>
    %298 = vector.shape_cast %297 : vector<1x1x32x128xf32> to vector<1x32x128xf32>
    %c1_152 = arith.constant 1 : index
    %299 = arith.index_cast %c12_i32 : i32 to index
    %c0_153 = arith.constant 0 : index
    %c0_154 = arith.constant 0 : index
    %300 = vector.load %arg4[%c1_152, %299, %c0_153, %c0_154] : memref<2x32x32x128xf32, #tpu.memory_space<vmem>>, vector<1x1x32x128xf32>
    %301 = vector.shape_cast %300 : vector<1x1x32x128xf32> to vector<1x32x128xf32>
    %302 = vector.broadcast %292 : vector<1x1x128xf32> to vector<1x32x128xf32>
    %303 = arith.mulf %302, %298 : vector<1x32x128xf32>
    %304 = vector.broadcast %295 : vector<1x1x128xf32> to vector<1x32x128xf32>
    %305 = arith.mulf %304, %301 : vector<1x32x128xf32>
    %306 = arith.subf %303, %305 : vector<1x32x128xf32>
    %307 = arith.addf %283, %306 : vector<1x32x128xf32>
    %308 = vector.broadcast %292 : vector<1x1x128xf32> to vector<1x32x128xf32>
    %309 = arith.mulf %308, %301 : vector<1x32x128xf32>
    %310 = vector.broadcast %295 : vector<1x1x128xf32> to vector<1x32x128xf32>
    %311 = arith.mulf %310, %298 : vector<1x32x128xf32>
    %312 = arith.addf %309, %311 : vector<1x32x128xf32>
    %313 = arith.addf %289, %312 : vector<1x32x128xf32>
    %c13_i32 = arith.constant 13 : i32
    %c0_155 = arith.constant 0 : index
    %c0_156 = arith.constant 0 : index
    %314 = arith.index_cast %c13_i32 : i32 to index
    %c0_157 = arith.constant 0 : index
    %315 = vector.load %arg3[%c0_155, %c0_156, %314, %c0_157] : memref<2x1x32x128xf32, #tpu.memory_space<vmem>>, vector<1x1x1x128xf32>
    %316 = vector.shape_cast %315 : vector<1x1x1x128xf32> to vector<1x1x128xf32>
    %c1_158 = arith.constant 1 : index
    %c0_159 = arith.constant 0 : index
    %317 = arith.index_cast %c13_i32 : i32 to index
    %c0_160 = arith.constant 0 : index
    %318 = vector.load %arg3[%c1_158, %c0_159, %317, %c0_160] : memref<2x1x32x128xf32, #tpu.memory_space<vmem>>, vector<1x1x1x128xf32>
    %319 = vector.shape_cast %318 : vector<1x1x1x128xf32> to vector<1x1x128xf32>
    %c0_161 = arith.constant 0 : index
    %320 = arith.index_cast %c13_i32 : i32 to index
    %c0_162 = arith.constant 0 : index
    %c0_163 = arith.constant 0 : index
    %321 = vector.load %arg4[%c0_161, %320, %c0_162, %c0_163] : memref<2x32x32x128xf32, #tpu.memory_space<vmem>>, vector<1x1x32x128xf32>
    %322 = vector.shape_cast %321 : vector<1x1x32x128xf32> to vector<1x32x128xf32>
    %c1_164 = arith.constant 1 : index
    %323 = arith.index_cast %c13_i32 : i32 to index
    %c0_165 = arith.constant 0 : index
    %c0_166 = arith.constant 0 : index
    %324 = vector.load %arg4[%c1_164, %323, %c0_165, %c0_166] : memref<2x32x32x128xf32, #tpu.memory_space<vmem>>, vector<1x1x32x128xf32>
    %325 = vector.shape_cast %324 : vector<1x1x32x128xf32> to vector<1x32x128xf32>
    %326 = vector.broadcast %316 : vector<1x1x128xf32> to vector<1x32x128xf32>
    %327 = arith.mulf %326, %322 : vector<1x32x128xf32>
    %328 = vector.broadcast %319 : vector<1x1x128xf32> to vector<1x32x128xf32>
    %329 = arith.mulf %328, %325 : vector<1x32x128xf32>
    %330 = arith.subf %327, %329 : vector<1x32x128xf32>
    %331 = arith.addf %307, %330 : vector<1x32x128xf32>
    %332 = vector.broadcast %316 : vector<1x1x128xf32> to vector<1x32x128xf32>
    %333 = arith.mulf %332, %325 : vector<1x32x128xf32>
    %334 = vector.broadcast %319 : vector<1x1x128xf32> to vector<1x32x128xf32>
    %335 = arith.mulf %334, %322 : vector<1x32x128xf32>
    %336 = arith.addf %333, %335 : vector<1x32x128xf32>
    %337 = arith.addf %313, %336 : vector<1x32x128xf32>
    %c14_i32 = arith.constant 14 : i32
    %c0_167 = arith.constant 0 : index
    %c0_168 = arith.constant 0 : index
    %338 = arith.index_cast %c14_i32 : i32 to index
    %c0_169 = arith.constant 0 : index
    %339 = vector.load %arg3[%c0_167, %c0_168, %338, %c0_169] : memref<2x1x32x128xf32, #tpu.memory_space<vmem>>, vector<1x1x1x128xf32>
    %340 = vector.shape_cast %339 : vector<1x1x1x128xf32> to vector<1x1x128xf32>
    %c1_170 = arith.constant 1 : index
    %c0_171 = arith.constant 0 : index
    %341 = arith.index_cast %c14_i32 : i32 to index
    %c0_172 = arith.constant 0 : index
    %342 = vector.load %arg3[%c1_170, %c0_171, %341, %c0_172] : memref<2x1x32x128xf32, #tpu.memory_space<vmem>>, vector<1x1x1x128xf32>
    %343 = vector.shape_cast %342 : vector<1x1x1x128xf32> to vector<1x1x128xf32>
    %c0_173 = arith.constant 0 : index
    %344 = arith.index_cast %c14_i32 : i32 to index
    %c0_174 = arith.constant 0 : index
    %c0_175 = arith.constant 0 : index
    %345 = vector.load %arg4[%c0_173, %344, %c0_174, %c0_175] : memref<2x32x32x128xf32, #tpu.memory_space<vmem>>, vector<1x1x32x128xf32>
    %346 = vector.shape_cast %345 : vector<1x1x32x128xf32> to vector<1x32x128xf32>
    %c1_176 = arith.constant 1 : index
    %347 = arith.index_cast %c14_i32 : i32 to index
    %c0_177 = arith.constant 0 : index
    %c0_178 = arith.constant 0 : index
    %348 = vector.load %arg4[%c1_176, %347, %c0_177, %c0_178] : memref<2x32x32x128xf32, #tpu.memory_space<vmem>>, vector<1x1x32x128xf32>
    %349 = vector.shape_cast %348 : vector<1x1x32x128xf32> to vector<1x32x128xf32>
    %350 = vector.broadcast %340 : vector<1x1x128xf32> to vector<1x32x128xf32>
    %351 = arith.mulf %350, %346 : vector<1x32x128xf32>
    %352 = vector.broadcast %343 : vector<1x1x128xf32> to vector<1x32x128xf32>
    %353 = arith.mulf %352, %349 : vector<1x32x128xf32>
    %354 = arith.subf %351, %353 : vector<1x32x128xf32>
    %355 = arith.addf %331, %354 : vector<1x32x128xf32>
    %356 = vector.broadcast %340 : vector<1x1x128xf32> to vector<1x32x128xf32>
    %357 = arith.mulf %356, %349 : vector<1x32x128xf32>
    %358 = vector.broadcast %343 : vector<1x1x128xf32> to vector<1x32x128xf32>
    %359 = arith.mulf %358, %346 : vector<1x32x128xf32>
    %360 = arith.addf %357, %359 : vector<1x32x128xf32>
    %361 = arith.addf %337, %360 : vector<1x32x128xf32>
    %c15_i32 = arith.constant 15 : i32
    %c0_179 = arith.constant 0 : index
    %c0_180 = arith.constant 0 : index
    %362 = arith.index_cast %c15_i32 : i32 to index
    %c0_181 = arith.constant 0 : index
    %363 = vector.load %arg3[%c0_179, %c0_180, %362, %c0_181] : memref<2x1x32x128xf32, #tpu.memory_space<vmem>>, vector<1x1x1x128xf32>
    %364 = vector.shape_cast %363 : vector<1x1x1x128xf32> to vector<1x1x128xf32>
    %c1_182 = arith.constant 1 : index
    %c0_183 = arith.constant 0 : index
    %365 = arith.index_cast %c15_i32 : i32 to index
    %c0_184 = arith.constant 0 : index
    %366 = vector.load %arg3[%c1_182, %c0_183, %365, %c0_184] : memref<2x1x32x128xf32, #tpu.memory_space<vmem>>, vector<1x1x1x128xf32>
    %367 = vector.shape_cast %366 : vector<1x1x1x128xf32> to vector<1x1x128xf32>
    %c0_185 = arith.constant 0 : index
    %368 = arith.index_cast %c15_i32 : i32 to index
    %c0_186 = arith.constant 0 : index
    %c0_187 = arith.constant 0 : index
    %369 = vector.load %arg4[%c0_185, %368, %c0_186, %c0_187] : memref<2x32x32x128xf32, #tpu.memory_space<vmem>>, vector<1x1x32x128xf32>
    %370 = vector.shape_cast %369 : vector<1x1x32x128xf32> to vector<1x32x128xf32>
    %c1_188 = arith.constant 1 : index
    %371 = arith.index_cast %c15_i32 : i32 to index
    %c0_189 = arith.constant 0 : index
    %c0_190 = arith.constant 0 : index
    %372 = vector.load %arg4[%c1_188, %371, %c0_189, %c0_190] : memref<2x32x32x128xf32, #tpu.memory_space<vmem>>, vector<1x1x32x128xf32>
    %373 = vector.shape_cast %372 : vector<1x1x32x128xf32> to vector<1x32x128xf32>
    %374 = vector.broadcast %364 : vector<1x1x128xf32> to vector<1x32x128xf32>
    %375 = arith.mulf %374, %370 : vector<1x32x128xf32>
    %376 = vector.broadcast %367 : vector<1x1x128xf32> to vector<1x32x128xf32>
    %377 = arith.mulf %376, %373 : vector<1x32x128xf32>
    %378 = arith.subf %375, %377 : vector<1x32x128xf32>
    %379 = arith.addf %355, %378 : vector<1x32x128xf32>
    %380 = vector.broadcast %364 : vector<1x1x128xf32> to vector<1x32x128xf32>
    %381 = arith.mulf %380, %373 : vector<1x32x128xf32>
    %382 = vector.broadcast %367 : vector<1x1x128xf32> to vector<1x32x128xf32>
    %383 = arith.mulf %382, %370 : vector<1x32x128xf32>
    %384 = arith.addf %381, %383 : vector<1x32x128xf32>
    %385 = arith.addf %361, %384 : vector<1x32x128xf32>
    %c16_i32 = arith.constant 16 : i32
    %c0_191 = arith.constant 0 : index
    %c0_192 = arith.constant 0 : index
    %386 = arith.index_cast %c16_i32 : i32 to index
    %c0_193 = arith.constant 0 : index
    %387 = vector.load %arg3[%c0_191, %c0_192, %386, %c0_193] : memref<2x1x32x128xf32, #tpu.memory_space<vmem>>, vector<1x1x1x128xf32>
    %388 = vector.shape_cast %387 : vector<1x1x1x128xf32> to vector<1x1x128xf32>
    %c1_194 = arith.constant 1 : index
    %c0_195 = arith.constant 0 : index
    %389 = arith.index_cast %c16_i32 : i32 to index
    %c0_196 = arith.constant 0 : index
    %390 = vector.load %arg3[%c1_194, %c0_195, %389, %c0_196] : memref<2x1x32x128xf32, #tpu.memory_space<vmem>>, vector<1x1x1x128xf32>
    %391 = vector.shape_cast %390 : vector<1x1x1x128xf32> to vector<1x1x128xf32>
    %c0_197 = arith.constant 0 : index
    %392 = arith.index_cast %c16_i32 : i32 to index
    %c0_198 = arith.constant 0 : index
    %c0_199 = arith.constant 0 : index
    %393 = vector.load %arg4[%c0_197, %392, %c0_198, %c0_199] : memref<2x32x32x128xf32, #tpu.memory_space<vmem>>, vector<1x1x32x128xf32>
    %394 = vector.shape_cast %393 : vector<1x1x32x128xf32> to vector<1x32x128xf32>
    %c1_200 = arith.constant 1 : index
    %395 = arith.index_cast %c16_i32 : i32 to index
    %c0_201 = arith.constant 0 : index
    %c0_202 = arith.constant 0 : index
    %396 = vector.load %arg4[%c1_200, %395, %c0_201, %c0_202] : memref<2x32x32x128xf32, #tpu.memory_space<vmem>>, vector<1x1x32x128xf32>
    %397 = vector.shape_cast %396 : vector<1x1x32x128xf32> to vector<1x32x128xf32>
    %398 = vector.broadcast %388 : vector<1x1x128xf32> to vector<1x32x128xf32>
    %399 = arith.mulf %398, %394 : vector<1x32x128xf32>
    %400 = vector.broadcast %391 : vector<1x1x128xf32> to vector<1x32x128xf32>
    %401 = arith.mulf %400, %397 : vector<1x32x128xf32>
    %402 = arith.subf %399, %401 : vector<1x32x128xf32>
    %403 = arith.addf %379, %402 : vector<1x32x128xf32>
    %404 = vector.broadcast %388 : vector<1x1x128xf32> to vector<1x32x128xf32>
    %405 = arith.mulf %404, %397 : vector<1x32x128xf32>
    %406 = vector.broadcast %391 : vector<1x1x128xf32> to vector<1x32x128xf32>
    %407 = arith.mulf %406, %394 : vector<1x32x128xf32>
    %408 = arith.addf %405, %407 : vector<1x32x128xf32>
    %409 = arith.addf %385, %408 : vector<1x32x128xf32>
    %c17_i32 = arith.constant 17 : i32
    %c0_203 = arith.constant 0 : index
    %c0_204 = arith.constant 0 : index
    %410 = arith.index_cast %c17_i32 : i32 to index
    %c0_205 = arith.constant 0 : index
    %411 = vector.load %arg3[%c0_203, %c0_204, %410, %c0_205] : memref<2x1x32x128xf32, #tpu.memory_space<vmem>>, vector<1x1x1x128xf32>
    %412 = vector.shape_cast %411 : vector<1x1x1x128xf32> to vector<1x1x128xf32>
    %c1_206 = arith.constant 1 : index
    %c0_207 = arith.constant 0 : index
    %413 = arith.index_cast %c17_i32 : i32 to index
    %c0_208 = arith.constant 0 : index
    %414 = vector.load %arg3[%c1_206, %c0_207, %413, %c0_208] : memref<2x1x32x128xf32, #tpu.memory_space<vmem>>, vector<1x1x1x128xf32>
    %415 = vector.shape_cast %414 : vector<1x1x1x128xf32> to vector<1x1x128xf32>
    %c0_209 = arith.constant 0 : index
    %416 = arith.index_cast %c17_i32 : i32 to index
    %c0_210 = arith.constant 0 : index
    %c0_211 = arith.constant 0 : index
    %417 = vector.load %arg4[%c0_209, %416, %c0_210, %c0_211] : memref<2x32x32x128xf32, #tpu.memory_space<vmem>>, vector<1x1x32x128xf32>
    %418 = vector.shape_cast %417 : vector<1x1x32x128xf32> to vector<1x32x128xf32>
    %c1_212 = arith.constant 1 : index
    %419 = arith.index_cast %c17_i32 : i32 to index
    %c0_213 = arith.constant 0 : index
    %c0_214 = arith.constant 0 : index
    %420 = vector.load %arg4[%c1_212, %419, %c0_213, %c0_214] : memref<2x32x32x128xf32, #tpu.memory_space<vmem>>, vector<1x1x32x128xf32>
    %421 = vector.shape_cast %420 : vector<1x1x32x128xf32> to vector<1x32x128xf32>
    %422 = vector.broadcast %412 : vector<1x1x128xf32> to vector<1x32x128xf32>
    %423 = arith.mulf %422, %418 : vector<1x32x128xf32>
    %424 = vector.broadcast %415 : vector<1x1x128xf32> to vector<1x32x128xf32>
    %425 = arith.mulf %424, %421 : vector<1x32x128xf32>
    %426 = arith.subf %423, %425 : vector<1x32x128xf32>
    %427 = arith.addf %403, %426 : vector<1x32x128xf32>
    %428 = vector.broadcast %412 : vector<1x1x128xf32> to vector<1x32x128xf32>
    %429 = arith.mulf %428, %421 : vector<1x32x128xf32>
    %430 = vector.broadcast %415 : vector<1x1x128xf32> to vector<1x32x128xf32>
    %431 = arith.mulf %430, %418 : vector<1x32x128xf32>
    %432 = arith.addf %429, %431 : vector<1x32x128xf32>
    %433 = arith.addf %409, %432 : vector<1x32x128xf32>
    %c18_i32 = arith.constant 18 : i32
    %c0_215 = arith.constant 0 : index
    %c0_216 = arith.constant 0 : index
    %434 = arith.index_cast %c18_i32 : i32 to index
    %c0_217 = arith.constant 0 : index
    %435 = vector.load %arg3[%c0_215, %c0_216, %434, %c0_217] : memref<2x1x32x128xf32, #tpu.memory_space<vmem>>, vector<1x1x1x128xf32>
    %436 = vector.shape_cast %435 : vector<1x1x1x128xf32> to vector<1x1x128xf32>
    %c1_218 = arith.constant 1 : index
    %c0_219 = arith.constant 0 : index
    %437 = arith.index_cast %c18_i32 : i32 to index
    %c0_220 = arith.constant 0 : index
    %438 = vector.load %arg3[%c1_218, %c0_219, %437, %c0_220] : memref<2x1x32x128xf32, #tpu.memory_space<vmem>>, vector<1x1x1x128xf32>
    %439 = vector.shape_cast %438 : vector<1x1x1x128xf32> to vector<1x1x128xf32>
    %c0_221 = arith.constant 0 : index
    %440 = arith.index_cast %c18_i32 : i32 to index
    %c0_222 = arith.constant 0 : index
    %c0_223 = arith.constant 0 : index
    %441 = vector.load %arg4[%c0_221, %440, %c0_222, %c0_223] : memref<2x32x32x128xf32, #tpu.memory_space<vmem>>, vector<1x1x32x128xf32>
    %442 = vector.shape_cast %441 : vector<1x1x32x128xf32> to vector<1x32x128xf32>
    %c1_224 = arith.constant 1 : index
    %443 = arith.index_cast %c18_i32 : i32 to index
    %c0_225 = arith.constant 0 : index
    %c0_226 = arith.constant 0 : index
    %444 = vector.load %arg4[%c1_224, %443, %c0_225, %c0_226] : memref<2x32x32x128xf32, #tpu.memory_space<vmem>>, vector<1x1x32x128xf32>
    %445 = vector.shape_cast %444 : vector<1x1x32x128xf32> to vector<1x32x128xf32>
    %446 = vector.broadcast %436 : vector<1x1x128xf32> to vector<1x32x128xf32>
    %447 = arith.mulf %446, %442 : vector<1x32x128xf32>
    %448 = vector.broadcast %439 : vector<1x1x128xf32> to vector<1x32x128xf32>
    %449 = arith.mulf %448, %445 : vector<1x32x128xf32>
    %450 = arith.subf %447, %449 : vector<1x32x128xf32>
    %451 = arith.addf %427, %450 : vector<1x32x128xf32>
    %452 = vector.broadcast %436 : vector<1x1x128xf32> to vector<1x32x128xf32>
    %453 = arith.mulf %452, %445 : vector<1x32x128xf32>
    %454 = vector.broadcast %439 : vector<1x1x128xf32> to vector<1x32x128xf32>
    %455 = arith.mulf %454, %442 : vector<1x32x128xf32>
    %456 = arith.addf %453, %455 : vector<1x32x128xf32>
    %457 = arith.addf %433, %456 : vector<1x32x128xf32>
    %c19_i32 = arith.constant 19 : i32
    %c0_227 = arith.constant 0 : index
    %c0_228 = arith.constant 0 : index
    %458 = arith.index_cast %c19_i32 : i32 to index
    %c0_229 = arith.constant 0 : index
    %459 = vector.load %arg3[%c0_227, %c0_228, %458, %c0_229] : memref<2x1x32x128xf32, #tpu.memory_space<vmem>>, vector<1x1x1x128xf32>
    %460 = vector.shape_cast %459 : vector<1x1x1x128xf32> to vector<1x1x128xf32>
    %c1_230 = arith.constant 1 : index
    %c0_231 = arith.constant 0 : index
    %461 = arith.index_cast %c19_i32 : i32 to index
    %c0_232 = arith.constant 0 : index
    %462 = vector.load %arg3[%c1_230, %c0_231, %461, %c0_232] : memref<2x1x32x128xf32, #tpu.memory_space<vmem>>, vector<1x1x1x128xf32>
    %463 = vector.shape_cast %462 : vector<1x1x1x128xf32> to vector<1x1x128xf32>
    %c0_233 = arith.constant 0 : index
    %464 = arith.index_cast %c19_i32 : i32 to index
    %c0_234 = arith.constant 0 : index
    %c0_235 = arith.constant 0 : index
    %465 = vector.load %arg4[%c0_233, %464, %c0_234, %c0_235] : memref<2x32x32x128xf32, #tpu.memory_space<vmem>>, vector<1x1x32x128xf32>
    %466 = vector.shape_cast %465 : vector<1x1x32x128xf32> to vector<1x32x128xf32>
    %c1_236 = arith.constant 1 : index
    %467 = arith.index_cast %c19_i32 : i32 to index
    %c0_237 = arith.constant 0 : index
    %c0_238 = arith.constant 0 : index
    %468 = vector.load %arg4[%c1_236, %467, %c0_237, %c0_238] : memref<2x32x32x128xf32, #tpu.memory_space<vmem>>, vector<1x1x32x128xf32>
    %469 = vector.shape_cast %468 : vector<1x1x32x128xf32> to vector<1x32x128xf32>
    %470 = vector.broadcast %460 : vector<1x1x128xf32> to vector<1x32x128xf32>
    %471 = arith.mulf %470, %466 : vector<1x32x128xf32>
    %472 = vector.broadcast %463 : vector<1x1x128xf32> to vector<1x32x128xf32>
    %473 = arith.mulf %472, %469 : vector<1x32x128xf32>
    %474 = arith.subf %471, %473 : vector<1x32x128xf32>
    %475 = arith.addf %451, %474 : vector<1x32x128xf32>
    %476 = vector.broadcast %460 : vector<1x1x128xf32> to vector<1x32x128xf32>
    %477 = arith.mulf %476, %469 : vector<1x32x128xf32>
    %478 = vector.broadcast %463 : vector<1x1x128xf32> to vector<1x32x128xf32>
    %479 = arith.mulf %478, %466 : vector<1x32x128xf32>
    %480 = arith.addf %477, %479 : vector<1x32x128xf32>
    %481 = arith.addf %457, %480 : vector<1x32x128xf32>
    %c20_i32 = arith.constant 20 : i32
    %c0_239 = arith.constant 0 : index
    %c0_240 = arith.constant 0 : index
    %482 = arith.index_cast %c20_i32 : i32 to index
    %c0_241 = arith.constant 0 : index
    %483 = vector.load %arg3[%c0_239, %c0_240, %482, %c0_241] : memref<2x1x32x128xf32, #tpu.memory_space<vmem>>, vector<1x1x1x128xf32>
    %484 = vector.shape_cast %483 : vector<1x1x1x128xf32> to vector<1x1x128xf32>
    %c1_242 = arith.constant 1 : index
    %c0_243 = arith.constant 0 : index
    %485 = arith.index_cast %c20_i32 : i32 to index
    %c0_244 = arith.constant 0 : index
    %486 = vector.load %arg3[%c1_242, %c0_243, %485, %c0_244] : memref<2x1x32x128xf32, #tpu.memory_space<vmem>>, vector<1x1x1x128xf32>
    %487 = vector.shape_cast %486 : vector<1x1x1x128xf32> to vector<1x1x128xf32>
    %c0_245 = arith.constant 0 : index
    %488 = arith.index_cast %c20_i32 : i32 to index
    %c0_246 = arith.constant 0 : index
    %c0_247 = arith.constant 0 : index
    %489 = vector.load %arg4[%c0_245, %488, %c0_246, %c0_247] : memref<2x32x32x128xf32, #tpu.memory_space<vmem>>, vector<1x1x32x128xf32>
    %490 = vector.shape_cast %489 : vector<1x1x32x128xf32> to vector<1x32x128xf32>
    %c1_248 = arith.constant 1 : index
    %491 = arith.index_cast %c20_i32 : i32 to index
    %c0_249 = arith.constant 0 : index
    %c0_250 = arith.constant 0 : index
    %492 = vector.load %arg4[%c1_248, %491, %c0_249, %c0_250] : memref<2x32x32x128xf32, #tpu.memory_space<vmem>>, vector<1x1x32x128xf32>
    %493 = vector.shape_cast %492 : vector<1x1x32x128xf32> to vector<1x32x128xf32>
    %494 = vector.broadcast %484 : vector<1x1x128xf32> to vector<1x32x128xf32>
    %495 = arith.mulf %494, %490 : vector<1x32x128xf32>
    %496 = vector.broadcast %487 : vector<1x1x128xf32> to vector<1x32x128xf32>
    %497 = arith.mulf %496, %493 : vector<1x32x128xf32>
    %498 = arith.subf %495, %497 : vector<1x32x128xf32>
    %499 = arith.addf %475, %498 : vector<1x32x128xf32>
    %500 = vector.broadcast %484 : vector<1x1x128xf32> to vector<1x32x128xf32>
    %501 = arith.mulf %500, %493 : vector<1x32x128xf32>
    %502 = vector.broadcast %487 : vector<1x1x128xf32> to vector<1x32x128xf32>
    %503 = arith.mulf %502, %490 : vector<1x32x128xf32>
    %504 = arith.addf %501, %503 : vector<1x32x128xf32>
    %505 = arith.addf %481, %504 : vector<1x32x128xf32>
    %c21_i32 = arith.constant 21 : i32
    %c0_251 = arith.constant 0 : index
    %c0_252 = arith.constant 0 : index
    %506 = arith.index_cast %c21_i32 : i32 to index
    %c0_253 = arith.constant 0 : index
    %507 = vector.load %arg3[%c0_251, %c0_252, %506, %c0_253] : memref<2x1x32x128xf32, #tpu.memory_space<vmem>>, vector<1x1x1x128xf32>
    %508 = vector.shape_cast %507 : vector<1x1x1x128xf32> to vector<1x1x128xf32>
    %c1_254 = arith.constant 1 : index
    %c0_255 = arith.constant 0 : index
    %509 = arith.index_cast %c21_i32 : i32 to index
    %c0_256 = arith.constant 0 : index
    %510 = vector.load %arg3[%c1_254, %c0_255, %509, %c0_256] : memref<2x1x32x128xf32, #tpu.memory_space<vmem>>, vector<1x1x1x128xf32>
    %511 = vector.shape_cast %510 : vector<1x1x1x128xf32> to vector<1x1x128xf32>
    %c0_257 = arith.constant 0 : index
    %512 = arith.index_cast %c21_i32 : i32 to index
    %c0_258 = arith.constant 0 : index
    %c0_259 = arith.constant 0 : index
    %513 = vector.load %arg4[%c0_257, %512, %c0_258, %c0_259] : memref<2x32x32x128xf32, #tpu.memory_space<vmem>>, vector<1x1x32x128xf32>
    %514 = vector.shape_cast %513 : vector<1x1x32x128xf32> to vector<1x32x128xf32>
    %c1_260 = arith.constant 1 : index
    %515 = arith.index_cast %c21_i32 : i32 to index
    %c0_261 = arith.constant 0 : index
    %c0_262 = arith.constant 0 : index
    %516 = vector.load %arg4[%c1_260, %515, %c0_261, %c0_262] : memref<2x32x32x128xf32, #tpu.memory_space<vmem>>, vector<1x1x32x128xf32>
    %517 = vector.shape_cast %516 : vector<1x1x32x128xf32> to vector<1x32x128xf32>
    %518 = vector.broadcast %508 : vector<1x1x128xf32> to vector<1x32x128xf32>
    %519 = arith.mulf %518, %514 : vector<1x32x128xf32>
    %520 = vector.broadcast %511 : vector<1x1x128xf32> to vector<1x32x128xf32>
    %521 = arith.mulf %520, %517 : vector<1x32x128xf32>
    %522 = arith.subf %519, %521 : vector<1x32x128xf32>
    %523 = arith.addf %499, %522 : vector<1x32x128xf32>
    %524 = vector.broadcast %508 : vector<1x1x128xf32> to vector<1x32x128xf32>
    %525 = arith.mulf %524, %517 : vector<1x32x128xf32>
    %526 = vector.broadcast %511 : vector<1x1x128xf32> to vector<1x32x128xf32>
    %527 = arith.mulf %526, %514 : vector<1x32x128xf32>
    %528 = arith.addf %525, %527 : vector<1x32x128xf32>
    %529 = arith.addf %505, %528 : vector<1x32x128xf32>
    %c22_i32 = arith.constant 22 : i32
    %c0_263 = arith.constant 0 : index
    %c0_264 = arith.constant 0 : index
    %530 = arith.index_cast %c22_i32 : i32 to index
    %c0_265 = arith.constant 0 : index
    %531 = vector.load %arg3[%c0_263, %c0_264, %530, %c0_265] : memref<2x1x32x128xf32, #tpu.memory_space<vmem>>, vector<1x1x1x128xf32>
    %532 = vector.shape_cast %531 : vector<1x1x1x128xf32> to vector<1x1x128xf32>
    %c1_266 = arith.constant 1 : index
    %c0_267 = arith.constant 0 : index
    %533 = arith.index_cast %c22_i32 : i32 to index
    %c0_268 = arith.constant 0 : index
    %534 = vector.load %arg3[%c1_266, %c0_267, %533, %c0_268] : memref<2x1x32x128xf32, #tpu.memory_space<vmem>>, vector<1x1x1x128xf32>
    %535 = vector.shape_cast %534 : vector<1x1x1x128xf32> to vector<1x1x128xf32>
    %c0_269 = arith.constant 0 : index
    %536 = arith.index_cast %c22_i32 : i32 to index
    %c0_270 = arith.constant 0 : index
    %c0_271 = arith.constant 0 : index
    %537 = vector.load %arg4[%c0_269, %536, %c0_270, %c0_271] : memref<2x32x32x128xf32, #tpu.memory_space<vmem>>, vector<1x1x32x128xf32>
    %538 = vector.shape_cast %537 : vector<1x1x32x128xf32> to vector<1x32x128xf32>
    %c1_272 = arith.constant 1 : index
    %539 = arith.index_cast %c22_i32 : i32 to index
    %c0_273 = arith.constant 0 : index
    %c0_274 = arith.constant 0 : index
    %540 = vector.load %arg4[%c1_272, %539, %c0_273, %c0_274] : memref<2x32x32x128xf32, #tpu.memory_space<vmem>>, vector<1x1x32x128xf32>
    %541 = vector.shape_cast %540 : vector<1x1x32x128xf32> to vector<1x32x128xf32>
    %542 = vector.broadcast %532 : vector<1x1x128xf32> to vector<1x32x128xf32>
    %543 = arith.mulf %542, %538 : vector<1x32x128xf32>
    %544 = vector.broadcast %535 : vector<1x1x128xf32> to vector<1x32x128xf32>
    %545 = arith.mulf %544, %541 : vector<1x32x128xf32>
    %546 = arith.subf %543, %545 : vector<1x32x128xf32>
    %547 = arith.addf %523, %546 : vector<1x32x128xf32>
    %548 = vector.broadcast %532 : vector<1x1x128xf32> to vector<1x32x128xf32>
    %549 = arith.mulf %548, %541 : vector<1x32x128xf32>
    %550 = vector.broadcast %535 : vector<1x1x128xf32> to vector<1x32x128xf32>
    %551 = arith.mulf %550, %538 : vector<1x32x128xf32>
    %552 = arith.addf %549, %551 : vector<1x32x128xf32>
    %553 = arith.addf %529, %552 : vector<1x32x128xf32>
    %c23_i32 = arith.constant 23 : i32
    %c0_275 = arith.constant 0 : index
    %c0_276 = arith.constant 0 : index
    %554 = arith.index_cast %c23_i32 : i32 to index
    %c0_277 = arith.constant 0 : index
    %555 = vector.load %arg3[%c0_275, %c0_276, %554, %c0_277] : memref<2x1x32x128xf32, #tpu.memory_space<vmem>>, vector<1x1x1x128xf32>
    %556 = vector.shape_cast %555 : vector<1x1x1x128xf32> to vector<1x1x128xf32>
    %c1_278 = arith.constant 1 : index
    %c0_279 = arith.constant 0 : index
    %557 = arith.index_cast %c23_i32 : i32 to index
    %c0_280 = arith.constant 0 : index
    %558 = vector.load %arg3[%c1_278, %c0_279, %557, %c0_280] : memref<2x1x32x128xf32, #tpu.memory_space<vmem>>, vector<1x1x1x128xf32>
    %559 = vector.shape_cast %558 : vector<1x1x1x128xf32> to vector<1x1x128xf32>
    %c0_281 = arith.constant 0 : index
    %560 = arith.index_cast %c23_i32 : i32 to index
    %c0_282 = arith.constant 0 : index
    %c0_283 = arith.constant 0 : index
    %561 = vector.load %arg4[%c0_281, %560, %c0_282, %c0_283] : memref<2x32x32x128xf32, #tpu.memory_space<vmem>>, vector<1x1x32x128xf32>
    %562 = vector.shape_cast %561 : vector<1x1x32x128xf32> to vector<1x32x128xf32>
    %c1_284 = arith.constant 1 : index
    %563 = arith.index_cast %c23_i32 : i32 to index
    %c0_285 = arith.constant 0 : index
    %c0_286 = arith.constant 0 : index
    %564 = vector.load %arg4[%c1_284, %563, %c0_285, %c0_286] : memref<2x32x32x128xf32, #tpu.memory_space<vmem>>, vector<1x1x32x128xf32>
    %565 = vector.shape_cast %564 : vector<1x1x32x128xf32> to vector<1x32x128xf32>
    %566 = vector.broadcast %556 : vector<1x1x128xf32> to vector<1x32x128xf32>
    %567 = arith.mulf %566, %562 : vector<1x32x128xf32>
    %568 = vector.broadcast %559 : vector<1x1x128xf32> to vector<1x32x128xf32>
    %569 = arith.mulf %568, %565 : vector<1x32x128xf32>
    %570 = arith.subf %567, %569 : vector<1x32x128xf32>
    %571 = arith.addf %547, %570 : vector<1x32x128xf32>
    %572 = vector.broadcast %556 : vector<1x1x128xf32> to vector<1x32x128xf32>
    %573 = arith.mulf %572, %565 : vector<1x32x128xf32>
    %574 = vector.broadcast %559 : vector<1x1x128xf32> to vector<1x32x128xf32>
    %575 = arith.mulf %574, %562 : vector<1x32x128xf32>
    %576 = arith.addf %573, %575 : vector<1x32x128xf32>
    %577 = arith.addf %553, %576 : vector<1x32x128xf32>
    %c24_i32 = arith.constant 24 : i32
    %c0_287 = arith.constant 0 : index
    %c0_288 = arith.constant 0 : index
    %578 = arith.index_cast %c24_i32 : i32 to index
    %c0_289 = arith.constant 0 : index
    %579 = vector.load %arg3[%c0_287, %c0_288, %578, %c0_289] : memref<2x1x32x128xf32, #tpu.memory_space<vmem>>, vector<1x1x1x128xf32>
    %580 = vector.shape_cast %579 : vector<1x1x1x128xf32> to vector<1x1x128xf32>
    %c1_290 = arith.constant 1 : index
    %c0_291 = arith.constant 0 : index
    %581 = arith.index_cast %c24_i32 : i32 to index
    %c0_292 = arith.constant 0 : index
    %582 = vector.load %arg3[%c1_290, %c0_291, %581, %c0_292] : memref<2x1x32x128xf32, #tpu.memory_space<vmem>>, vector<1x1x1x128xf32>
    %583 = vector.shape_cast %582 : vector<1x1x1x128xf32> to vector<1x1x128xf32>
    %c0_293 = arith.constant 0 : index
    %584 = arith.index_cast %c24_i32 : i32 to index
    %c0_294 = arith.constant 0 : index
    %c0_295 = arith.constant 0 : index
    %585 = vector.load %arg4[%c0_293, %584, %c0_294, %c0_295] : memref<2x32x32x128xf32, #tpu.memory_space<vmem>>, vector<1x1x32x128xf32>
    %586 = vector.shape_cast %585 : vector<1x1x32x128xf32> to vector<1x32x128xf32>
    %c1_296 = arith.constant 1 : index
    %587 = arith.index_cast %c24_i32 : i32 to index
    %c0_297 = arith.constant 0 : index
    %c0_298 = arith.constant 0 : index
    %588 = vector.load %arg4[%c1_296, %587, %c0_297, %c0_298] : memref<2x32x32x128xf32, #tpu.memory_space<vmem>>, vector<1x1x32x128xf32>
    %589 = vector.shape_cast %588 : vector<1x1x32x128xf32> to vector<1x32x128xf32>
    %590 = vector.broadcast %580 : vector<1x1x128xf32> to vector<1x32x128xf32>
    %591 = arith.mulf %590, %586 : vector<1x32x128xf32>
    %592 = vector.broadcast %583 : vector<1x1x128xf32> to vector<1x32x128xf32>
    %593 = arith.mulf %592, %589 : vector<1x32x128xf32>
    %594 = arith.subf %591, %593 : vector<1x32x128xf32>
    %595 = arith.addf %571, %594 : vector<1x32x128xf32>
    %596 = vector.broadcast %580 : vector<1x1x128xf32> to vector<1x32x128xf32>
    %597 = arith.mulf %596, %589 : vector<1x32x128xf32>
    %598 = vector.broadcast %583 : vector<1x1x128xf32> to vector<1x32x128xf32>
    %599 = arith.mulf %598, %586 : vector<1x32x128xf32>
    %600 = arith.addf %597, %599 : vector<1x32x128xf32>
    %601 = arith.addf %577, %600 : vector<1x32x128xf32>
    %c25_i32 = arith.constant 25 : i32
    %c0_299 = arith.constant 0 : index
    %c0_300 = arith.constant 0 : index
    %602 = arith.index_cast %c25_i32 : i32 to index
    %c0_301 = arith.constant 0 : index
    %603 = vector.load %arg3[%c0_299, %c0_300, %602, %c0_301] : memref<2x1x32x128xf32, #tpu.memory_space<vmem>>, vector<1x1x1x128xf32>
    %604 = vector.shape_cast %603 : vector<1x1x1x128xf32> to vector<1x1x128xf32>
    %c1_302 = arith.constant 1 : index
    %c0_303 = arith.constant 0 : index
    %605 = arith.index_cast %c25_i32 : i32 to index
    %c0_304 = arith.constant 0 : index
    %606 = vector.load %arg3[%c1_302, %c0_303, %605, %c0_304] : memref<2x1x32x128xf32, #tpu.memory_space<vmem>>, vector<1x1x1x128xf32>
    %607 = vector.shape_cast %606 : vector<1x1x1x128xf32> to vector<1x1x128xf32>
    %c0_305 = arith.constant 0 : index
    %608 = arith.index_cast %c25_i32 : i32 to index
    %c0_306 = arith.constant 0 : index
    %c0_307 = arith.constant 0 : index
    %609 = vector.load %arg4[%c0_305, %608, %c0_306, %c0_307] : memref<2x32x32x128xf32, #tpu.memory_space<vmem>>, vector<1x1x32x128xf32>
    %610 = vector.shape_cast %609 : vector<1x1x32x128xf32> to vector<1x32x128xf32>
    %c1_308 = arith.constant 1 : index
    %611 = arith.index_cast %c25_i32 : i32 to index
    %c0_309 = arith.constant 0 : index
    %c0_310 = arith.constant 0 : index
    %612 = vector.load %arg4[%c1_308, %611, %c0_309, %c0_310] : memref<2x32x32x128xf32, #tpu.memory_space<vmem>>, vector<1x1x32x128xf32>
    %613 = vector.shape_cast %612 : vector<1x1x32x128xf32> to vector<1x32x128xf32>
    %614 = vector.broadcast %604 : vector<1x1x128xf32> to vector<1x32x128xf32>
    %615 = arith.mulf %614, %610 : vector<1x32x128xf32>
    %616 = vector.broadcast %607 : vector<1x1x128xf32> to vector<1x32x128xf32>
    %617 = arith.mulf %616, %613 : vector<1x32x128xf32>
    %618 = arith.subf %615, %617 : vector<1x32x128xf32>
    %619 = arith.addf %595, %618 : vector<1x32x128xf32>
    %620 = vector.broadcast %604 : vector<1x1x128xf32> to vector<1x32x128xf32>
    %621 = arith.mulf %620, %613 : vector<1x32x128xf32>
    %622 = vector.broadcast %607 : vector<1x1x128xf32> to vector<1x32x128xf32>
    %623 = arith.mulf %622, %610 : vector<1x32x128xf32>
    %624 = arith.addf %621, %623 : vector<1x32x128xf32>
    %625 = arith.addf %601, %624 : vector<1x32x128xf32>
    %c26_i32 = arith.constant 26 : i32
    %c0_311 = arith.constant 0 : index
    %c0_312 = arith.constant 0 : index
    %626 = arith.index_cast %c26_i32 : i32 to index
    %c0_313 = arith.constant 0 : index
    %627 = vector.load %arg3[%c0_311, %c0_312, %626, %c0_313] : memref<2x1x32x128xf32, #tpu.memory_space<vmem>>, vector<1x1x1x128xf32>
    %628 = vector.shape_cast %627 : vector<1x1x1x128xf32> to vector<1x1x128xf32>
    %c1_314 = arith.constant 1 : index
    %c0_315 = arith.constant 0 : index
    %629 = arith.index_cast %c26_i32 : i32 to index
    %c0_316 = arith.constant 0 : index
    %630 = vector.load %arg3[%c1_314, %c0_315, %629, %c0_316] : memref<2x1x32x128xf32, #tpu.memory_space<vmem>>, vector<1x1x1x128xf32>
    %631 = vector.shape_cast %630 : vector<1x1x1x128xf32> to vector<1x1x128xf32>
    %c0_317 = arith.constant 0 : index
    %632 = arith.index_cast %c26_i32 : i32 to index
    %c0_318 = arith.constant 0 : index
    %c0_319 = arith.constant 0 : index
    %633 = vector.load %arg4[%c0_317, %632, %c0_318, %c0_319] : memref<2x32x32x128xf32, #tpu.memory_space<vmem>>, vector<1x1x32x128xf32>
    %634 = vector.shape_cast %633 : vector<1x1x32x128xf32> to vector<1x32x128xf32>
    %c1_320 = arith.constant 1 : index
    %635 = arith.index_cast %c26_i32 : i32 to index
    %c0_321 = arith.constant 0 : index
    %c0_322 = arith.constant 0 : index
    %636 = vector.load %arg4[%c1_320, %635, %c0_321, %c0_322] : memref<2x32x32x128xf32, #tpu.memory_space<vmem>>, vector<1x1x32x128xf32>
    %637 = vector.shape_cast %636 : vector<1x1x32x128xf32> to vector<1x32x128xf32>
    %638 = vector.broadcast %628 : vector<1x1x128xf32> to vector<1x32x128xf32>
    %639 = arith.mulf %638, %634 : vector<1x32x128xf32>
    %640 = vector.broadcast %631 : vector<1x1x128xf32> to vector<1x32x128xf32>
    %641 = arith.mulf %640, %637 : vector<1x32x128xf32>
    %642 = arith.subf %639, %641 : vector<1x32x128xf32>
    %643 = arith.addf %619, %642 : vector<1x32x128xf32>
    %644 = vector.broadcast %628 : vector<1x1x128xf32> to vector<1x32x128xf32>
    %645 = arith.mulf %644, %637 : vector<1x32x128xf32>
    %646 = vector.broadcast %631 : vector<1x1x128xf32> to vector<1x32x128xf32>
    %647 = arith.mulf %646, %634 : vector<1x32x128xf32>
    %648 = arith.addf %645, %647 : vector<1x32x128xf32>
    %649 = arith.addf %625, %648 : vector<1x32x128xf32>
    %c27_i32 = arith.constant 27 : i32
    %c0_323 = arith.constant 0 : index
    %c0_324 = arith.constant 0 : index
    %650 = arith.index_cast %c27_i32 : i32 to index
    %c0_325 = arith.constant 0 : index
    %651 = vector.load %arg3[%c0_323, %c0_324, %650, %c0_325] : memref<2x1x32x128xf32, #tpu.memory_space<vmem>>, vector<1x1x1x128xf32>
    %652 = vector.shape_cast %651 : vector<1x1x1x128xf32> to vector<1x1x128xf32>
    %c1_326 = arith.constant 1 : index
    %c0_327 = arith.constant 0 : index
    %653 = arith.index_cast %c27_i32 : i32 to index
    %c0_328 = arith.constant 0 : index
    %654 = vector.load %arg3[%c1_326, %c0_327, %653, %c0_328] : memref<2x1x32x128xf32, #tpu.memory_space<vmem>>, vector<1x1x1x128xf32>
    %655 = vector.shape_cast %654 : vector<1x1x1x128xf32> to vector<1x1x128xf32>
    %c0_329 = arith.constant 0 : index
    %656 = arith.index_cast %c27_i32 : i32 to index
    %c0_330 = arith.constant 0 : index
    %c0_331 = arith.constant 0 : index
    %657 = vector.load %arg4[%c0_329, %656, %c0_330, %c0_331] : memref<2x32x32x128xf32, #tpu.memory_space<vmem>>, vector<1x1x32x128xf32>
    %658 = vector.shape_cast %657 : vector<1x1x32x128xf32> to vector<1x32x128xf32>
    %c1_332 = arith.constant 1 : index
    %659 = arith.index_cast %c27_i32 : i32 to index
    %c0_333 = arith.constant 0 : index
    %c0_334 = arith.constant 0 : index
    %660 = vector.load %arg4[%c1_332, %659, %c0_333, %c0_334] : memref<2x32x32x128xf32, #tpu.memory_space<vmem>>, vector<1x1x32x128xf32>
    %661 = vector.shape_cast %660 : vector<1x1x32x128xf32> to vector<1x32x128xf32>
    %662 = vector.broadcast %652 : vector<1x1x128xf32> to vector<1x32x128xf32>
    %663 = arith.mulf %662, %658 : vector<1x32x128xf32>
    %664 = vector.broadcast %655 : vector<1x1x128xf32> to vector<1x32x128xf32>
    %665 = arith.mulf %664, %661 : vector<1x32x128xf32>
    %666 = arith.subf %663, %665 : vector<1x32x128xf32>
    %667 = arith.addf %643, %666 : vector<1x32x128xf32>
    %668 = vector.broadcast %652 : vector<1x1x128xf32> to vector<1x32x128xf32>
    %669 = arith.mulf %668, %661 : vector<1x32x128xf32>
    %670 = vector.broadcast %655 : vector<1x1x128xf32> to vector<1x32x128xf32>
    %671 = arith.mulf %670, %658 : vector<1x32x128xf32>
    %672 = arith.addf %669, %671 : vector<1x32x128xf32>
    %673 = arith.addf %649, %672 : vector<1x32x128xf32>
    %c28_i32 = arith.constant 28 : i32
    %c0_335 = arith.constant 0 : index
    %c0_336 = arith.constant 0 : index
    %674 = arith.index_cast %c28_i32 : i32 to index
    %c0_337 = arith.constant 0 : index
    %675 = vector.load %arg3[%c0_335, %c0_336, %674, %c0_337] : memref<2x1x32x128xf32, #tpu.memory_space<vmem>>, vector<1x1x1x128xf32>
    %676 = vector.shape_cast %675 : vector<1x1x1x128xf32> to vector<1x1x128xf32>
    %c1_338 = arith.constant 1 : index
    %c0_339 = arith.constant 0 : index
    %677 = arith.index_cast %c28_i32 : i32 to index
    %c0_340 = arith.constant 0 : index
    %678 = vector.load %arg3[%c1_338, %c0_339, %677, %c0_340] : memref<2x1x32x128xf32, #tpu.memory_space<vmem>>, vector<1x1x1x128xf32>
    %679 = vector.shape_cast %678 : vector<1x1x1x128xf32> to vector<1x1x128xf32>
    %c0_341 = arith.constant 0 : index
    %680 = arith.index_cast %c28_i32 : i32 to index
    %c0_342 = arith.constant 0 : index
    %c0_343 = arith.constant 0 : index
    %681 = vector.load %arg4[%c0_341, %680, %c0_342, %c0_343] : memref<2x32x32x128xf32, #tpu.memory_space<vmem>>, vector<1x1x32x128xf32>
    %682 = vector.shape_cast %681 : vector<1x1x32x128xf32> to vector<1x32x128xf32>
    %c1_344 = arith.constant 1 : index
    %683 = arith.index_cast %c28_i32 : i32 to index
    %c0_345 = arith.constant 0 : index
    %c0_346 = arith.constant 0 : index
    %684 = vector.load %arg4[%c1_344, %683, %c0_345, %c0_346] : memref<2x32x32x128xf32, #tpu.memory_space<vmem>>, vector<1x1x32x128xf32>
    %685 = vector.shape_cast %684 : vector<1x1x32x128xf32> to vector<1x32x128xf32>
    %686 = vector.broadcast %676 : vector<1x1x128xf32> to vector<1x32x128xf32>
    %687 = arith.mulf %686, %682 : vector<1x32x128xf32>
    %688 = vector.broadcast %679 : vector<1x1x128xf32> to vector<1x32x128xf32>
    %689 = arith.mulf %688, %685 : vector<1x32x128xf32>
    %690 = arith.subf %687, %689 : vector<1x32x128xf32>
    %691 = arith.addf %667, %690 : vector<1x32x128xf32>
    %692 = vector.broadcast %676 : vector<1x1x128xf32> to vector<1x32x128xf32>
    %693 = arith.mulf %692, %685 : vector<1x32x128xf32>
    %694 = vector.broadcast %679 : vector<1x1x128xf32> to vector<1x32x128xf32>
    %695 = arith.mulf %694, %682 : vector<1x32x128xf32>
    %696 = arith.addf %693, %695 : vector<1x32x128xf32>
    %697 = arith.addf %673, %696 : vector<1x32x128xf32>
    %c29_i32 = arith.constant 29 : i32
    %c0_347 = arith.constant 0 : index
    %c0_348 = arith.constant 0 : index
    %698 = arith.index_cast %c29_i32 : i32 to index
    %c0_349 = arith.constant 0 : index
    %699 = vector.load %arg3[%c0_347, %c0_348, %698, %c0_349] : memref<2x1x32x128xf32, #tpu.memory_space<vmem>>, vector<1x1x1x128xf32>
    %700 = vector.shape_cast %699 : vector<1x1x1x128xf32> to vector<1x1x128xf32>
    %c1_350 = arith.constant 1 : index
    %c0_351 = arith.constant 0 : index
    %701 = arith.index_cast %c29_i32 : i32 to index
    %c0_352 = arith.constant 0 : index
    %702 = vector.load %arg3[%c1_350, %c0_351, %701, %c0_352] : memref<2x1x32x128xf32, #tpu.memory_space<vmem>>, vector<1x1x1x128xf32>
    %703 = vector.shape_cast %702 : vector<1x1x1x128xf32> to vector<1x1x128xf32>
    %c0_353 = arith.constant 0 : index
    %704 = arith.index_cast %c29_i32 : i32 to index
    %c0_354 = arith.constant 0 : index
    %c0_355 = arith.constant 0 : index
    %705 = vector.load %arg4[%c0_353, %704, %c0_354, %c0_355] : memref<2x32x32x128xf32, #tpu.memory_space<vmem>>, vector<1x1x32x128xf32>
    %706 = vector.shape_cast %705 : vector<1x1x32x128xf32> to vector<1x32x128xf32>
    %c1_356 = arith.constant 1 : index
    %707 = arith.index_cast %c29_i32 : i32 to index
    %c0_357 = arith.constant 0 : index
    %c0_358 = arith.constant 0 : index
    %708 = vector.load %arg4[%c1_356, %707, %c0_357, %c0_358] : memref<2x32x32x128xf32, #tpu.memory_space<vmem>>, vector<1x1x32x128xf32>
    %709 = vector.shape_cast %708 : vector<1x1x32x128xf32> to vector<1x32x128xf32>
    %710 = vector.broadcast %700 : vector<1x1x128xf32> to vector<1x32x128xf32>
    %711 = arith.mulf %710, %706 : vector<1x32x128xf32>
    %712 = vector.broadcast %703 : vector<1x1x128xf32> to vector<1x32x128xf32>
    %713 = arith.mulf %712, %709 : vector<1x32x128xf32>
    %714 = arith.subf %711, %713 : vector<1x32x128xf32>
    %715 = arith.addf %691, %714 : vector<1x32x128xf32>
    %716 = vector.broadcast %700 : vector<1x1x128xf32> to vector<1x32x128xf32>
    %717 = arith.mulf %716, %709 : vector<1x32x128xf32>
    %718 = vector.broadcast %703 : vector<1x1x128xf32> to vector<1x32x128xf32>
    %719 = arith.mulf %718, %706 : vector<1x32x128xf32>
    %720 = arith.addf %717, %719 : vector<1x32x128xf32>
    %721 = arith.addf %697, %720 : vector<1x32x128xf32>
    %c30_i32 = arith.constant 30 : i32
    %c0_359 = arith.constant 0 : index
    %c0_360 = arith.constant 0 : index
    %722 = arith.index_cast %c30_i32 : i32 to index
    %c0_361 = arith.constant 0 : index
    %723 = vector.load %arg3[%c0_359, %c0_360, %722, %c0_361] : memref<2x1x32x128xf32, #tpu.memory_space<vmem>>, vector<1x1x1x128xf32>
    %724 = vector.shape_cast %723 : vector<1x1x1x128xf32> to vector<1x1x128xf32>
    %c1_362 = arith.constant 1 : index
    %c0_363 = arith.constant 0 : index
    %725 = arith.index_cast %c30_i32 : i32 to index
    %c0_364 = arith.constant 0 : index
    %726 = vector.load %arg3[%c1_362, %c0_363, %725, %c0_364] : memref<2x1x32x128xf32, #tpu.memory_space<vmem>>, vector<1x1x1x128xf32>
    %727 = vector.shape_cast %726 : vector<1x1x1x128xf32> to vector<1x1x128xf32>
    %c0_365 = arith.constant 0 : index
    %728 = arith.index_cast %c30_i32 : i32 to index
    %c0_366 = arith.constant 0 : index
    %c0_367 = arith.constant 0 : index
    %729 = vector.load %arg4[%c0_365, %728, %c0_366, %c0_367] : memref<2x32x32x128xf32, #tpu.memory_space<vmem>>, vector<1x1x32x128xf32>
    %730 = vector.shape_cast %729 : vector<1x1x32x128xf32> to vector<1x32x128xf32>
    %c1_368 = arith.constant 1 : index
    %731 = arith.index_cast %c30_i32 : i32 to index
    %c0_369 = arith.constant 0 : index
    %c0_370 = arith.constant 0 : index
    %732 = vector.load %arg4[%c1_368, %731, %c0_369, %c0_370] : memref<2x32x32x128xf32, #tpu.memory_space<vmem>>, vector<1x1x32x128xf32>
    %733 = vector.shape_cast %732 : vector<1x1x32x128xf32> to vector<1x32x128xf32>
    %734 = vector.broadcast %724 : vector<1x1x128xf32> to vector<1x32x128xf32>
    %735 = arith.mulf %734, %730 : vector<1x32x128xf32>
    %736 = vector.broadcast %727 : vector<1x1x128xf32> to vector<1x32x128xf32>
    %737 = arith.mulf %736, %733 : vector<1x32x128xf32>
    %738 = arith.subf %735, %737 : vector<1x32x128xf32>
    %739 = arith.addf %715, %738 : vector<1x32x128xf32>
    %740 = vector.broadcast %724 : vector<1x1x128xf32> to vector<1x32x128xf32>
    %741 = arith.mulf %740, %733 : vector<1x32x128xf32>
    %742 = vector.broadcast %727 : vector<1x1x128xf32> to vector<1x32x128xf32>
    %743 = arith.mulf %742, %730 : vector<1x32x128xf32>
    %744 = arith.addf %741, %743 : vector<1x32x128xf32>
    %745 = arith.addf %721, %744 : vector<1x32x128xf32>
    %c31_i32 = arith.constant 31 : i32
    %c0_371 = arith.constant 0 : index
    %c0_372 = arith.constant 0 : index
    %746 = arith.index_cast %c31_i32 : i32 to index
    %c0_373 = arith.constant 0 : index
    %747 = vector.load %arg3[%c0_371, %c0_372, %746, %c0_373] : memref<2x1x32x128xf32, #tpu.memory_space<vmem>>, vector<1x1x1x128xf32>
    %748 = vector.shape_cast %747 : vector<1x1x1x128xf32> to vector<1x1x128xf32>
    %c1_374 = arith.constant 1 : index
    %c0_375 = arith.constant 0 : index
    %749 = arith.index_cast %c31_i32 : i32 to index
    %c0_376 = arith.constant 0 : index
    %750 = vector.load %arg3[%c1_374, %c0_375, %749, %c0_376] : memref<2x1x32x128xf32, #tpu.memory_space<vmem>>, vector<1x1x1x128xf32>
    %751 = vector.shape_cast %750 : vector<1x1x1x128xf32> to vector<1x1x128xf32>
    %c0_377 = arith.constant 0 : index
    %752 = arith.index_cast %c31_i32 : i32 to index
    %c0_378 = arith.constant 0 : index
    %c0_379 = arith.constant 0 : index
    %753 = vector.load %arg4[%c0_377, %752, %c0_378, %c0_379] : memref<2x32x32x128xf32, #tpu.memory_space<vmem>>, vector<1x1x32x128xf32>
    %754 = vector.shape_cast %753 : vector<1x1x32x128xf32> to vector<1x32x128xf32>
    %c1_380 = arith.constant 1 : index
    %755 = arith.index_cast %c31_i32 : i32 to index
    %c0_381 = arith.constant 0 : index
    %c0_382 = arith.constant 0 : index
    %756 = vector.load %arg4[%c1_380, %755, %c0_381, %c0_382] : memref<2x32x32x128xf32, #tpu.memory_space<vmem>>, vector<1x1x32x128xf32>
    %757 = vector.shape_cast %756 : vector<1x1x32x128xf32> to vector<1x32x128xf32>
    %758 = vector.broadcast %748 : vector<1x1x128xf32> to vector<1x32x128xf32>
    %759 = arith.mulf %758, %754 : vector<1x32x128xf32>
    %760 = vector.broadcast %751 : vector<1x1x128xf32> to vector<1x32x128xf32>
    %761 = arith.mulf %760, %757 : vector<1x32x128xf32>
    %762 = arith.subf %759, %761 : vector<1x32x128xf32>
    %763 = arith.addf %739, %762 : vector<1x32x128xf32>
    %764 = vector.broadcast %748 : vector<1x1x128xf32> to vector<1x32x128xf32>
    %765 = arith.mulf %764, %757 : vector<1x32x128xf32>
    %766 = vector.broadcast %751 : vector<1x1x128xf32> to vector<1x32x128xf32>
    %767 = arith.mulf %766, %754 : vector<1x32x128xf32>
    %768 = arith.addf %765, %767 : vector<1x32x128xf32>
    %769 = arith.addf %745, %768 : vector<1x32x128xf32>
    %c32_i32 = arith.constant 32 : i32
    %c0_383 = arith.constant 0 : index
    %c0_384 = arith.constant 0 : index
    %c0_385 = arith.constant 0 : index
    %c0_386 = arith.constant 0 : index
    %770 = vector.load %arg5[%c0_383, %c0_384, %c0_385, %c0_386] : memref<2x1x32x128xf32, #tpu.memory_space<vmem>>, vector<1x1x32x128xf32>
    %771 = vector.shape_cast %770 : vector<1x1x32x128xf32> to vector<1x32x128xf32>
    %772 = vector.shape_cast %763 : vector<1x32x128xf32> to vector<1x1x32x128xf32>
    tpu.vector_store %arg5[%c0_383, %c0_384, %c0_385, %c0_386], %772 {strides = array<i32>} : memref<2x1x32x128xf32, #tpu.memory_space<vmem>>, vector<1x1x32x128xf32>,
    %c1_387 = arith.constant 1 : index
    %c0_388 = arith.constant 0 : index
    %c0_389 = arith.constant 0 : index
    %c0_390 = arith.constant 0 : index
    %773 = vector.load %arg5[%c1_387, %c0_388, %c0_389, %c0_390] : memref<2x1x32x128xf32, #tpu.memory_space<vmem>>, vector<1x1x32x128xf32>
    %774 = vector.shape_cast %773 : vector<1x1x32x128xf32> to vector<1x32x128xf32>
    %775 = vector.shape_cast %769 : vector<1x32x128xf32> to vector<1x1x32x128xf32>
    tpu.vector_store %arg5[%c1_387, %c0_388, %c0_389, %c0_390], %775 {strides = array<i32>} : memref<2x1x32x128xf32, #tpu.memory_space<vmem>>, vector<1x1x32x128xf32>,
    return
  }
  func.func @transform_0(%arg0: i32, %arg1: i32, %arg2: i32) -> (i32, i32, i32, i32) {
    %c0_i32 = arith.constant 0 : i32
    %c0_i32_0 = arith.constant 0 : i32
    %c0_i32_1 = arith.constant 0 : i32
    return %c0_i32, %arg2, %c0_i32_0, %arg0 : i32, i32, i32, i32
  }
  func.func @transform_1(%arg0: i32, %arg1: i32, %arg2: i32) -> (i32, i32, i32, i32) {
    %c0_i32 = arith.constant 0 : i32
    %c0_i32_0 = arith.constant 0 : i32
    %c0_i32_1 = arith.constant 0 : i32
    return %c0_i32, %c0_i32_0, %arg1, %arg0 : i32, i32, i32, i32
  }
  func.func @transform_2(%arg0: i32, %arg1: i32, %arg2: i32) -> (i32, i32, i32, i32) {
    %c0_i32 = arith.constant 0 : i32
    %c0_i32_0 = arith.constant 0 : i32
    return %c0_i32, %arg2, %arg1, %arg0 : i32, i32, i32, i32
  }
}

</mosaic_0001>

<bundles_post_ra>
// kernel: custom-call
= control target key start
LH: loop header
LB: loop body
LE: loop exit
PB: predicated region body
PF: predicated region fallthrough
CT: control target
= control target key end

     0   :  { %2 = vsyncpa [#allocation0], 0  ;;  %s47_s0 = inlined_call_operand.hbm [shape: c64[32,32,8,6], index: 0, kind: input, shape index: {}]   ;;  %s48_s1 = inlined_call_operand.vmem [shape: f32[32,32,8,6], index: 1, kind: output, shape index: {}]  }
   0x1   :  { %s3_s8 = sshll.u32 %s48_s1, 4  ;;  %s4_s8 = int_to_ptr.vmem [resolvable:$true] %s3_s8 }
   0x2   :  { %s17_s9 = scalar_lea.vmem %s4_s8, 24576  ;;  %p22_p1 = scmp.lt.s32.totalorder %s4_s8, %s4_s8 }
   0x3   :  { %p18_p0 = scmp.ne.s32.totalorder %s4_s8, %s17_s9  ;;  %p23_p2 = scmp.lt.s32.totalorder %s17_s9, %s17_s9 }
   0x5   :  { %p24_p3 = por %p23_p2, %p22_p1 }
   0x7   :  { %p25_p4 = pnand %p24_p3, %p18_p0 }
   0x9   :  { %28 = shalt.err (!%p25_p4)  }
   0xa   :  { %6 = dma.hbm_to_vmem [thread:$0]  %s47_s0, 24576, %s4_s8, [#allocation0] }
   0xb   :  { %29 = dma.done.wait [#allocation0], 24576  }
   0xc   :  { %30 = vsyncadd [#allocation0], 4294942720 }
   0xd   :  { %8 = vsyncpa [#allocation0], 1 }

// kernel: custom-call.1
= control target key start
LH: loop header
LB: loop body
LE: loop exit
PB: predicated region body
PF: predicated region fallthrough
CT: control target
= control target key end

     0   :  { %s51_s0 = inlined_call_operand.hbm [shape: c64[32,32,8,6], index: 0, kind: input, shape index: {}]   ;;  %s52_s1 = inlined_call_operand.vmem [shape: f32[32,32,8,6], index: 1, kind: output, shape index: {}]  }
   0x1   :  { %s2_s8 = scalar_lea.hbm %s51_s0, 24576 }
   0x2   :  { %3 = vsyncpa [#allocation0], 0  ;;  %s4_s11 = sshll.u32 %s52_s1, 4  ;;  %s5_s11 = int_to_ptr.vmem [resolvable:$true] %s4_s11 }
   0x3   :  { %s20_s12 = scalar_lea.vmem %s5_s11, 24576  ;;  %p25_p1 = scmp.lt.s32.totalorder %s5_s11, %s5_s11 }
   0x4   :  { %p21_p0 = scmp.ne.s32.totalorder %s5_s11, %s20_s12  ;;  %p26_p2 = scmp.lt.s32.totalorder %s20_s12, %s20_s12 }
   0x6   :  { %p27_p3 = por %p26_p2, %p25_p1 }
   0x8   :  { %p28_p4 = pnand %p27_p3, %p21_p0 }
   0xa   :  { %31 = shalt.err (!%p28_p4)  }
   0xb   :  { %7 = dma.hbm_to_vmem [thread:$0]  %s2_s8, 24576, %s5_s11, [#allocation0] }
   0xc   :  { %33 = dma.done.wait [#allocation0], 24576  }
   0xd   :  { %34 = vsyncadd [#allocation0], 4294942720 }
   0xe   :  { %9 = vsyncpa [#allocation0], 1 }

// kernel: spectral_conv2d.1
= control target key start
LH: loop header
LB: loop body
LE: loop exit
PB: predicated region body
PF: predicated region fallthrough
CT: control target
= control target key end

     0   :  { %s2566_s9 = smov 0   ;;  %s2568_s10 = smov 0   ;;  %s3476_s0 = inlined_call_operand.vmem [shape: f32[2,2,32,128], index: 0, kind: input, shape index: {}]   ;;  %s3477_s1 = inlined_call_operand.vmem [shape: f32[2,32,32,128], index: 1, kind: input, shape index: {}]   ;;  %s3478_s2 = inlined_call_operand.vmem [shape: f32[2,2,32,128], index: 2, kind: output, shape index: {}]  }
   0x1   :  { %s2570_s11 = smov 0   ;;  %s2572_s12 = smov 0  }
   0x2   :  { %s2574_s13 = smov 0  }
   0x3 LB: > { %s24_s14 = sadd.s32 1, %s2545_s12  ;;  %s2101_s15 = sadd.s32 4294967295, %s2549_s13   ;;  %s2549_s13 = sphi %s2574_s13, %s12_s13   ;;  %s2545_s12 = sphi %s2572_s12, %s3483_s12   ;;  %s2541_s11 = sphi %s2570_s11, %s3482_s11   ;;  %s2537_s10 = sphi %s2568_s10, %s3481_s10   ;;  %s2533_s9 = sphi %s2566_s9, %s3480_s9  }
   0x4   : > { %p25_p0 = scmp.ge.s32.totalorder %s24_s14, 2  ;;  %p47_p1 = scmp.ne.s32.totalorder %s2537_s10, %s2533_s9 }
   0x5   : > { %p48_p2 = scmp.eq.s32.totalorder %s2549_s13, 0  ;;  %p109_p4 = scmp.eq.s32.totalorder %s2101_s15, 1 }
   0x6   : > { %s3485_s14 = smov (%p25_p0, %s24_s14), 0  ;;  %s40_s17 = sadd.s32 1, %s2537_s10 }
   0x7   : > { %p49_p3 = por %p48_p2, %p47_p1  ;;  %s35_s16 = ssub.s32 %s2545_s12, %s3485_s14 }
   0x8   : > { %p38_p5 = scmp.eq.s32.totalorder %s35_s16, 0  ;;  %p2601_p6 = por %p109_p4, %p47_p1 }
   0x9   : > { %p2105_p7 = scmp.ge.s32.totalorder %s2549_s13, 2 }
   0xa   : > { %s2606_s19 = scalar_select %p38_p5, %s2537_s10, %s40_s17  }
   0xb   : > { %143 = sbr.rel (%p2105_p7) target bundleno = 24 (0x18), region = 20 }
  0x10   : > { %146 = sbr.rel (!%p49_p3) target bundleno = 24 (0x18), region = 24  ;;  %s148_s20 = sand.u32 (%p49_p3), 1, %s2537_s10  }
  0x11   : > { %s2469_s21 = sshll.u32 (%p49_p3), %s2545_s12, 5  ;;  %s2106_s22 = sshll.u32 (%p49_p3), %s148_s20, 6 }
  0x12   : > { %s154_s25 = scalar_lea.vmem (%p49_p3), %s3476_s0, %s2469_s21  ;;  %s150_s26 = scalar_lea.vmem (%p49_p3), [#allocation2], %s2106_s22 }
  0x13   : > { %v197_v0 = vld [vmem:[%s154_s25] sm:$0xff] (%p49_p3)  ;;  %v199_v1 = vld [vmem:[%s154_s25 + $0x8] sm:$0xff] (%p49_p3)  ;;  %v201_v2 = vld [vmem:[%s154_s25 + $0x10] sm:$0xff] (%p49_p3) }
  0x14   : > { %198 = vst [vmem:[%s150_s26] sm:$0xff] (%p49_p3), %v197_v0  ;;  %200 = vst [vmem:[%s150_s26 + $0x8] sm:$0xff] (%p49_p3), %v199_v1  ;;  %v203_v3 = vld [vmem:[%s154_s25 + $0x18] sm:$0xff] (%p49_p3)  ;;  %v205_v4 = vld [vmem:[%s154_s25 + $0x40] sm:$0xff] (%p49_p3) }
  0x15   : > { %202 = vst [vmem:[%s150_s26 + $0x10] sm:$0xff] %v201_v2  ;;  %v207_v5 = vld [vmem:[%s154_s25 + $0x48] sm:$0xff]  ;;  %204 = vst [vmem:[%s150_s26 + $0x18] sm:$0xff] %v203_v3  ;;  %v209_v6 = vld [vmem:[%s154_s25 + $0x50] sm:$0xff] }
  0x16   : > { %206 = vst [vmem:[%s150_s26 + $0x20] sm:$0xff] %v205_v4  ;;  %208 = vst [vmem:[%s150_s26 + $0x28] sm:$0xff] %v207_v5  ;;  %v211_v7 = vld [vmem:[%s154_s25 + $0x58] sm:$0xff] }
  0x17   : > { %210 = vst [vmem:[%s150_s26 + $0x30] sm:$0xff] %v209_v6  ;;  %212 = vst [vmem:[%s150_s26 + $0x38] sm:$0xff] %v211_v7 }
  0x18 PF: > { %p2109_p8 = scmp.ge.s32.totalorder %s2549_s13, 1  ;;  %p217_p9 = scmp.lt.s32.totalorder %s2549_s13, 3 }
  0x1a   : > { %p218_p10 = pnand %p2109_p8, %p217_p9 }
  0x1b   : > { %s224_s27 = sand.u32 (!%p218_p10), 1, %s2533_s9  }
  0x1c   : > { %221 = sbr.rel (%p218_p10) target bundleno = 302 (0x12e), region = 62  ;;  %s2623_s4 = sshll.u32 (!%p218_p10), %s224_s27, 6 }
  0x1d   : > { %s2644_s24 = scalar_lea.vmem (!%p218_p10), [#allocation2], %s2623_s4 }
  0x21   : > { %v265_v8 = vld [vmem:[%s3477_s1] sm:$0xff]  ;;  %v266_v9 = vld [vmem:[%s3477_s1 + $0x8] sm:$0xff]  ;;  %v267_v10 = vld [vmem:[%s3477_s1 + $0x10] sm:$0xff]  ;;  %s2470_s27 = sshll.u32 (%p2601_p6), %s2541_s11, 5 }
  0x22   : > { %v268_v11 = vld [vmem:[%s3477_s1 + $0x18] sm:$0xff]  ;;  %v2113_v12 = vld [vmem:[%s3477_s1 + $0x400] sm:$0xff]  ;;  %v2114_v13 = vld [vmem:[%s3477_s1 + $0x408] sm:$0xff]  ;;  %s1947_s29 = scalar_lea.vmem (%p2601_p6), %s3478_s2, %s2470_s27 }
  0x23   : > { %v2115_v14 = vld [vmem:[%s3477_s1 + $0x410] sm:$0xff]  ;;  %v2116_v15 = vld [vmem:[%s3477_s1 + $0x418] sm:$0xff]  ;;  %v2117_v16 = vld [vmem:[%s2644_s24] ss:$0 sm:$0xff] }
  0x24   : > { %v2118_v17 = vld [vmem:[%s2644_s24 + $0x20] ss:$0 sm:$0xff]  ;;  %v278_v18 = vmul.f32 %v2117_v16, %v265_v8  ;;  %v279_v19 = vmul.f32 %v2117_v16, %v266_v9  ;;  %v280_v20 = vmul.f32 %v2117_v16, %v267_v10  ;;  %v281_v21 = vmul.f32 %v2117_v16, %v268_v11  ;;  %v2128_v26 = vld [vmem:[%s2644_s24 + $0x1] ss:$0 sm:$0xff]  ;;  %v2121_v32 = vld [vmem:[%s3477_s1 + $0x28] sm:$0xff] }
  0x25   : > { %v286_v22 = vmul.f32 %v2118_v17, %v2113_v12  ;;  %v287_v23 = vmul.f32 %v2118_v17, %v2114_v13  ;;  %v288_v24 = vmul.f32 %v2118_v17, %v2115_v14  ;;  %v289_v25 = vmul.f32 %v2118_v17, %v2116_v15  ;;  %v2120_v27 = vld [vmem:[%s3477_s1 + $0x20] sm:$0xff]  ;;  %v2122_v33 = vld [vmem:[%s3477_s1 + $0x30] sm:$0xff]  ;;  %v2123_v34 = vld [vmem:[%s3477_s1 + $0x38] sm:$0xff] }
  0x26   : > { %v298_v28 = vmul.f32 %v2117_v16, %v2113_v12  ;;  %v299_v29 = vmul.f32 %v2117_v16, %v2114_v13  ;;  %v300_v30 = vmul.f32 %v2117_v16, %v2115_v14  ;;  %v301_v31 = vmul.f32 %v2117_v16, %v2116_v15  ;;  %v2129_v39 = vld [vmem:[%s2644_s24 + $0x21] ss:$0 sm:$0xff]  ;;  %v2125_v45 = vld [vmem:[%s3477_s1 + $0x428] sm:$0xff]  ;;  %v2126_v46 = vld [vmem:[%s3477_s1 + $0x430] sm:$0xff] }
  0x27   : > { %v290_v35 = vsub.f32 %v278_v18, %v286_v22  ;;  %v291_v36 = vsub.f32 %v279_v19, %v287_v23  ;;  %v292_v37 = vsub.f32 %v280_v20, %v288_v24  ;;  %v293_v38 = vsub.f32 %v281_v21, %v289_v25  ;;  %v2124_v40 = vld [vmem:[%s3477_s1 + $0x420] sm:$0xff]  ;;  %v2127_v47 = vld [vmem:[%s3477_s1 + $0x438] sm:$0xff]  ;;  %v2136_v23 = vld [vmem:[%s3477_s1 + $0x448] sm:$0xff] }
  0x28   : > { %v302_v41 = vmul.f32 %v2118_v17, %v265_v8  ;;  %v303_v42 = vmul.f32 %v2118_v17, %v266_v9  ;;  %v304_v43 = vmul.f32 %v2118_v17, %v267_v10  ;;  %v305_v44 = vmul.f32 %v2118_v17, %v268_v11  ;;  %v2139_v4 = vld [vmem:[%s2644_s24 + $0x2] ss:$0 sm:$0xff]  ;;  %v2132_v10 = vld [vmem:[%s3477_s1 + $0x48] sm:$0xff]  ;;  %v2133_v11 = vld [vmem:[%s3477_s1 + $0x50] sm:$0xff] }
  0x29   : > { %v330_v48 = vmul.f32 %v2128_v26, %v2120_v27  ;;  %v331_v49 = vmul.f32 %v2128_v26, %v2121_v32  ;;  %v332_v50 = vmul.f32 %v2128_v26, %v2122_v33  ;;  %v333_v51 = vmul.f32 %v2128_v26, %v2123_v34  ;;  %v2131_v5 = vld [vmem:[%s3477_s1 + $0x40] sm:$0xff]  ;;  %v2134_v12 = vld [vmem:[%s3477_s1 + $0x58] sm:$0xff]  ;;  %v2137_v24 = vld [vmem:[%s3477_s1 + $0x450] sm:$0xff] }
  0x2a   : > { %v306_v52 = vadd.f32 %v302_v41, %v298_v28  ;;  %v307_v53 = vadd.f32 %v303_v42, %v299_v29  ;;  %v308_v54 = vadd.f32 %v304_v43, %v300_v30  ;;  %v309_v55 = vadd.f32 %v305_v44, %v301_v31  ;;  %v2140_v17 = vld [vmem:[%s2644_s24 + $0x22] ss:$0 sm:$0xff]  ;;  %v2138_v25 = vld [vmem:[%s3477_s1 + $0x458] sm:$0xff] }
  0x2b   : > { %v338_v56 = vmul.f32 %v2129_v39, %v2124_v40  ;;  %v339_v57 = vmul.f32 %v2129_v39, %v2125_v45  ;;  %v340_v58 = vmul.f32 %v2129_v39, %v2126_v46  ;;  %v341_v59 = vmul.f32 %v2129_v39, %v2127_v47  ;;  %v2135_v18 = vld [vmem:[%s3477_s1 + $0x440] sm:$0xff] }
  0x2c   : > { %v350_v60 = vmul.f32 %v2128_v26, %v2124_v40  ;;  %v351_v61 = vmul.f32 %v2128_v26, %v2125_v45  ;;  %v352_v62 = vmul.f32 %v2128_v26, %v2126_v46  ;;  %v353_v63 = vmul.f32 %v2128_v26, %v2127_v47  ;;  %v2150_v46 = vld [vmem:[%s2644_s24 + $0x3] ss:$0 sm:$0xff] }
  0x2d   : > { %v342_v0 = vsub.f32 %v330_v48, %v338_v56  ;;  %v343_v1 = vsub.f32 %v331_v49, %v339_v57  ;;  %v344_v2 = vsub.f32 %v332_v50, %v340_v58  ;;  %v345_v3 = vsub.f32 %v333_v51, %v341_v59  ;;  %v2142_v47 = vld [vmem:[%s3477_s1 + $0x60] sm:$0xff] }
  0x2e   : > { %v354_v6 = vmul.f32 %v2129_v39, %v2120_v27  ;;  %v355_v7 = vmul.f32 %v2129_v39, %v2121_v32  ;;  %v356_v8 = vmul.f32 %v2129_v39, %v2122_v33  ;;  %v357_v9 = vmul.f32 %v2129_v39, %v2123_v34  ;;  %v2151_v59 = vld [vmem:[%s2644_s24 + $0x23] ss:$0 sm:$0xff] }
  0x2f   : > { %v346_v13 = vadd.f32 %v342_v0, %v290_v35  ;;  %v347_v14 = vadd.f32 %v343_v1, %v291_v36  ;;  %v348_v15 = vadd.f32 %v344_v2, %v292_v37  ;;  %v349_v16 = vadd.f32 %v345_v3, %v293_v38  ;;  %v2147_v1 = vld [vmem:[%s3477_s1 + $0x468] sm:$0xff]  ;;  %v2148_v2 = vld [vmem:[%s3477_s1 + $0x470] sm:$0xff]  ;;  %v2149_v3 = vld [vmem:[%s3477_s1 + $0x478] sm:$0xff] }
  0x30   : > { %v358_v19 = vadd.f32 %v354_v6, %v350_v60  ;;  %v359_v20 = vadd.f32 %v355_v7, %v351_v61  ;;  %v360_v21 = vadd.f32 %v356_v8, %v352_v62  ;;  %v361_v22 = vadd.f32 %v357_v9, %v353_v63  ;;  %v2146_v60 = vld [vmem:[%s3477_s1 + $0x460] sm:$0xff] }
  0x31   : > { %v382_v26 = vmul.f32 %v2139_v4, %v2131_v5  ;;  %v383_v27 = vmul.f32 %v2139_v4, %v2132_v10  ;;  %v384_v28 = vmul.f32 %v2139_v4, %v2133_v11  ;;  %v385_v29 = vmul.f32 %v2139_v4, %v2134_v12 }
  0x32   : > { %v362_v30 = vadd.f32 %v358_v19, %v306_v52  ;;  %v363_v31 = vadd.f32 %v359_v20, %v307_v53  ;;  %v364_v32 = vadd.f32 %v360_v21, %v308_v54  ;;  %v365_v33 = vadd.f32 %v361_v22, %v309_v55  ;;  %v2143_v52 = vld [vmem:[%s3477_s1 + $0x68] sm:$0xff]  ;;  %v2144_v53 = vld [vmem:[%s3477_s1 + $0x70] sm:$0xff]  ;;  %v2145_v54 = vld [vmem:[%s3477_s1 + $0x78] sm:$0xff] }
  0x33   : > { %v390_v34 = vmul.f32 %v2140_v17, %v2135_v18  ;;  %v391_v35 = vmul.f32 %v2140_v17, %v2136_v23  ;;  %v392_v36 = vmul.f32 %v2140_v17, %v2137_v24  ;;  %v393_v37 = vmul.f32 %v2140_v17, %v2138_v25 }
  0x34   : > { %v402_v38 = vmul.f32 %v2139_v4, %v2135_v18  ;;  %v403_v39 = vmul.f32 %v2139_v4, %v2136_v23  ;;  %v404_v40 = vmul.f32 %v2139_v4, %v2137_v24  ;;  %v405_v41 = vmul.f32 %v2139_v4, %v2138_v25  ;;  %v2161_v24 = vld [vmem:[%s2644_s24 + $0x4] ss:$0 sm:$0xff] }
  0x35   : > { %v394_v42 = vsub.f32 %v382_v26, %v390_v34  ;;  %v395_v43 = vsub.f32 %v383_v27, %v391_v35  ;;  %v396_v44 = vsub.f32 %v384_v28, %v392_v36  ;;  %v397_v45 = vsub.f32 %v385_v29, %v393_v37  ;;  %v2153_v25 = vld [vmem:[%s3477_s1 + $0x80] sm:$0xff] }
  0x36   : > { %v406_v48 = vmul.f32 %v2140_v17, %v2131_v5  ;;  %v407_v49 = vmul.f32 %v2140_v17, %v2132_v10  ;;  %v408_v50 = vmul.f32 %v2140_v17, %v2133_v11  ;;  %v409_v51 = vmul.f32 %v2140_v17, %v2134_v12  ;;  %v2162_v37 = vld [vmem:[%s2644_s24 + $0x24] ss:$0 sm:$0xff] }
  0x37   : > { %v398_v55 = vadd.f32 %v394_v42, %v346_v13  ;;  %v399_v56 = vadd.f32 %v395_v43, %v347_v14  ;;  %v400_v57 = vadd.f32 %v396_v44, %v348_v15  ;;  %v401_v58 = vadd.f32 %v397_v45, %v349_v16  ;;  %v2158_v43 = vld [vmem:[%s3477_s1 + $0x488] sm:$0xff]  ;;  %v2159_v44 = vld [vmem:[%s3477_s1 + $0x490] sm:$0xff]  ;;  %v2160_v45 = vld [vmem:[%s3477_s1 + $0x498] sm:$0xff] }
  0x38   : > { %v410_v61 = vadd.f32 %v406_v48, %v402_v38  ;;  %v411_v62 = vadd.f32 %v407_v49, %v403_v39  ;;  %v412_v63 = vadd.f32 %v408_v50, %v404_v40  ;;  %v413_v0 = vadd.f32 %v409_v51, %v405_v41  ;;  %v2157_v38 = vld [vmem:[%s3477_s1 + $0x480] sm:$0xff] }
  0x39   : > { %v434_v4 = vmul.f32 %v2150_v46, %v2142_v47  ;;  %v435_v5 = vmul.f32 %v2150_v46, %v2143_v52  ;;  %v436_v6 = vmul.f32 %v2150_v46, %v2144_v53  ;;  %v437_v7 = vmul.f32 %v2150_v46, %v2145_v54 }
  0x3a   : > { %v414_v8 = vadd.f32 %v410_v61, %v362_v30  ;;  %v415_v9 = vadd.f32 %v411_v62, %v363_v31  ;;  %v416_v10 = vadd.f32 %v412_v63, %v364_v32  ;;  %v417_v11 = vadd.f32 %v413_v0, %v365_v33  ;;  %v2154_v30 = vld [vmem:[%s3477_s1 + $0x88] sm:$0xff]  ;;  %v2155_v31 = vld [vmem:[%s3477_s1 + $0x90] sm:$0xff]  ;;  %v2156_v32 = vld [vmem:[%s3477_s1 + $0x98] sm:$0xff] }
  0x3b   : > { %v442_v12 = vmul.f32 %v2151_v59, %v2146_v60  ;;  %v443_v13 = vmul.f32 %v2151_v59, %v2147_v1  ;;  %v444_v14 = vmul.f32 %v2151_v59, %v2148_v2  ;;  %v445_v15 = vmul.f32 %v2151_v59, %v2149_v3 }
  0x3c   : > { %v454_v16 = vmul.f32 %v2150_v46, %v2146_v60  ;;  %v455_v17 = vmul.f32 %v2150_v46, %v2147_v1  ;;  %v456_v18 = vmul.f32 %v2150_v46, %v2148_v2  ;;  %v457_v19 = vmul.f32 %v2150_v46, %v2149_v3  ;;  %v2172_v2 = vld [vmem:[%s2644_s24 + $0x5] ss:$0 sm:$0xff] }
  0x3d   : > { %v446_v20 = vsub.f32 %v434_v4, %v442_v12  ;;  %v447_v21 = vsub.f32 %v435_v5, %v443_v13  ;;  %v448_v22 = vsub.f32 %v436_v6, %v444_v14  ;;  %v449_v23 = vsub.f32 %v437_v7, %v445_v15  ;;  %v2164_v3 = vld [vmem:[%s3477_s1 + $0xa0] sm:$0xff] }
  0x3e   : > { %v458_v26 = vmul.f32 %v2151_v59, %v2142_v47  ;;  %v459_v27 = vmul.f32 %v2151_v59, %v2143_v52  ;;  %v460_v28 = vmul.f32 %v2151_v59, %v2144_v53  ;;  %v461_v29 = vmul.f32 %v2151_v59, %v2145_v54  ;;  %v2173_v15 = vld [vmem:[%s2644_s24 + $0x25] ss:$0 sm:$0xff] }
  0x3f   : > { %v450_v33 = vadd.f32 %v446_v20, %v398_v55  ;;  %v451_v34 = vadd.f32 %v447_v21, %v399_v56  ;;  %v452_v35 = vadd.f32 %v448_v22, %v400_v57  ;;  %v453_v36 = vadd.f32 %v449_v23, %v401_v58  ;;  %v2169_v21 = vld [vmem:[%s3477_s1 + $0x4a8] sm:$0xff]  ;;  %v2170_v22 = vld [vmem:[%s3477_s1 + $0x4b0] sm:$0xff]  ;;  %v2171_v23 = vld [vmem:[%s3477_s1 + $0x4b8] sm:$0xff] }
  0x40   : > { %v462_v39 = vadd.f32 %v458_v26, %v454_v16  ;;  %v463_v40 = vadd.f32 %v459_v27, %v455_v17  ;;  %v464_v41 = vadd.f32 %v460_v28, %v456_v18  ;;  %v465_v42 = vadd.f32 %v461_v29, %v457_v19  ;;  %v2168_v16 = vld [vmem:[%s3477_s1 + $0x4a0] sm:$0xff] }
  0x41   : > { %v486_v46 = vmul.f32 %v2161_v24, %v2153_v25  ;;  %v487_v47 = vmul.f32 %v2161_v24, %v2154_v30  ;;  %v488_v48 = vmul.f32 %v2161_v24, %v2155_v31  ;;  %v489_v49 = vmul.f32 %v2161_v24, %v2156_v32 }
  0x42   : > { %v466_v50 = vadd.f32 %v462_v39, %v414_v8  ;;  %v467_v51 = vadd.f32 %v463_v40, %v415_v9  ;;  %v468_v52 = vadd.f32 %v464_v41, %v416_v10  ;;  %v469_v53 = vadd.f32 %v465_v42, %v417_v11  ;;  %v2165_v8 = vld [vmem:[%s3477_s1 + $0xa8] sm:$0xff]  ;;  %v2166_v9 = vld [vmem:[%s3477_s1 + $0xb0] sm:$0xff]  ;;  %v2167_v10 = vld [vmem:[%s3477_s1 + $0xb8] sm:$0xff] }
  0x43   : > { %v494_v54 = vmul.f32 %v2162_v37, %v2157_v38  ;;  %v495_v55 = vmul.f32 %v2162_v37, %v2158_v43  ;;  %v496_v56 = vmul.f32 %v2162_v37, %v2159_v44  ;;  %v497_v57 = vmul.f32 %v2162_v37, %v2160_v45 }
  0x44   : > { %v506_v58 = vmul.f32 %v2161_v24, %v2157_v38  ;;  %v507_v59 = vmul.f32 %v2161_v24, %v2158_v43  ;;  %v508_v60 = vmul.f32 %v2161_v24, %v2159_v44  ;;  %v509_v61 = vmul.f32 %v2161_v24, %v2160_v45  ;;  %v2183_v44 = vld [vmem:[%s2644_s24 + $0x6] ss:$0 sm:$0xff] }
  0x45   : > { %v498_v62 = vsub.f32 %v486_v46, %v494_v54  ;;  %v499_v63 = vsub.f32 %v487_v47, %v495_v55  ;;  %v500_v0 = vsub.f32 %v488_v48, %v496_v56  ;;  %v501_v1 = vsub.f32 %v489_v49, %v497_v57  ;;  %v2175_v45 = vld [vmem:[%s3477_s1 + $0xc0] sm:$0xff] }
  0x46   : > { %v510_v4 = vmul.f32 %v2162_v37, %v2153_v25  ;;  %v511_v5 = vmul.f32 %v2162_v37, %v2154_v30  ;;  %v512_v6 = vmul.f32 %v2162_v37, %v2155_v31  ;;  %v513_v7 = vmul.f32 %v2162_v37, %v2156_v32  ;;  %v2184_v57 = vld [vmem:[%s2644_s24 + $0x26] ss:$0 sm:$0xff] }
  0x47   : > { %v502_v11 = vadd.f32 %v498_v62, %v450_v33  ;;  %v503_v12 = vadd.f32 %v499_v63, %v451_v34  ;;  %v504_v13 = vadd.f32 %v500_v0, %v452_v35  ;;  %v505_v14 = vadd.f32 %v501_v1, %v453_v36  ;;  %v2180_v63 = vld [vmem:[%s3477_s1 + $0x4c8] sm:$0xff]  ;;  %v2181_v0 = vld [vmem:[%s3477_s1 + $0x4d0] sm:$0xff]  ;;  %v2182_v1 = vld [vmem:[%s3477_s1 + $0x4d8] sm:$0xff] }
  0x48   : > { %v514_v17 = vadd.f32 %v510_v4, %v506_v58  ;;  %v515_v18 = vadd.f32 %v511_v5, %v507_v59  ;;  %v516_v19 = vadd.f32 %v512_v6, %v508_v60  ;;  %v517_v20 = vadd.f32 %v513_v7, %v509_v61  ;;  %v2179_v58 = vld [vmem:[%s3477_s1 + $0x4c0] sm:$0xff] }
  0x49   : > { %v538_v24 = vmul.f32 %v2172_v2, %v2164_v3  ;;  %v539_v25 = vmul.f32 %v2172_v2, %v2165_v8  ;;  %v540_v26 = vmul.f32 %v2172_v2, %v2166_v9  ;;  %v541_v27 = vmul.f32 %v2172_v2, %v2167_v10 }
  0x4a   : > { %v518_v28 = vadd.f32 %v514_v17, %v466_v50  ;;  %v519_v29 = vadd.f32 %v515_v18, %v467_v51  ;;  %v520_v30 = vadd.f32 %v516_v19, %v468_v52  ;;  %v521_v31 = vadd.f32 %v517_v20, %v469_v53  ;;  %v2176_v50 = vld [vmem:[%s3477_s1 + $0xc8] sm:$0xff]  ;;  %v2177_v51 = vld [vmem:[%s3477_s1 + $0xd0] sm:$0xff]  ;;  %v2178_v52 = vld [vmem:[%s3477_s1 + $0xd8] sm:$0xff] }
  0x4b   : > { %v546_v32 = vmul.f32 %v2173_v15, %v2168_v16  ;;  %v547_v33 = vmul.f32 %v2173_v15, %v2169_v21  ;;  %v548_v34 = vmul.f32 %v2173_v15, %v2170_v22  ;;  %v549_v35 = vmul.f32 %v2173_v15, %v2171_v23 }
  0x4c   : > { %v558_v36 = vmul.f32 %v2172_v2, %v2168_v16  ;;  %v559_v37 = vmul.f32 %v2172_v2, %v2169_v21  ;;  %v560_v38 = vmul.f32 %v2172_v2, %v2170_v22  ;;  %v561_v39 = vmul.f32 %v2172_v2, %v2171_v23  ;;  %v2194_v22 = vld [vmem:[%s2644_s24 + $0x7] ss:$0 sm:$0xff] }
  0x4d   : > { %v550_v40 = vsub.f32 %v538_v24, %v546_v32  ;;  %v551_v41 = vsub.f32 %v539_v25, %v547_v33  ;;  %v552_v42 = vsub.f32 %v540_v26, %v548_v34  ;;  %v553_v43 = vsub.f32 %v541_v27, %v549_v35  ;;  %v2186_v23 = vld [vmem:[%s3477_s1 + $0xe0] sm:$0xff] }
  0x4e   : > { %v562_v46 = vmul.f32 %v2173_v15, %v2164_v3  ;;  %v563_v47 = vmul.f32 %v2173_v15, %v2165_v8  ;;  %v564_v48 = vmul.f32 %v2173_v15, %v2166_v9  ;;  %v565_v49 = vmul.f32 %v2173_v15, %v2167_v10  ;;  %v2195_v35 = vld [vmem:[%s2644_s24 + $0x27] ss:$0 sm:$0xff] }
  0x4f   : > { %v554_v53 = vadd.f32 %v550_v40, %v502_v11  ;;  %v555_v54 = vadd.f32 %v551_v41, %v503_v12  ;;  %v556_v55 = vadd.f32 %v552_v42, %v504_v13  ;;  %v557_v56 = vadd.f32 %v553_v43, %v505_v14  ;;  %v2191_v41 = vld [vmem:[%s3477_s1 + $0x4e8] sm:$0xff]  ;;  %v2192_v42 = vld [vmem:[%s3477_s1 + $0x4f0] sm:$0xff]  ;;  %v2193_v43 = vld [vmem:[%s3477_s1 + $0x4f8] sm:$0xff] }
  0x50   : > { %v566_v59 = vadd.f32 %v562_v46, %v558_v36  ;;  %v567_v60 = vadd.f32 %v563_v47, %v559_v37  ;;  %v568_v61 = vadd.f32 %v564_v48, %v560_v38  ;;  %v569_v62 = vadd.f32 %v565_v49, %v561_v39  ;;  %v2190_v36 = vld [vmem:[%s3477_s1 + $0x4e0] sm:$0xff] }
  0x51   : > { %v590_v2 = vmul.f32 %v2183_v44, %v2175_v45  ;;  %v591_v3 = vmul.f32 %v2183_v44, %v2176_v50  ;;  %v592_v4 = vmul.f32 %v2183_v44, %v2177_v51  ;;  %v593_v5 = vmul.f32 %v2183_v44, %v2178_v52 }
  0x52   : > { %v570_v6 = vadd.f32 %v566_v59, %v518_v28  ;;  %v571_v7 = vadd.f32 %v567_v60, %v519_v29  ;;  %v572_v8 = vadd.f32 %v568_v61, %v520_v30  ;;  %v573_v9 = vadd.f32 %v569_v62, %v521_v31  ;;  %v2187_v28 = vld [vmem:[%s3477_s1 + $0xe8] sm:$0xff]  ;;  %v2188_v29 = vld [vmem:[%s3477_s1 + $0xf0] sm:$0xff]  ;;  %v2189_v30 = vld [vmem:[%s3477_s1 + $0xf8] sm:$0xff] }
  0x53   : > { %v598_v10 = vmul.f32 %v2184_v57, %v2179_v58  ;;  %v599_v11 = vmul.f32 %v2184_v57, %v2180_v63  ;;  %v600_v12 = vmul.f32 %v2184_v57, %v2181_v0  ;;  %v601_v13 = vmul.f32 %v2184_v57, %v2182_v1 }
  0x54   : > { %v610_v14 = vmul.f32 %v2183_v44, %v2179_v58  ;;  %v611_v15 = vmul.f32 %v2183_v44, %v2180_v63  ;;  %v612_v16 = vmul.f32 %v2183_v44, %v2181_v0  ;;  %v613_v17 = vmul.f32 %v2183_v44, %v2182_v1  ;;  %v2205_v0 = vld [vmem:[%s2644_s24 + $0x8] ss:$0 sm:$0xff]  ;;  %v2197_v1 = vld [vmem:[%s3477_s1 + $0x100] sm:$0xff] }
  0x55   : > { %v602_v18 = vsub.f32 %v590_v2, %v598_v10  ;;  %v603_v19 = vsub.f32 %v591_v3, %v599_v11  ;;  %v604_v20 = vsub.f32 %v592_v4, %v600_v12  ;;  %v605_v21 = vsub.f32 %v593_v5, %v601_v13  ;;  %v2206_v13 = vld [vmem:[%s2644_s24 + $0x28] ss:$0 sm:$0xff] }
  0x56   : > { %v614_v24 = vmul.f32 %v2184_v57, %v2175_v45  ;;  %v615_v25 = vmul.f32 %v2184_v57, %v2176_v50  ;;  %v616_v26 = vmul.f32 %v2184_v57, %v2177_v51  ;;  %v617_v27 = vmul.f32 %v2184_v57, %v2178_v52 }
  0x57   : > { %v606_v31 = vadd.f32 %v602_v18, %v554_v53  ;;  %v607_v32 = vadd.f32 %v603_v19, %v555_v54  ;;  %v608_v33 = vadd.f32 %v604_v20, %v556_v55  ;;  %v609_v34 = vadd.f32 %v605_v21, %v557_v56  ;;  %v2202_v19 = vld [vmem:[%s3477_s1 + $0x508] sm:$0xff]  ;;  %v2203_v20 = vld [vmem:[%s3477_s1 + $0x510] sm:$0xff]  ;;  %v2204_v21 = vld [vmem:[%s3477_s1 + $0x518] sm:$0xff] }
  0x58   : > { %v618_v37 = vadd.f32 %v614_v24, %v610_v14  ;;  %v619_v38 = vadd.f32 %v615_v25, %v611_v15  ;;  %v620_v39 = vadd.f32 %v616_v26, %v612_v16  ;;  %v621_v40 = vadd.f32 %v617_v27, %v613_v17  ;;  %v2201_v14 = vld [vmem:[%s3477_s1 + $0x500] sm:$0xff] }
  0x59   : > { %v642_v44 = vmul.f32 %v2194_v22, %v2186_v23  ;;  %v643_v45 = vmul.f32 %v2194_v22, %v2187_v28  ;;  %v644_v46 = vmul.f32 %v2194_v22, %v2188_v29  ;;  %v645_v47 = vmul.f32 %v2194_v22, %v2189_v30 }
  0x5a   : > { %v622_v48 = vadd.f32 %v618_v37, %v570_v6  ;;  %v623_v49 = vadd.f32 %v619_v38, %v571_v7  ;;  %v624_v50 = vadd.f32 %v620_v39, %v572_v8  ;;  %v625_v51 = vadd.f32 %v621_v40, %v573_v9  ;;  %v2198_v6 = vld [vmem:[%s3477_s1 + $0x108] sm:$0xff]  ;;  %v2199_v7 = vld [vmem:[%s3477_s1 + $0x110] sm:$0xff]  ;;  %v2200_v8 = vld [vmem:[%s3477_s1 + $0x118] sm:$0xff] }
  0x5b   : > { %v650_v52 = vmul.f32 %v2195_v35, %v2190_v36  ;;  %v651_v53 = vmul.f32 %v2195_v35, %v2191_v41  ;;  %v652_v54 = vmul.f32 %v2195_v35, %v2192_v42  ;;  %v653_v55 = vmul.f32 %v2195_v35, %v2193_v43 }
  0x5c   : > { %v662_v56 = vmul.f32 %v2194_v22, %v2190_v36  ;;  %v663_v57 = vmul.f32 %v2194_v22, %v2191_v41  ;;  %v664_v58 = vmul.f32 %v2194_v22, %v2192_v42  ;;  %v665_v59 = vmul.f32 %v2194_v22, %v2193_v43  ;;  %v2216_v42 = vld [vmem:[%s2644_s24 + $0x9] ss:$0 sm:$0xff]  ;;  %v2208_v43 = vld [vmem:[%s3477_s1 + $0x120] sm:$0xff] }
  0x5d   : > { %v654_v60 = vsub.f32 %v642_v44, %v650_v52  ;;  %v655_v61 = vsub.f32 %v643_v45, %v651_v53  ;;  %v656_v62 = vsub.f32 %v644_v46, %v652_v54  ;;  %v657_v63 = vsub.f32 %v645_v47, %v653_v55  ;;  %v2217_v55 = vld [vmem:[%s2644_s24 + $0x29] ss:$0 sm:$0xff] }
  0x5e   : > { %v666_v2 = vmul.f32 %v2195_v35, %v2186_v23  ;;  %v667_v3 = vmul.f32 %v2195_v35, %v2187_v28  ;;  %v668_v4 = vmul.f32 %v2195_v35, %v2188_v29  ;;  %v669_v5 = vmul.f32 %v2195_v35, %v2189_v30 }
  0x5f   : > { %v658_v9 = vadd.f32 %v654_v60, %v606_v31  ;;  %v659_v10 = vadd.f32 %v655_v61, %v607_v32  ;;  %v660_v11 = vadd.f32 %v656_v62, %v608_v33  ;;  %v661_v12 = vadd.f32 %v657_v63, %v609_v34  ;;  %v2213_v61 = vld [vmem:[%s3477_s1 + $0x528] sm:$0xff]  ;;  %v2214_v62 = vld [vmem:[%s3477_s1 + $0x530] sm:$0xff]  ;;  %v2215_v63 = vld [vmem:[%s3477_s1 + $0x538] sm:$0xff] }
  0x60   : > { %v670_v15 = vadd.f32 %v666_v2, %v662_v56  ;;  %v671_v16 = vadd.f32 %v667_v3, %v663_v57  ;;  %v672_v17 = vadd.f32 %v668_v4, %v664_v58  ;;  %v673_v18 = vadd.f32 %v669_v5, %v665_v59  ;;  %v2212_v56 = vld [vmem:[%s3477_s1 + $0x520] sm:$0xff] }
  0x61   : > { %v694_v22 = vmul.f32 %v2205_v0, %v2197_v1  ;;  %v695_v23 = vmul.f32 %v2205_v0, %v2198_v6  ;;  %v696_v24 = vmul.f32 %v2205_v0, %v2199_v7  ;;  %v697_v25 = vmul.f32 %v2205_v0, %v2200_v8 }
  0x62   : > { %v674_v26 = vadd.f32 %v670_v15, %v622_v48  ;;  %v675_v27 = vadd.f32 %v671_v16, %v623_v49  ;;  %v676_v28 = vadd.f32 %v672_v17, %v624_v50  ;;  %v677_v29 = vadd.f32 %v673_v18, %v625_v51  ;;  %v2209_v48 = vld [vmem:[%s3477_s1 + $0x128] sm:$0xff]  ;;  %v2210_v49 = vld [vmem:[%s3477_s1 + $0x130] sm:$0xff]  ;;  %v2211_v50 = vld [vmem:[%s3477_s1 + $0x138] sm:$0xff] }
  0x63   : > { %v702_v30 = vmul.f32 %v2206_v13, %v2201_v14  ;;  %v703_v31 = vmul.f32 %v2206_v13, %v2202_v19  ;;  %v704_v32 = vmul.f32 %v2206_v13, %v2203_v20  ;;  %v705_v33 = vmul.f32 %v2206_v13, %v2204_v21 }
  0x64   : > { %v714_v34 = vmul.f32 %v2205_v0, %v2201_v14  ;;  %v715_v35 = vmul.f32 %v2205_v0, %v2202_v19  ;;  %v716_v36 = vmul.f32 %v2205_v0, %v2203_v20  ;;  %v717_v37 = vmul.f32 %v2205_v0, %v2204_v21  ;;  %v2227_v20 = vld [vmem:[%s2644_s24 + $0xa] ss:$0 sm:$0xff]  ;;  %v2219_v21 = vld [vmem:[%s3477_s1 + $0x140] sm:$0xff] }
  0x65   : > { %v706_v38 = vsub.f32 %v694_v22, %v702_v30  ;;  %v707_v39 = vsub.f32 %v695_v23, %v703_v31  ;;  %v708_v40 = vsub.f32 %v696_v24, %v704_v32  ;;  %v709_v41 = vsub.f32 %v697_v25, %v705_v33  ;;  %v2228_v33 = vld [vmem:[%s2644_s24 + $0x2a] ss:$0 sm:$0xff] }
  0x66   : > { %v718_v44 = vmul.f32 %v2206_v13, %v2197_v1  ;;  %v719_v45 = vmul.f32 %v2206_v13, %v2198_v6  ;;  %v720_v46 = vmul.f32 %v2206_v13, %v2199_v7  ;;  %v721_v47 = vmul.f32 %v2206_v13, %v2200_v8 }
  0x67   : > { %v710_v51 = vadd.f32 %v706_v38, %v658_v9  ;;  %v711_v52 = vadd.f32 %v707_v39, %v659_v10  ;;  %v712_v53 = vadd.f32 %v708_v40, %v660_v11  ;;  %v713_v54 = vadd.f32 %v709_v41, %v661_v12  ;;  %v2224_v39 = vld [vmem:[%s3477_s1 + $0x548] sm:$0xff]  ;;  %v2225_v40 = vld [vmem:[%s3477_s1 + $0x550] sm:$0xff]  ;;  %v2226_v41 = vld [vmem:[%s3477_s1 + $0x558] sm:$0xff] }
  0x68   : > { %v722_v57 = vadd.f32 %v718_v44, %v714_v34  ;;  %v723_v58 = vadd.f32 %v719_v45, %v715_v35  ;;  %v724_v59 = vadd.f32 %v720_v46, %v716_v36  ;;  %v725_v60 = vadd.f32 %v721_v47, %v717_v37  ;;  %v2223_v34 = vld [vmem:[%s3477_s1 + $0x540] sm:$0xff] }
  0x69   : > { %v746_v0 = vmul.f32 %v2216_v42, %v2208_v43  ;;  %v747_v1 = vmul.f32 %v2216_v42, %v2209_v48  ;;  %v748_v2 = vmul.f32 %v2216_v42, %v2210_v49  ;;  %v749_v3 = vmul.f32 %v2216_v42, %v2211_v50 }
  0x6a   : > { %v726_v4 = vadd.f32 %v722_v57, %v674_v26  ;;  %v727_v5 = vadd.f32 %v723_v58, %v675_v27  ;;  %v728_v6 = vadd.f32 %v724_v59, %v676_v28  ;;  %v729_v7 = vadd.f32 %v725_v60, %v677_v29  ;;  %v2220_v26 = vld [vmem:[%s3477_s1 + $0x148] sm:$0xff]  ;;  %v2221_v27 = vld [vmem:[%s3477_s1 + $0x150] sm:$0xff]  ;;  %v2222_v28 = vld [vmem:[%s3477_s1 + $0x158] sm:$0xff] }
  0x6b   : > { %v754_v8 = vmul.f32 %v2217_v55, %v2212_v56  ;;  %v755_v9 = vmul.f32 %v2217_v55, %v2213_v61  ;;  %v756_v10 = vmul.f32 %v2217_v55, %v2214_v62  ;;  %v757_v11 = vmul.f32 %v2217_v55, %v2215_v63 }
  0x6c   : > { %v766_v12 = vmul.f32 %v2216_v42, %v2212_v56  ;;  %v767_v13 = vmul.f32 %v2216_v42, %v2213_v61  ;;  %v768_v14 = vmul.f32 %v2216_v42, %v2214_v62  ;;  %v769_v15 = vmul.f32 %v2216_v42, %v2215_v63  ;;  %v2238_v62 = vld [vmem:[%s2644_s24 + $0xb] ss:$0 sm:$0xff]  ;;  %v2230_v63 = vld [vmem:[%s3477_s1 + $0x160] sm:$0xff] }
  0x6d   : > { %v758_v16 = vsub.f32 %v746_v0, %v754_v8  ;;  %v759_v17 = vsub.f32 %v747_v1, %v755_v9  ;;  %v760_v18 = vsub.f32 %v748_v2, %v756_v10  ;;  %v761_v19 = vsub.f32 %v749_v3, %v757_v11  ;;  %v2239_v11 = vld [vmem:[%s2644_s24 + $0x2b] ss:$0 sm:$0xff] }
  0x6e   : > { %v770_v22 = vmul.f32 %v2217_v55, %v2208_v43  ;;  %v771_v23 = vmul.f32 %v2217_v55, %v2209_v48  ;;  %v772_v24 = vmul.f32 %v2217_v55, %v2210_v49  ;;  %v773_v25 = vmul.f32 %v2217_v55, %v2211_v50 }
  0x6f   : > { %v762_v29 = vadd.f32 %v758_v16, %v710_v51  ;;  %v763_v30 = vadd.f32 %v759_v17, %v711_v52  ;;  %v764_v31 = vadd.f32 %v760_v18, %v712_v53  ;;  %v765_v32 = vadd.f32 %v761_v19, %v713_v54  ;;  %v2235_v17 = vld [vmem:[%s3477_s1 + $0x568] sm:$0xff]  ;;  %v2236_v18 = vld [vmem:[%s3477_s1 + $0x570] sm:$0xff]  ;;  %v2237_v19 = vld [vmem:[%s3477_s1 + $0x578] sm:$0xff] }
  0x70   : > { %v774_v35 = vadd.f32 %v770_v22, %v766_v12  ;;  %v775_v36 = vadd.f32 %v771_v23, %v767_v13  ;;  %v776_v37 = vadd.f32 %v772_v24, %v768_v14  ;;  %v777_v38 = vadd.f32 %v773_v25, %v769_v15  ;;  %v2234_v12 = vld [vmem:[%s3477_s1 + $0x560] sm:$0xff] }
  0x71   : > { %v798_v42 = vmul.f32 %v2227_v20, %v2219_v21  ;;  %v799_v43 = vmul.f32 %v2227_v20, %v2220_v26  ;;  %v800_v44 = vmul.f32 %v2227_v20, %v2221_v27  ;;  %v801_v45 = vmul.f32 %v2227_v20, %v2222_v28 }
  0x72   : > { %v778_v46 = vadd.f32 %v774_v35, %v726_v4  ;;  %v779_v47 = vadd.f32 %v775_v36, %v727_v5  ;;  %v780_v48 = vadd.f32 %v776_v37, %v728_v6  ;;  %v781_v49 = vadd.f32 %v777_v38, %v729_v7  ;;  %v2231_v4 = vld [vmem:[%s3477_s1 + $0x168] sm:$0xff]  ;;  %v2232_v5 = vld [vmem:[%s3477_s1 + $0x170] sm:$0xff]  ;;  %v2233_v6 = vld [vmem:[%s3477_s1 + $0x178] sm:$0xff] }
  0x73   : > { %v806_v50 = vmul.f32 %v2228_v33, %v2223_v34  ;;  %v807_v51 = vmul.f32 %v2228_v33, %v2224_v39  ;;  %v808_v52 = vmul.f32 %v2228_v33, %v2225_v40  ;;  %v809_v53 = vmul.f32 %v2228_v33, %v2226_v41 }
  0x74   : > { %v818_v54 = vmul.f32 %v2227_v20, %v2223_v34  ;;  %v819_v55 = vmul.f32 %v2227_v20, %v2224_v39  ;;  %v820_v56 = vmul.f32 %v2227_v20, %v2225_v40  ;;  %v821_v57 = vmul.f32 %v2227_v20, %v2226_v41  ;;  %v2249_v40 = vld [vmem:[%s2644_s24 + $0xc] ss:$0 sm:$0xff]  ;;  %v2241_v41 = vld [vmem:[%s3477_s1 + $0x180] sm:$0xff] }
  0x75   : > { %v810_v58 = vsub.f32 %v798_v42, %v806_v50  ;;  %v811_v59 = vsub.f32 %v799_v43, %v807_v51  ;;  %v812_v60 = vsub.f32 %v800_v44, %v808_v52  ;;  %v813_v61 = vsub.f32 %v801_v45, %v809_v53  ;;  %v2250_v53 = vld [vmem:[%s2644_s24 + $0x2c] ss:$0 sm:$0xff] }
  0x76   : > { %v822_v0 = vmul.f32 %v2228_v33, %v2219_v21  ;;  %v823_v1 = vmul.f32 %v2228_v33, %v2220_v26  ;;  %v824_v2 = vmul.f32 %v2228_v33, %v2221_v27  ;;  %v825_v3 = vmul.f32 %v2228_v33, %v2222_v28 }
  0x77   : > { %v814_v7 = vadd.f32 %v810_v58, %v762_v29  ;;  %v815_v8 = vadd.f32 %v811_v59, %v763_v30  ;;  %v816_v9 = vadd.f32 %v812_v60, %v764_v31  ;;  %v817_v10 = vadd.f32 %v813_v61, %v765_v32  ;;  %v2246_v59 = vld [vmem:[%s3477_s1 + $0x588] sm:$0xff]  ;;  %v2247_v60 = vld [vmem:[%s3477_s1 + $0x590] sm:$0xff]  ;;  %v2248_v61 = vld [vmem:[%s3477_s1 + $0x598] sm:$0xff] }
  0x78   : > { %v826_v13 = vadd.f32 %v822_v0, %v818_v54  ;;  %v827_v14 = vadd.f32 %v823_v1, %v819_v55  ;;  %v828_v15 = vadd.f32 %v824_v2, %v820_v56  ;;  %v829_v16 = vadd.f32 %v825_v3, %v821_v57  ;;  %v2245_v54 = vld [vmem:[%s3477_s1 + $0x580] sm:$0xff] }
  0x79   : > { %v850_v20 = vmul.f32 %v2238_v62, %v2230_v63  ;;  %v851_v21 = vmul.f32 %v2238_v62, %v2231_v4  ;;  %v852_v22 = vmul.f32 %v2238_v62, %v2232_v5  ;;  %v853_v23 = vmul.f32 %v2238_v62, %v2233_v6 }
  0x7a   : > { %v830_v24 = vadd.f32 %v826_v13, %v778_v46  ;;  %v831_v25 = vadd.f32 %v827_v14, %v779_v47  ;;  %v832_v26 = vadd.f32 %v828_v15, %v780_v48  ;;  %v833_v27 = vadd.f32 %v829_v16, %v781_v49  ;;  %v2242_v46 = vld [vmem:[%s3477_s1 + $0x188] sm:$0xff]  ;;  %v2243_v47 = vld [vmem:[%s3477_s1 + $0x190] sm:$0xff]  ;;  %v2244_v48 = vld [vmem:[%s3477_s1 + $0x198] sm:$0xff] }
  0x7b   : > { %v858_v28 = vmul.f32 %v2239_v11, %v2234_v12  ;;  %v859_v29 = vmul.f32 %v2239_v11, %v2235_v17  ;;  %v860_v30 = vmul.f32 %v2239_v11, %v2236_v18  ;;  %v861_v31 = vmul.f32 %v2239_v11, %v2237_v19 }
  0x7c   : > { %v870_v32 = vmul.f32 %v2238_v62, %v2234_v12  ;;  %v871_v33 = vmul.f32 %v2238_v62, %v2235_v17  ;;  %v872_v34 = vmul.f32 %v2238_v62, %v2236_v18  ;;  %v873_v35 = vmul.f32 %v2238_v62, %v2237_v19  ;;  %v2260_v18 = vld [vmem:[%s2644_s24 + $0xd] ss:$0 sm:$0xff]  ;;  %v2252_v19 = vld [vmem:[%s3477_s1 + $0x1a0] sm:$0xff] }
  0x7d   : > { %v862_v36 = vsub.f32 %v850_v20, %v858_v28  ;;  %v863_v37 = vsub.f32 %v851_v21, %v859_v29  ;;  %v864_v38 = vsub.f32 %v852_v22, %v860_v30  ;;  %v865_v39 = vsub.f32 %v853_v23, %v861_v31  ;;  %v2261_v31 = vld [vmem:[%s2644_s24 + $0x2d] ss:$0 sm:$0xff] }
  0x7e   : > { %v874_v42 = vmul.f32 %v2239_v11, %v2230_v63  ;;  %v875_v43 = vmul.f32 %v2239_v11, %v2231_v4  ;;  %v876_v44 = vmul.f32 %v2239_v11, %v2232_v5  ;;  %v877_v45 = vmul.f32 %v2239_v11, %v2233_v6 }
  0x7f   : > { %v866_v49 = vadd.f32 %v862_v36, %v814_v7  ;;  %v867_v50 = vadd.f32 %v863_v37, %v815_v8  ;;  %v868_v51 = vadd.f32 %v864_v38, %v816_v9  ;;  %v869_v52 = vadd.f32 %v865_v39, %v817_v10  ;;  %v2257_v37 = vld [vmem:[%s3477_s1 + $0x5a8] sm:$0xff]  ;;  %v2258_v38 = vld [vmem:[%s3477_s1 + $0x5b0] sm:$0xff]  ;;  %v2259_v39 = vld [vmem:[%s3477_s1 + $0x5b8] sm:$0xff] }
  0x80   : > { %v878_v55 = vadd.f32 %v874_v42, %v870_v32  ;;  %v879_v56 = vadd.f32 %v875_v43, %v871_v33  ;;  %v880_v57 = vadd.f32 %v876_v44, %v872_v34  ;;  %v881_v58 = vadd.f32 %v877_v45, %v873_v35  ;;  %v2256_v32 = vld [vmem:[%s3477_s1 + $0x5a0] sm:$0xff] }
  0x81   : > { %v902_v62 = vmul.f32 %v2249_v40, %v2241_v41  ;;  %v903_v63 = vmul.f32 %v2249_v40, %v2242_v46  ;;  %v904_v0 = vmul.f32 %v2249_v40, %v2243_v47  ;;  %v905_v1 = vmul.f32 %v2249_v40, %v2244_v48 }
  0x82   : > { %v882_v2 = vadd.f32 %v878_v55, %v830_v24  ;;  %v883_v3 = vadd.f32 %v879_v56, %v831_v25  ;;  %v884_v4 = vadd.f32 %v880_v57, %v832_v26  ;;  %v885_v5 = vadd.f32 %v881_v58, %v833_v27  ;;  %v2253_v24 = vld [vmem:[%s3477_s1 + $0x1a8] sm:$0xff]  ;;  %v2254_v25 = vld [vmem:[%s3477_s1 + $0x1b0] sm:$0xff]  ;;  %v2255_v26 = vld [vmem:[%s3477_s1 + $0x1b8] sm:$0xff] }
  0x83   : > { %v910_v6 = vmul.f32 %v2250_v53, %v2245_v54  ;;  %v911_v7 = vmul.f32 %v2250_v53, %v2246_v59  ;;  %v912_v8 = vmul.f32 %v2250_v53, %v2247_v60  ;;  %v913_v9 = vmul.f32 %v2250_v53, %v2248_v61 }
  0x84   : > { %v922_v10 = vmul.f32 %v2249_v40, %v2245_v54  ;;  %v923_v11 = vmul.f32 %v2249_v40, %v2246_v59  ;;  %v924_v12 = vmul.f32 %v2249_v40, %v2247_v60  ;;  %v925_v13 = vmul.f32 %v2249_v40, %v2248_v61  ;;  %v2271_v60 = vld [vmem:[%s2644_s24 + $0xe] ss:$0 sm:$0xff]  ;;  %v2263_v61 = vld [vmem:[%s3477_s1 + $0x1c0] sm:$0xff] }
  0x85   : > { %v914_v14 = vsub.f32 %v902_v62, %v910_v6  ;;  %v915_v15 = vsub.f32 %v903_v63, %v911_v7  ;;  %v916_v16 = vsub.f32 %v904_v0, %v912_v8  ;;  %v917_v17 = vsub.f32 %v905_v1, %v913_v9  ;;  %v2272_v9 = vld [vmem:[%s2644_s24 + $0x2e] ss:$0 sm:$0xff] }
  0x86   : > { %v926_v20 = vmul.f32 %v2250_v53, %v2241_v41  ;;  %v927_v21 = vmul.f32 %v2250_v53, %v2242_v46  ;;  %v928_v22 = vmul.f32 %v2250_v53, %v2243_v47  ;;  %v929_v23 = vmul.f32 %v2250_v53, %v2244_v48 }
  0x87   : > { %v918_v27 = vadd.f32 %v914_v14, %v866_v49  ;;  %v919_v28 = vadd.f32 %v915_v15, %v867_v50  ;;  %v920_v29 = vadd.f32 %v916_v16, %v868_v51  ;;  %v921_v30 = vadd.f32 %v917_v17, %v869_v52  ;;  %v2268_v15 = vld [vmem:[%s3477_s1 + $0x5c8] sm:$0xff]  ;;  %v2269_v16 = vld [vmem:[%s3477_s1 + $0x5d0] sm:$0xff]  ;;  %v2270_v17 = vld [vmem:[%s3477_s1 + $0x5d8] sm:$0xff] }
  0x88   : > { %v930_v33 = vadd.f32 %v926_v20, %v922_v10  ;;  %v931_v34 = vadd.f32 %v927_v21, %v923_v11  ;;  %v932_v35 = vadd.f32 %v928_v22, %v924_v12  ;;  %v933_v36 = vadd.f32 %v929_v23, %v925_v13  ;;  %v2267_v10 = vld [vmem:[%s3477_s1 + $0x5c0] sm:$0xff] }
  0x89   : > { %v954_v40 = vmul.f32 %v2260_v18, %v2252_v19  ;;  %v955_v41 = vmul.f32 %v2260_v18, %v2253_v24  ;;  %v956_v42 = vmul.f32 %v2260_v18, %v2254_v25  ;;  %v957_v43 = vmul.f32 %v2260_v18, %v2255_v26 }
  0x8a   : > { %v934_v44 = vadd.f32 %v930_v33, %v882_v2  ;;  %v935_v45 = vadd.f32 %v931_v34, %v883_v3  ;;  %v936_v46 = vadd.f32 %v932_v35, %v884_v4  ;;  %v937_v47 = vadd.f32 %v933_v36, %v885_v5  ;;  %v2264_v2 = vld [vmem:[%s3477_s1 + $0x1c8] sm:$0xff]  ;;  %v2265_v3 = vld [vmem:[%s3477_s1 + $0x1d0] sm:$0xff]  ;;  %v2266_v4 = vld [vmem:[%s3477_s1 + $0x1d8] sm:$0xff] }
  0x8b   : > { %v962_v48 = vmul.f32 %v2261_v31, %v2256_v32  ;;  %v963_v49 = vmul.f32 %v2261_v31, %v2257_v37  ;;  %v964_v50 = vmul.f32 %v2261_v31, %v2258_v38  ;;  %v965_v51 = vmul.f32 %v2261_v31, %v2259_v39 }
  0x8c   : > { %v974_v52 = vmul.f32 %v2260_v18, %v2256_v32  ;;  %v975_v53 = vmul.f32 %v2260_v18, %v2257_v37  ;;  %v976_v54 = vmul.f32 %v2260_v18, %v2258_v38  ;;  %v977_v55 = vmul.f32 %v2260_v18, %v2259_v39  ;;  %v2282_v38 = vld [vmem:[%s2644_s24 + $0xf] ss:$0 sm:$0xff]  ;;  %v2274_v39 = vld [vmem:[%s3477_s1 + $0x1e0] sm:$0xff] }
  0x8d   : > { %v966_v56 = vsub.f32 %v954_v40, %v962_v48  ;;  %v967_v57 = vsub.f32 %v955_v41, %v963_v49  ;;  %v968_v58 = vsub.f32 %v956_v42, %v964_v50  ;;  %v969_v59 = vsub.f32 %v957_v43, %v965_v51  ;;  %v2283_v51 = vld [vmem:[%s2644_s24 + $0x2f] ss:$0 sm:$0xff] }
  0x8e   : > { %v978_v62 = vmul.f32 %v2261_v31, %v2252_v19  ;;  %v979_v63 = vmul.f32 %v2261_v31, %v2253_v24  ;;  %v980_v0 = vmul.f32 %v2261_v31, %v2254_v25  ;;  %v981_v1 = vmul.f32 %v2261_v31, %v2255_v26 }
  0x8f   : > { %v970_v5 = vadd.f32 %v966_v56, %v918_v27  ;;  %v971_v6 = vadd.f32 %v967_v57, %v919_v28  ;;  %v972_v7 = vadd.f32 %v968_v58, %v920_v29  ;;  %v973_v8 = vadd.f32 %v969_v59, %v921_v30  ;;  %v2279_v57 = vld [vmem:[%s3477_s1 + $0x5e8] sm:$0xff]  ;;  %v2280_v58 = vld [vmem:[%s3477_s1 + $0x5f0] sm:$0xff]  ;;  %v2281_v59 = vld [vmem:[%s3477_s1 + $0x5f8] sm:$0xff] }
  0x90   : > { %v982_v11 = vadd.f32 %v978_v62, %v974_v52  ;;  %v983_v12 = vadd.f32 %v979_v63, %v975_v53  ;;  %v984_v13 = vadd.f32 %v980_v0, %v976_v54  ;;  %v985_v14 = vadd.f32 %v981_v1, %v977_v55  ;;  %v2278_v52 = vld [vmem:[%s3477_s1 + $0x5e0] sm:$0xff] }
  0x91   : > { %v1006_v18 = vmul.f32 %v2271_v60, %v2263_v61  ;;  %v1007_v19 = vmul.f32 %v2271_v60, %v2264_v2  ;;  %v1008_v20 = vmul.f32 %v2271_v60, %v2265_v3  ;;  %v1009_v21 = vmul.f32 %v2271_v60, %v2266_v4 }
  0x92   : > { %v986_v22 = vadd.f32 %v982_v11, %v934_v44  ;;  %v987_v23 = vadd.f32 %v983_v12, %v935_v45  ;;  %v988_v24 = vadd.f32 %v984_v13, %v936_v46  ;;  %v989_v25 = vadd.f32 %v985_v14, %v937_v47  ;;  %v2275_v44 = vld [vmem:[%s3477_s1 + $0x1e8] sm:$0xff]  ;;  %v2276_v45 = vld [vmem:[%s3477_s1 + $0x1f0] sm:$0xff]  ;;  %v2277_v46 = vld [vmem:[%s3477_s1 + $0x1f8] sm:$0xff] }
  0x93   : > { %v1014_v26 = vmul.f32 %v2272_v9, %v2267_v10  ;;  %v1015_v27 = vmul.f32 %v2272_v9, %v2268_v15  ;;  %v1016_v28 = vmul.f32 %v2272_v9, %v2269_v16  ;;  %v1017_v29 = vmul.f32 %v2272_v9, %v2270_v17 }
  0x94   : > { %v1026_v30 = vmul.f32 %v2271_v60, %v2267_v10  ;;  %v1027_v31 = vmul.f32 %v2271_v60, %v2268_v15  ;;  %v1028_v32 = vmul.f32 %v2271_v60, %v2269_v16  ;;  %v1029_v33 = vmul.f32 %v2271_v60, %v2270_v17  ;;  %v2293_v16 = vld [vmem:[%s2644_s24 + $0x10] ss:$0 sm:$0xff]  ;;  %v2285_v17 = vld [vmem:[%s3477_s1 + $0x200] sm:$0xff] }
  0x95   : > { %v1018_v34 = vsub.f32 %v1006_v18, %v1014_v26  ;;  %v1019_v35 = vsub.f32 %v1007_v19, %v1015_v27  ;;  %v1020_v36 = vsub.f32 %v1008_v20, %v1016_v28  ;;  %v1021_v37 = vsub.f32 %v1009_v21, %v1017_v29  ;;  %v2294_v29 = vld [vmem:[%s2644_s24 + $0x30] ss:$0 sm:$0xff] }
  0x96   : > { %v1030_v40 = vmul.f32 %v2272_v9, %v2263_v61  ;;  %v1031_v41 = vmul.f32 %v2272_v9, %v2264_v2  ;;  %v1032_v42 = vmul.f32 %v2272_v9, %v2265_v3  ;;  %v1033_v43 = vmul.f32 %v2272_v9, %v2266_v4 }
  0x97   : > { %v1022_v47 = vadd.f32 %v1018_v34, %v970_v5  ;;  %v1023_v48 = vadd.f32 %v1019_v35, %v971_v6  ;;  %v1024_v49 = vadd.f32 %v1020_v36, %v972_v7  ;;  %v1025_v50 = vadd.f32 %v1021_v37, %v973_v8  ;;  %v2290_v35 = vld [vmem:[%s3477_s1 + $0x608] sm:$0xff]  ;;  %v2291_v36 = vld [vmem:[%s3477_s1 + $0x610] sm:$0xff]  ;;  %v2292_v37 = vld [vmem:[%s3477_s1 + $0x618] sm:$0xff] }
  0x98   : > { %v1034_v53 = vadd.f32 %v1030_v40, %v1026_v30  ;;  %v1035_v54 = vadd.f32 %v1031_v41, %v1027_v31  ;;  %v1036_v55 = vadd.f32 %v1032_v42, %v1028_v32  ;;  %v1037_v56 = vadd.f32 %v1033_v43, %v1029_v33  ;;  %v2289_v30 = vld [vmem:[%s3477_s1 + $0x600] sm:$0xff] }
  0x99   : > { %v1058_v60 = vmul.f32 %v2282_v38, %v2274_v39  ;;  %v1059_v61 = vmul.f32 %v2282_v38, %v2275_v44  ;;  %v1060_v62 = vmul.f32 %v2282_v38, %v2276_v45  ;;  %v1061_v63 = vmul.f32 %v2282_v38, %v2277_v46 }
  0x9a   : > { %v1038_v0 = vadd.f32 %v1034_v53, %v986_v22  ;;  %v1039_v1 = vadd.f32 %v1035_v54, %v987_v23  ;;  %v1040_v2 = vadd.f32 %v1036_v55, %v988_v24  ;;  %v1041_v3 = vadd.f32 %v1037_v56, %v989_v25  ;;  %v2286_v22 = vld [vmem:[%s3477_s1 + $0x208] sm:$0xff]  ;;  %v2287_v23 = vld [vmem:[%s3477_s1 + $0x210] sm:$0xff]  ;;  %v2288_v24 = vld [vmem:[%s3477_s1 + $0x218] sm:$0xff] }
  0x9b   : > { %v1066_v4 = vmul.f32 %v2283_v51, %v2278_v52  ;;  %v1067_v5 = vmul.f32 %v2283_v51, %v2279_v57  ;;  %v1068_v6 = vmul.f32 %v2283_v51, %v2280_v58  ;;  %v1069_v7 = vmul.f32 %v2283_v51, %v2281_v59 }
  0x9c   : > { %v1078_v8 = vmul.f32 %v2282_v38, %v2278_v52  ;;  %v1079_v9 = vmul.f32 %v2282_v38, %v2279_v57  ;;  %v1080_v10 = vmul.f32 %v2282_v38, %v2280_v58  ;;  %v1081_v11 = vmul.f32 %v2282_v38, %v2281_v59  ;;  %v2304_v58 = vld [vmem:[%s2644_s24 + $0x11] ss:$0 sm:$0xff]  ;;  %v2296_v59 = vld [vmem:[%s3477_s1 + $0x220] sm:$0xff] }
  0x9d   : > { %v1070_v12 = vsub.f32 %v1058_v60, %v1066_v4  ;;  %v1071_v13 = vsub.f32 %v1059_v61, %v1067_v5  ;;  %v1072_v14 = vsub.f32 %v1060_v62, %v1068_v6  ;;  %v1073_v15 = vsub.f32 %v1061_v63, %v1069_v7  ;;  %v2305_v7 = vld [vmem:[%s2644_s24 + $0x31] ss:$0 sm:$0xff] }
  0x9e   : > { %v1082_v18 = vmul.f32 %v2283_v51, %v2274_v39  ;;  %v1083_v19 = vmul.f32 %v2283_v51, %v2275_v44  ;;  %v1084_v20 = vmul.f32 %v2283_v51, %v2276_v45  ;;  %v1085_v21 = vmul.f32 %v2283_v51, %v2277_v46 }
  0x9f   : > { %v1074_v25 = vadd.f32 %v1070_v12, %v1022_v47  ;;  %v1075_v26 = vadd.f32 %v1071_v13, %v1023_v48  ;;  %v1076_v27 = vadd.f32 %v1072_v14, %v1024_v49  ;;  %v1077_v28 = vadd.f32 %v1073_v15, %v1025_v50  ;;  %v2301_v13 = vld [vmem:[%s3477_s1 + $0x628] sm:$0xff]  ;;  %v2302_v14 = vld [vmem:[%s3477_s1 + $0x630] sm:$0xff]  ;;  %v2303_v15 = vld [vmem:[%s3477_s1 + $0x638] sm:$0xff] }
  0xa0   : > { %v1086_v31 = vadd.f32 %v1082_v18, %v1078_v8  ;;  %v1087_v32 = vadd.f32 %v1083_v19, %v1079_v9  ;;  %v1088_v33 = vadd.f32 %v1084_v20, %v1080_v10  ;;  %v1089_v34 = vadd.f32 %v1085_v21, %v1081_v11  ;;  %v2300_v8 = vld [vmem:[%s3477_s1 + $0x620] sm:$0xff] }
  0xa1   : > { %v1110_v38 = vmul.f32 %v2293_v16, %v2285_v17  ;;  %v1111_v39 = vmul.f32 %v2293_v16, %v2286_v22  ;;  %v1112_v40 = vmul.f32 %v2293_v16, %v2287_v23  ;;  %v1113_v41 = vmul.f32 %v2293_v16, %v2288_v24 }
  0xa2   : > { %v1090_v42 = vadd.f32 %v1086_v31, %v1038_v0  ;;  %v1091_v43 = vadd.f32 %v1087_v32, %v1039_v1  ;;  %v1092_v44 = vadd.f32 %v1088_v33, %v1040_v2  ;;  %v1093_v45 = vadd.f32 %v1089_v34, %v1041_v3  ;;  %v2297_v0 = vld [vmem:[%s3477_s1 + $0x228] sm:$0xff]  ;;  %v2298_v1 = vld [vmem:[%s3477_s1 + $0x230] sm:$0xff]  ;;  %v2299_v2 = vld [vmem:[%s3477_s1 + $0x238] sm:$0xff] }
  0xa3   : > { %v1118_v46 = vmul.f32 %v2294_v29, %v2289_v30  ;;  %v1119_v47 = vmul.f32 %v2294_v29, %v2290_v35  ;;  %v1120_v48 = vmul.f32 %v2294_v29, %v2291_v36  ;;  %v1121_v49 = vmul.f32 %v2294_v29, %v2292_v37 }
  0xa4   : > { %v1130_v50 = vmul.f32 %v2293_v16, %v2289_v30  ;;  %v1131_v51 = vmul.f32 %v2293_v16, %v2290_v35  ;;  %v1132_v52 = vmul.f32 %v2293_v16, %v2291_v36  ;;  %v1133_v53 = vmul.f32 %v2293_v16, %v2292_v37  ;;  %v2315_v36 = vld [vmem:[%s2644_s24 + $0x12] ss:$0 sm:$0xff]  ;;  %v2307_v37 = vld [vmem:[%s3477_s1 + $0x240] sm:$0xff] }
  0xa5   : > { %v1122_v54 = vsub.f32 %v1110_v38, %v1118_v46  ;;  %v1123_v55 = vsub.f32 %v1111_v39, %v1119_v47  ;;  %v1124_v56 = vsub.f32 %v1112_v40, %v1120_v48  ;;  %v1125_v57 = vsub.f32 %v1113_v41, %v1121_v49  ;;  %v2316_v49 = vld [vmem:[%s2644_s24 + $0x32] ss:$0 sm:$0xff] }
  0xa6   : > { %v1134_v60 = vmul.f32 %v2294_v29, %v2285_v17  ;;  %v1135_v61 = vmul.f32 %v2294_v29, %v2286_v22  ;;  %v1136_v62 = vmul.f32 %v2294_v29, %v2287_v23  ;;  %v1137_v63 = vmul.f32 %v2294_v29, %v2288_v24 }
  0xa7   : > { %v1126_v3 = vadd.f32 %v1122_v54, %v1074_v25  ;;  %v1127_v4 = vadd.f32 %v1123_v55, %v1075_v26  ;;  %v1128_v5 = vadd.f32 %v1124_v56, %v1076_v27  ;;  %v1129_v6 = vadd.f32 %v1125_v57, %v1077_v28  ;;  %v2312_v55 = vld [vmem:[%s3477_s1 + $0x648] sm:$0xff]  ;;  %v2313_v56 = vld [vmem:[%s3477_s1 + $0x650] sm:$0xff]  ;;  %v2314_v57 = vld [vmem:[%s3477_s1 + $0x658] sm:$0xff] }
  0xa8   : > { %v1138_v9 = vadd.f32 %v1134_v60, %v1130_v50  ;;  %v1139_v10 = vadd.f32 %v1135_v61, %v1131_v51  ;;  %v1140_v11 = vadd.f32 %v1136_v62, %v1132_v52  ;;  %v1141_v12 = vadd.f32 %v1137_v63, %v1133_v53  ;;  %v2311_v50 = vld [vmem:[%s3477_s1 + $0x640] sm:$0xff] }
  0xa9   : > { %v1162_v16 = vmul.f32 %v2304_v58, %v2296_v59  ;;  %v1163_v17 = vmul.f32 %v2304_v58, %v2297_v0  ;;  %v1164_v18 = vmul.f32 %v2304_v58, %v2298_v1  ;;  %v1165_v19 = vmul.f32 %v2304_v58, %v2299_v2 }
  0xaa   : > { %v1142_v20 = vadd.f32 %v1138_v9, %v1090_v42  ;;  %v1143_v21 = vadd.f32 %v1139_v10, %v1091_v43  ;;  %v1144_v22 = vadd.f32 %v1140_v11, %v1092_v44  ;;  %v1145_v23 = vadd.f32 %v1141_v12, %v1093_v45  ;;  %v2308_v42 = vld [vmem:[%s3477_s1 + $0x248] sm:$0xff]  ;;  %v2309_v43 = vld [vmem:[%s3477_s1 + $0x250] sm:$0xff]  ;;  %v2310_v44 = vld [vmem:[%s3477_s1 + $0x258] sm:$0xff] }
  0xab   : > { %v1170_v24 = vmul.f32 %v2305_v7, %v2300_v8  ;;  %v1171_v25 = vmul.f32 %v2305_v7, %v2301_v13  ;;  %v1172_v26 = vmul.f32 %v2305_v7, %v2302_v14  ;;  %v1173_v27 = vmul.f32 %v2305_v7, %v2303_v15 }
  0xac   : > { %v1182_v28 = vmul.f32 %v2304_v58, %v2300_v8  ;;  %v1183_v29 = vmul.f32 %v2304_v58, %v2301_v13  ;;  %v1184_v30 = vmul.f32 %v2304_v58, %v2302_v14  ;;  %v1185_v31 = vmul.f32 %v2304_v58, %v2303_v15  ;;  %v2326_v14 = vld [vmem:[%s2644_s24 + $0x13] ss:$0 sm:$0xff]  ;;  %v2318_v15 = vld [vmem:[%s3477_s1 + $0x260] sm:$0xff] }
  0xad   : > { %v1174_v32 = vsub.f32 %v1162_v16, %v1170_v24  ;;  %v1175_v33 = vsub.f32 %v1163_v17, %v1171_v25  ;;  %v1176_v34 = vsub.f32 %v1164_v18, %v1172_v26  ;;  %v1177_v35 = vsub.f32 %v1165_v19, %v1173_v27  ;;  %v2327_v27 = vld [vmem:[%s2644_s24 + $0x33] ss:$0 sm:$0xff] }
  0xae   : > { %v1186_v38 = vmul.f32 %v2305_v7, %v2296_v59  ;;  %v1187_v39 = vmul.f32 %v2305_v7, %v2297_v0  ;;  %v1188_v40 = vmul.f32 %v2305_v7, %v2298_v1  ;;  %v1189_v41 = vmul.f32 %v2305_v7, %v2299_v2 }
  0xaf   : > { %v1178_v45 = vadd.f32 %v1174_v32, %v1126_v3  ;;  %v1179_v46 = vadd.f32 %v1175_v33, %v1127_v4  ;;  %v1180_v47 = vadd.f32 %v1176_v34, %v1128_v5  ;;  %v1181_v48 = vadd.f32 %v1177_v35, %v1129_v6  ;;  %v2323_v33 = vld [vmem:[%s3477_s1 + $0x668] sm:$0xff]  ;;  %v2324_v34 = vld [vmem:[%s3477_s1 + $0x670] sm:$0xff]  ;;  %v2325_v35 = vld [vmem:[%s3477_s1 + $0x678] sm:$0xff] }
  0xb0   : > { %v1190_v51 = vadd.f32 %v1186_v38, %v1182_v28  ;;  %v1191_v52 = vadd.f32 %v1187_v39, %v1183_v29  ;;  %v1192_v53 = vadd.f32 %v1188_v40, %v1184_v30  ;;  %v1193_v54 = vadd.f32 %v1189_v41, %v1185_v31  ;;  %v2322_v28 = vld [vmem:[%s3477_s1 + $0x660] sm:$0xff] }
  0xb1   : > { %v1214_v58 = vmul.f32 %v2315_v36, %v2307_v37  ;;  %v1215_v59 = vmul.f32 %v2315_v36, %v2308_v42  ;;  %v1216_v60 = vmul.f32 %v2315_v36, %v2309_v43  ;;  %v1217_v61 = vmul.f32 %v2315_v36, %v2310_v44 }
  0xb2   : > { %v1194_v62 = vadd.f32 %v1190_v51, %v1142_v20  ;;  %v1195_v63 = vadd.f32 %v1191_v52, %v1143_v21  ;;  %v1196_v0 = vadd.f32 %v1192_v53, %v1144_v22  ;;  %v1197_v1 = vadd.f32 %v1193_v54, %v1145_v23  ;;  %v2319_v20 = vld [vmem:[%s3477_s1 + $0x268] sm:$0xff]  ;;  %v2320_v21 = vld [vmem:[%s3477_s1 + $0x270] sm:$0xff]  ;;  %v2321_v22 = vld [vmem:[%s3477_s1 + $0x278] sm:$0xff] }
  0xb3   : > { %v1222_v2 = vmul.f32 %v2316_v49, %v2311_v50  ;;  %v1223_v3 = vmul.f32 %v2316_v49, %v2312_v55  ;;  %v1224_v4 = vmul.f32 %v2316_v49, %v2313_v56  ;;  %v1225_v5 = vmul.f32 %v2316_v49, %v2314_v57 }
  0xb4   : > { %v1234_v6 = vmul.f32 %v2315_v36, %v2311_v50  ;;  %v1235_v7 = vmul.f32 %v2315_v36, %v2312_v55  ;;  %v1236_v8 = vmul.f32 %v2315_v36, %v2313_v56  ;;  %v1237_v9 = vmul.f32 %v2315_v36, %v2314_v57  ;;  %v2337_v56 = vld [vmem:[%s2644_s24 + $0x14] ss:$0 sm:$0xff]  ;;  %v2329_v57 = vld [vmem:[%s3477_s1 + $0x280] sm:$0xff] }
  0xb5   : > { %v1226_v10 = vsub.f32 %v1214_v58, %v1222_v2  ;;  %v1227_v11 = vsub.f32 %v1215_v59, %v1223_v3  ;;  %v1228_v12 = vsub.f32 %v1216_v60, %v1224_v4  ;;  %v1229_v13 = vsub.f32 %v1217_v61, %v1225_v5  ;;  %v2338_v5 = vld [vmem:[%s2644_s24 + $0x34] ss:$0 sm:$0xff] }
  0xb6   : > { %v1238_v16 = vmul.f32 %v2316_v49, %v2307_v37  ;;  %v1239_v17 = vmul.f32 %v2316_v49, %v2308_v42  ;;  %v1240_v18 = vmul.f32 %v2316_v49, %v2309_v43  ;;  %v1241_v19 = vmul.f32 %v2316_v49, %v2310_v44 }
  0xb7   : > { %v1230_v23 = vadd.f32 %v1226_v10, %v1178_v45  ;;  %v1231_v24 = vadd.f32 %v1227_v11, %v1179_v46  ;;  %v1232_v25 = vadd.f32 %v1228_v12, %v1180_v47  ;;  %v1233_v26 = vadd.f32 %v1229_v13, %v1181_v48  ;;  %v2334_v11 = vld [vmem:[%s3477_s1 + $0x688] sm:$0xff]  ;;  %v2335_v12 = vld [vmem:[%s3477_s1 + $0x690] sm:$0xff]  ;;  %v2336_v13 = vld [vmem:[%s3477_s1 + $0x698] sm:$0xff] }
  0xb8   : > { %v1242_v29 = vadd.f32 %v1238_v16, %v1234_v6  ;;  %v1243_v30 = vadd.f32 %v1239_v17, %v1235_v7  ;;  %v1244_v31 = vadd.f32 %v1240_v18, %v1236_v8  ;;  %v1245_v32 = vadd.f32 %v1241_v19, %v1237_v9  ;;  %v2333_v6 = vld [vmem:[%s3477_s1 + $0x680] sm:$0xff] }
  0xb9   : > { %v1266_v36 = vmul.f32 %v2326_v14, %v2318_v15  ;;  %v1267_v37 = vmul.f32 %v2326_v14, %v2319_v20  ;;  %v1268_v38 = vmul.f32 %v2326_v14, %v2320_v21  ;;  %v1269_v39 = vmul.f32 %v2326_v14, %v2321_v22 }
  0xba   : > { %v1246_v40 = vadd.f32 %v1242_v29, %v1194_v62  ;;  %v1247_v41 = vadd.f32 %v1243_v30, %v1195_v63  ;;  %v1248_v42 = vadd.f32 %v1244_v31, %v1196_v0  ;;  %v1249_v43 = vadd.f32 %v1245_v32, %v1197_v1  ;;  %v2330_v62 = vld [vmem:[%s3477_s1 + $0x288] sm:$0xff]  ;;  %v2331_v63 = vld [vmem:[%s3477_s1 + $0x290] sm:$0xff]  ;;  %v2332_v0 = vld [vmem:[%s3477_s1 + $0x298] sm:$0xff] }
  0xbb   : > { %v1274_v44 = vmul.f32 %v2327_v27, %v2322_v28  ;;  %v1275_v45 = vmul.f32 %v2327_v27, %v2323_v33  ;;  %v1276_v46 = vmul.f32 %v2327_v27, %v2324_v34  ;;  %v1277_v47 = vmul.f32 %v2327_v27, %v2325_v35 }
  0xbc   : > { %v1286_v48 = vmul.f32 %v2326_v14, %v2322_v28  ;;  %v1287_v49 = vmul.f32 %v2326_v14, %v2323_v33  ;;  %v1288_v50 = vmul.f32 %v2326_v14, %v2324_v34  ;;  %v1289_v51 = vmul.f32 %v2326_v14, %v2325_v35  ;;  %v2348_v34 = vld [vmem:[%s2644_s24 + $0x15] ss:$0 sm:$0xff]  ;;  %v2340_v35 = vld [vmem:[%s3477_s1 + $0x2a0] sm:$0xff] }
  0xbd   : > { %v1278_v52 = vsub.f32 %v1266_v36, %v1274_v44  ;;  %v1279_v53 = vsub.f32 %v1267_v37, %v1275_v45  ;;  %v1280_v54 = vsub.f32 %v1268_v38, %v1276_v46  ;;  %v1281_v55 = vsub.f32 %v1269_v39, %v1277_v47  ;;  %v2349_v47 = vld [vmem:[%s2644_s24 + $0x35] ss:$0 sm:$0xff] }
  0xbe   : > { %v1290_v58 = vmul.f32 %v2327_v27, %v2318_v15  ;;  %v1291_v59 = vmul.f32 %v2327_v27, %v2319_v20  ;;  %v1292_v60 = vmul.f32 %v2327_v27, %v2320_v21  ;;  %v1293_v61 = vmul.f32 %v2327_v27, %v2321_v22 }
  0xbf   : > { %v1282_v1 = vadd.f32 %v1278_v52, %v1230_v23  ;;  %v1283_v2 = vadd.f32 %v1279_v53, %v1231_v24  ;;  %v1284_v3 = vadd.f32 %v1280_v54, %v1232_v25  ;;  %v1285_v4 = vadd.f32 %v1281_v55, %v1233_v26  ;;  %v2345_v53 = vld [vmem:[%s3477_s1 + $0x6a8] sm:$0xff]  ;;  %v2346_v54 = vld [vmem:[%s3477_s1 + $0x6b0] sm:$0xff]  ;;  %v2347_v55 = vld [vmem:[%s3477_s1 + $0x6b8] sm:$0xff] }
  0xc0   : > { %v1294_v7 = vadd.f32 %v1290_v58, %v1286_v48  ;;  %v1295_v8 = vadd.f32 %v1291_v59, %v1287_v49  ;;  %v1296_v9 = vadd.f32 %v1292_v60, %v1288_v50  ;;  %v1297_v10 = vadd.f32 %v1293_v61, %v1289_v51  ;;  %v2344_v48 = vld [vmem:[%s3477_s1 + $0x6a0] sm:$0xff] }
  0xc1   : > { %v1318_v14 = vmul.f32 %v2337_v56, %v2329_v57  ;;  %v1319_v15 = vmul.f32 %v2337_v56, %v2330_v62  ;;  %v1320_v16 = vmul.f32 %v2337_v56, %v2331_v63  ;;  %v1321_v17 = vmul.f32 %v2337_v56, %v2332_v0 }
  0xc2   : > { %v1298_v18 = vadd.f32 %v1294_v7, %v1246_v40  ;;  %v1299_v19 = vadd.f32 %v1295_v8, %v1247_v41  ;;  %v1300_v20 = vadd.f32 %v1296_v9, %v1248_v42  ;;  %v1301_v21 = vadd.f32 %v1297_v10, %v1249_v43  ;;  %v2341_v40 = vld [vmem:[%s3477_s1 + $0x2a8] sm:$0xff]  ;;  %v2342_v41 = vld [vmem:[%s3477_s1 + $0x2b0] sm:$0xff]  ;;  %v2343_v42 = vld [vmem:[%s3477_s1 + $0x2b8] sm:$0xff] }
  0xc3   : > { %v1326_v22 = vmul.f32 %v2338_v5, %v2333_v6  ;;  %v1327_v23 = vmul.f32 %v2338_v5, %v2334_v11  ;;  %v1328_v24 = vmul.f32 %v2338_v5, %v2335_v12  ;;  %v1329_v25 = vmul.f32 %v2338_v5, %v2336_v13 }
  0xc4   : > { %v1338_v26 = vmul.f32 %v2337_v56, %v2333_v6  ;;  %v1339_v27 = vmul.f32 %v2337_v56, %v2334_v11  ;;  %v1340_v28 = vmul.f32 %v2337_v56, %v2335_v12  ;;  %v1341_v29 = vmul.f32 %v2337_v56, %v2336_v13  ;;  %v2359_v12 = vld [vmem:[%s2644_s24 + $0x16] ss:$0 sm:$0xff]  ;;  %v2351_v13 = vld [vmem:[%s3477_s1 + $0x2c0] sm:$0xff] }
  0xc5   : > { %v1330_v30 = vsub.f32 %v1318_v14, %v1326_v22  ;;  %v1331_v31 = vsub.f32 %v1319_v15, %v1327_v23  ;;  %v1332_v32 = vsub.f32 %v1320_v16, %v1328_v24  ;;  %v1333_v33 = vsub.f32 %v1321_v17, %v1329_v25  ;;  %v2360_v25 = vld [vmem:[%s2644_s24 + $0x36] ss:$0 sm:$0xff] }
  0xc6   : > { %v1342_v36 = vmul.f32 %v2338_v5, %v2329_v57  ;;  %v1343_v37 = vmul.f32 %v2338_v5, %v2330_v62  ;;  %v1344_v38 = vmul.f32 %v2338_v5, %v2331_v63  ;;  %v1345_v39 = vmul.f32 %v2338_v5, %v2332_v0 }
  0xc7   : > { %v1334_v43 = vadd.f32 %v1330_v30, %v1282_v1  ;;  %v1335_v44 = vadd.f32 %v1331_v31, %v1283_v2  ;;  %v1336_v45 = vadd.f32 %v1332_v32, %v1284_v3  ;;  %v1337_v46 = vadd.f32 %v1333_v33, %v1285_v4  ;;  %v2356_v31 = vld [vmem:[%s3477_s1 + $0x6c8] sm:$0xff]  ;;  %v2357_v32 = vld [vmem:[%s3477_s1 + $0x6d0] sm:$0xff]  ;;  %v2358_v33 = vld [vmem:[%s3477_s1 + $0x6d8] sm:$0xff] }
  0xc8   : > { %v1346_v49 = vadd.f32 %v1342_v36, %v1338_v26  ;;  %v1347_v50 = vadd.f32 %v1343_v37, %v1339_v27  ;;  %v1348_v51 = vadd.f32 %v1344_v38, %v1340_v28  ;;  %v1349_v52 = vadd.f32 %v1345_v39, %v1341_v29  ;;  %v2355_v26 = vld [vmem:[%s3477_s1 + $0x6c0] sm:$0xff] }
  0xc9   : > { %v1370_v56 = vmul.f32 %v2348_v34, %v2340_v35  ;;  %v1371_v57 = vmul.f32 %v2348_v34, %v2341_v40  ;;  %v1372_v58 = vmul.f32 %v2348_v34, %v2342_v41  ;;  %v1373_v59 = vmul.f32 %v2348_v34, %v2343_v42 }
  0xca   : > { %v1350_v60 = vadd.f32 %v1346_v49, %v1298_v18  ;;  %v1351_v61 = vadd.f32 %v1347_v50, %v1299_v19  ;;  %v1352_v62 = vadd.f32 %v1348_v51, %v1300_v20  ;;  %v1353_v63 = vadd.f32 %v1349_v52, %v1301_v21  ;;  %v2352_v18 = vld [vmem:[%s3477_s1 + $0x2c8] sm:$0xff]  ;;  %v2353_v19 = vld [vmem:[%s3477_s1 + $0x2d0] sm:$0xff]  ;;  %v2354_v20 = vld [vmem:[%s3477_s1 + $0x2d8] sm:$0xff] }
  0xcb   : > { %v1378_v0 = vmul.f32 %v2349_v47, %v2344_v48  ;;  %v1379_v1 = vmul.f32 %v2349_v47, %v2345_v53  ;;  %v1380_v2 = vmul.f32 %v2349_v47, %v2346_v54  ;;  %v1381_v3 = vmul.f32 %v2349_v47, %v2347_v55 }
  0xcc   : > { %v1390_v4 = vmul.f32 %v2348_v34, %v2344_v48  ;;  %v1391_v5 = vmul.f32 %v2348_v34, %v2345_v53  ;;  %v1392_v6 = vmul.f32 %v2348_v34, %v2346_v54  ;;  %v1393_v7 = vmul.f32 %v2348_v34, %v2347_v55  ;;  %v2370_v54 = vld [vmem:[%s2644_s24 + $0x17] ss:$0 sm:$0xff]  ;;  %v2362_v55 = vld [vmem:[%s3477_s1 + $0x2e0] sm:$0xff] }
  0xcd   : > { %v1382_v8 = vsub.f32 %v1370_v56, %v1378_v0  ;;  %v1383_v9 = vsub.f32 %v1371_v57, %v1379_v1  ;;  %v1384_v10 = vsub.f32 %v1372_v58, %v1380_v2  ;;  %v1385_v11 = vsub.f32 %v1373_v59, %v1381_v3  ;;  %v2371_v3 = vld [vmem:[%s2644_s24 + $0x37] ss:$0 sm:$0xff] }
  0xce   : > { %v1394_v14 = vmul.f32 %v2349_v47, %v2340_v35  ;;  %v1395_v15 = vmul.f32 %v2349_v47, %v2341_v40  ;;  %v1396_v16 = vmul.f32 %v2349_v47, %v2342_v41  ;;  %v1397_v17 = vmul.f32 %v2349_v47, %v2343_v42 }
  0xcf   : > { %v1386_v21 = vadd.f32 %v1382_v8, %v1334_v43  ;;  %v1387_v22 = vadd.f32 %v1383_v9, %v1335_v44  ;;  %v1388_v23 = vadd.f32 %v1384_v10, %v1336_v45  ;;  %v1389_v24 = vadd.f32 %v1385_v11, %v1337_v46  ;;  %v2367_v9 = vld [vmem:[%s3477_s1 + $0x6e8] sm:$0xff]  ;;  %v2368_v10 = vld [vmem:[%s3477_s1 + $0x6f0] sm:$0xff]  ;;  %v2369_v11 = vld [vmem:[%s3477_s1 + $0x6f8] sm:$0xff] }
  0xd0   : > { %v1398_v27 = vadd.f32 %v1394_v14, %v1390_v4  ;;  %v1399_v28 = vadd.f32 %v1395_v15, %v1391_v5  ;;  %v1400_v29 = vadd.f32 %v1396_v16, %v1392_v6  ;;  %v1401_v30 = vadd.f32 %v1397_v17, %v1393_v7  ;;  %v2366_v4 = vld [vmem:[%s3477_s1 + $0x6e0] sm:$0xff] }
  0xd1   : > { %v1422_v34 = vmul.f32 %v2359_v12, %v2351_v13  ;;  %v1423_v35 = vmul.f32 %v2359_v12, %v2352_v18  ;;  %v1424_v36 = vmul.f32 %v2359_v12, %v2353_v19  ;;  %v1425_v37 = vmul.f32 %v2359_v12, %v2354_v20 }
  0xd2   : > { %v1402_v38 = vadd.f32 %v1398_v27, %v1350_v60  ;;  %v1403_v39 = vadd.f32 %v1399_v28, %v1351_v61  ;;  %v1404_v40 = vadd.f32 %v1400_v29, %v1352_v62  ;;  %v1405_v41 = vadd.f32 %v1401_v30, %v1353_v63  ;;  %v2363_v60 = vld [vmem:[%s3477_s1 + $0x2e8] sm:$0xff]  ;;  %v2364_v61 = vld [vmem:[%s3477_s1 + $0x2f0] sm:$0xff]  ;;  %v2365_v62 = vld [vmem:[%s3477_s1 + $0x2f8] sm:$0xff] }
  0xd3   : > { %v1430_v42 = vmul.f32 %v2360_v25, %v2355_v26  ;;  %v1431_v43 = vmul.f32 %v2360_v25, %v2356_v31  ;;  %v1432_v44 = vmul.f32 %v2360_v25, %v2357_v32  ;;  %v1433_v45 = vmul.f32 %v2360_v25, %v2358_v33 }
  0xd4   : > { %v1442_v46 = vmul.f32 %v2359_v12, %v2355_v26  ;;  %v1443_v47 = vmul.f32 %v2359_v12, %v2356_v31  ;;  %v1444_v48 = vmul.f32 %v2359_v12, %v2357_v32  ;;  %v1445_v49 = vmul.f32 %v2359_v12, %v2358_v33  ;;  %v2381_v32 = vld [vmem:[%s2644_s24 + $0x18] ss:$0 sm:$0xff]  ;;  %v2373_v33 = vld [vmem:[%s3477_s1 + $0x300] sm:$0xff] }
  0xd5   : > { %v1434_v50 = vsub.f32 %v1422_v34, %v1430_v42  ;;  %v1435_v51 = vsub.f32 %v1423_v35, %v1431_v43  ;;  %v1436_v52 = vsub.f32 %v1424_v36, %v1432_v44  ;;  %v1437_v53 = vsub.f32 %v1425_v37, %v1433_v45  ;;  %v2382_v45 = vld [vmem:[%s2644_s24 + $0x38] ss:$0 sm:$0xff] }
  0xd6   : > { %v1446_v56 = vmul.f32 %v2360_v25, %v2351_v13  ;;  %v1447_v57 = vmul.f32 %v2360_v25, %v2352_v18  ;;  %v1448_v58 = vmul.f32 %v2360_v25, %v2353_v19  ;;  %v1449_v59 = vmul.f32 %v2360_v25, %v2354_v20 }
  0xd7   : > { %v1438_v63 = vadd.f32 %v1434_v50, %v1386_v21  ;;  %v1439_v0 = vadd.f32 %v1435_v51, %v1387_v22  ;;  %v1440_v1 = vadd.f32 %v1436_v52, %v1388_v23  ;;  %v1441_v2 = vadd.f32 %v1437_v53, %v1389_v24  ;;  %v2378_v51 = vld [vmem:[%s3477_s1 + $0x708] sm:$0xff]  ;;  %v2379_v52 = vld [vmem:[%s3477_s1 + $0x710] sm:$0xff]  ;;  %v2380_v53 = vld [vmem:[%s3477_s1 + $0x718] sm:$0xff] }
  0xd8   : > { %v1450_v5 = vadd.f32 %v1446_v56, %v1442_v46  ;;  %v1451_v6 = vadd.f32 %v1447_v57, %v1443_v47  ;;  %v1452_v7 = vadd.f32 %v1448_v58, %v1444_v48  ;;  %v1453_v8 = vadd.f32 %v1449_v59, %v1445_v49  ;;  %v2377_v46 = vld [vmem:[%s3477_s1 + $0x700] sm:$0xff] }
  0xd9   : > { %v1474_v12 = vmul.f32 %v2370_v54, %v2362_v55  ;;  %v1475_v13 = vmul.f32 %v2370_v54, %v2363_v60  ;;  %v1476_v14 = vmul.f32 %v2370_v54, %v2364_v61  ;;  %v1477_v15 = vmul.f32 %v2370_v54, %v2365_v62 }
  0xda   : > { %v1454_v16 = vadd.f32 %v1450_v5, %v1402_v38  ;;  %v1455_v17 = vadd.f32 %v1451_v6, %v1403_v39  ;;  %v1456_v18 = vadd.f32 %v1452_v7, %v1404_v40  ;;  %v1457_v19 = vadd.f32 %v1453_v8, %v1405_v41  ;;  %v2374_v38 = vld [vmem:[%s3477_s1 + $0x308] sm:$0xff]  ;;  %v2375_v39 = vld [vmem:[%s3477_s1 + $0x310] sm:$0xff]  ;;  %v2376_v40 = vld [vmem:[%s3477_s1 + $0x318] sm:$0xff] }
  0xdb   : > { %v1482_v20 = vmul.f32 %v2371_v3, %v2366_v4  ;;  %v1483_v21 = vmul.f32 %v2371_v3, %v2367_v9  ;;  %v1484_v22 = vmul.f32 %v2371_v3, %v2368_v10  ;;  %v1485_v23 = vmul.f32 %v2371_v3, %v2369_v11 }
  0xdc   : > { %v1494_v24 = vmul.f32 %v2370_v54, %v2366_v4  ;;  %v1495_v25 = vmul.f32 %v2370_v54, %v2367_v9  ;;  %v1496_v26 = vmul.f32 %v2370_v54, %v2368_v10  ;;  %v1497_v27 = vmul.f32 %v2370_v54, %v2369_v11  ;;  %v2392_v10 = vld [vmem:[%s2644_s24 + $0x19] ss:$0 sm:$0xff]  ;;  %v2384_v11 = vld [vmem:[%s3477_s1 + $0x320] sm:$0xff] }
  0xdd   : > { %v1486_v28 = vsub.f32 %v1474_v12, %v1482_v20  ;;  %v1487_v29 = vsub.f32 %v1475_v13, %v1483_v21  ;;  %v1488_v30 = vsub.f32 %v1476_v14, %v1484_v22  ;;  %v1489_v31 = vsub.f32 %v1477_v15, %v1485_v23  ;;  %v2393_v23 = vld [vmem:[%s2644_s24 + $0x39] ss:$0 sm:$0xff] }
  0xde   : > { %v1498_v34 = vmul.f32 %v2371_v3, %v2362_v55  ;;  %v1499_v35 = vmul.f32 %v2371_v3, %v2363_v60  ;;  %v1500_v36 = vmul.f32 %v2371_v3, %v2364_v61  ;;  %v1501_v37 = vmul.f32 %v2371_v3, %v2365_v62 }
  0xdf   : > { %v1490_v41 = vadd.f32 %v1486_v28, %v1438_v63  ;;  %v1491_v42 = vadd.f32 %v1487_v29, %v1439_v0  ;;  %v1492_v43 = vadd.f32 %v1488_v30, %v1440_v1  ;;  %v1493_v44 = vadd.f32 %v1489_v31, %v1441_v2  ;;  %v2389_v29 = vld [vmem:[%s3477_s1 + $0x728] sm:$0xff]  ;;  %v2390_v30 = vld [vmem:[%s3477_s1 + $0x730] sm:$0xff]  ;;  %v2391_v31 = vld [vmem:[%s3477_s1 + $0x738] sm:$0xff] }
  0xe0   : > { %v1502_v47 = vadd.f32 %v1498_v34, %v1494_v24  ;;  %v1503_v48 = vadd.f32 %v1499_v35, %v1495_v25  ;;  %v1504_v49 = vadd.f32 %v1500_v36, %v1496_v26  ;;  %v1505_v50 = vadd.f32 %v1501_v37, %v1497_v27  ;;  %v2388_v24 = vld [vmem:[%s3477_s1 + $0x720] sm:$0xff] }
  0xe1   : > { %v1526_v54 = vmul.f32 %v2381_v32, %v2373_v33  ;;  %v1527_v55 = vmul.f32 %v2381_v32, %v2374_v38  ;;  %v1528_v56 = vmul.f32 %v2381_v32, %v2375_v39  ;;  %v1529_v57 = vmul.f32 %v2381_v32, %v2376_v40 }
  0xe2   : > { %v1506_v58 = vadd.f32 %v1502_v47, %v1454_v16  ;;  %v1507_v59 = vadd.f32 %v1503_v48, %v1455_v17  ;;  %v1508_v60 = vadd.f32 %v1504_v49, %v1456_v18  ;;  %v1509_v61 = vadd.f32 %v1505_v50, %v1457_v19  ;;  %v2385_v16 = vld [vmem:[%s3477_s1 + $0x328] sm:$0xff]  ;;  %v2386_v17 = vld [vmem:[%s3477_s1 + $0x330] sm:$0xff]  ;;  %v2387_v18 = vld [vmem:[%s3477_s1 + $0x338] sm:$0xff] }
  0xe3   : > { %v1534_v62 = vmul.f32 %v2382_v45, %v2377_v46  ;;  %v1535_v63 = vmul.f32 %v2382_v45, %v2378_v51  ;;  %v1536_v0 = vmul.f32 %v2382_v45, %v2379_v52  ;;  %v1537_v1 = vmul.f32 %v2382_v45, %v2380_v53 }
  0xe4   : > { %v1546_v2 = vmul.f32 %v2381_v32, %v2377_v46  ;;  %v1547_v3 = vmul.f32 %v2381_v32, %v2378_v51  ;;  %v1548_v4 = vmul.f32 %v2381_v32, %v2379_v52  ;;  %v1549_v5 = vmul.f32 %v2381_v32, %v2380_v53  ;;  %v2403_v52 = vld [vmem:[%s2644_s24 + $0x1a] ss:$0 sm:$0xff]  ;;  %v2395_v53 = vld [vmem:[%s3477_s1 + $0x340] sm:$0xff] }
  0xe5   : > { %v1538_v6 = vsub.f32 %v1526_v54, %v1534_v62  ;;  %v1539_v7 = vsub.f32 %v1527_v55, %v1535_v63  ;;  %v1540_v8 = vsub.f32 %v1528_v56, %v1536_v0  ;;  %v1541_v9 = vsub.f32 %v1529_v57, %v1537_v1  ;;  %v2404_v1 = vld [vmem:[%s2644_s24 + $0x3a] ss:$0 sm:$0xff] }
  0xe6   : > { %v1550_v12 = vmul.f32 %v2382_v45, %v2373_v33  ;;  %v1551_v13 = vmul.f32 %v2382_v45, %v2374_v38  ;;  %v1552_v14 = vmul.f32 %v2382_v45, %v2375_v39  ;;  %v1553_v15 = vmul.f32 %v2382_v45, %v2376_v40 }
  0xe7   : > { %v1542_v19 = vadd.f32 %v1538_v6, %v1490_v41  ;;  %v1543_v20 = vadd.f32 %v1539_v7, %v1491_v42  ;;  %v1544_v21 = vadd.f32 %v1540_v8, %v1492_v43  ;;  %v1545_v22 = vadd.f32 %v1541_v9, %v1493_v44  ;;  %v2400_v7 = vld [vmem:[%s3477_s1 + $0x748] sm:$0xff]  ;;  %v2401_v8 = vld [vmem:[%s3477_s1 + $0x750] sm:$0xff]  ;;  %v2402_v9 = vld [vmem:[%s3477_s1 + $0x758] sm:$0xff] }
  0xe8   : > { %v1554_v25 = vadd.f32 %v1550_v12, %v1546_v2  ;;  %v1555_v26 = vadd.f32 %v1551_v13, %v1547_v3  ;;  %v1556_v27 = vadd.f32 %v1552_v14, %v1548_v4  ;;  %v1557_v28 = vadd.f32 %v1553_v15, %v1549_v5  ;;  %v2399_v2 = vld [vmem:[%s3477_s1 + $0x740] sm:$0xff] }
  0xe9   : > { %v1578_v32 = vmul.f32 %v2392_v10, %v2384_v11  ;;  %v1579_v33 = vmul.f32 %v2392_v10, %v2385_v16  ;;  %v1580_v34 = vmul.f32 %v2392_v10, %v2386_v17  ;;  %v1581_v35 = vmul.f32 %v2392_v10, %v2387_v18 }
  0xea   : > { %v1558_v36 = vadd.f32 %v1554_v25, %v1506_v58  ;;  %v1559_v37 = vadd.f32 %v1555_v26, %v1507_v59  ;;  %v1560_v38 = vadd.f32 %v1556_v27, %v1508_v60  ;;  %v1561_v39 = vadd.f32 %v1557_v28, %v1509_v61  ;;  %v2396_v58 = vld [vmem:[%s3477_s1 + $0x348] sm:$0xff]  ;;  %v2397_v59 = vld [vmem:[%s3477_s1 + $0x350] sm:$0xff]  ;;  %v2398_v60 = vld [vmem:[%s3477_s1 + $0x358] sm:$0xff] }
  0xeb   : > { %v1586_v40 = vmul.f32 %v2393_v23, %v2388_v24  ;;  %v1587_v41 = vmul.f32 %v2393_v23, %v2389_v29  ;;  %v1588_v42 = vmul.f32 %v2393_v23, %v2390_v30  ;;  %v1589_v43 = vmul.f32 %v2393_v23, %v2391_v31 }
  0xec   : > { %v1598_v44 = vmul.f32 %v2392_v10, %v2388_v24  ;;  %v1599_v45 = vmul.f32 %v2392_v10, %v2389_v29  ;;  %v1600_v46 = vmul.f32 %v2392_v10, %v2390_v30  ;;  %v1601_v47 = vmul.f32 %v2392_v10, %v2391_v31  ;;  %v2414_v30 = vld [vmem:[%s2644_s24 + $0x1b] ss:$0 sm:$0xff]  ;;  %v2406_v31 = vld [vmem:[%s3477_s1 + $0x360] sm:$0xff] }
  0xed   : > { %v1590_v48 = vsub.f32 %v1578_v32, %v1586_v40  ;;  %v1591_v49 = vsub.f32 %v1579_v33, %v1587_v41  ;;  %v1592_v50 = vsub.f32 %v1580_v34, %v1588_v42  ;;  %v1593_v51 = vsub.f32 %v1581_v35, %v1589_v43  ;;  %v2415_v43 = vld [vmem:[%s2644_s24 + $0x3b] ss:$0 sm:$0xff] }
  0xee   : > { %v1602_v54 = vmul.f32 %v2393_v23, %v2384_v11  ;;  %v1603_v55 = vmul.f32 %v2393_v23, %v2385_v16  ;;  %v1604_v56 = vmul.f32 %v2393_v23, %v2386_v17  ;;  %v1605_v57 = vmul.f32 %v2393_v23, %v2387_v18 }
  0xef   : > { %v1594_v61 = vadd.f32 %v1590_v48, %v1542_v19  ;;  %v1595_v62 = vadd.f32 %v1591_v49, %v1543_v20  ;;  %v1596_v63 = vadd.f32 %v1592_v50, %v1544_v21  ;;  %v1597_v0 = vadd.f32 %v1593_v51, %v1545_v22  ;;  %v2411_v49 = vld [vmem:[%s3477_s1 + $0x768] sm:$0xff]  ;;  %v2412_v50 = vld [vmem:[%s3477_s1 + $0x770] sm:$0xff]  ;;  %v2413_v51 = vld [vmem:[%s3477_s1 + $0x778] sm:$0xff] }
  0xf0   : > { %v1606_v3 = vadd.f32 %v1602_v54, %v1598_v44  ;;  %v1607_v4 = vadd.f32 %v1603_v55, %v1599_v45  ;;  %v1608_v5 = vadd.f32 %v1604_v56, %v1600_v46  ;;  %v1609_v6 = vadd.f32 %v1605_v57, %v1601_v47  ;;  %v2410_v44 = vld [vmem:[%s3477_s1 + $0x760] sm:$0xff] }
  0xf1   : > { %v1630_v10 = vmul.f32 %v2403_v52, %v2395_v53  ;;  %v1631_v11 = vmul.f32 %v2403_v52, %v2396_v58  ;;  %v1632_v12 = vmul.f32 %v2403_v52, %v2397_v59  ;;  %v1633_v13 = vmul.f32 %v2403_v52, %v2398_v60 }
  0xf2   : > { %v1610_v14 = vadd.f32 %v1606_v3, %v1558_v36  ;;  %v1611_v15 = vadd.f32 %v1607_v4, %v1559_v37  ;;  %v1612_v16 = vadd.f32 %v1608_v5, %v1560_v38  ;;  %v1613_v17 = vadd.f32 %v1609_v6, %v1561_v39  ;;  %v2407_v36 = vld [vmem:[%s3477_s1 + $0x368] sm:$0xff]  ;;  %v2408_v37 = vld [vmem:[%s3477_s1 + $0x370] sm:$0xff]  ;;  %v2409_v38 = vld [vmem:[%s3477_s1 + $0x378] sm:$0xff] }
  0xf3   : > { %v1638_v18 = vmul.f32 %v2404_v1, %v2399_v2  ;;  %v1639_v19 = vmul.f32 %v2404_v1, %v2400_v7  ;;  %v1640_v20 = vmul.f32 %v2404_v1, %v2401_v8  ;;  %v1641_v21 = vmul.f32 %v2404_v1, %v2402_v9 }
  0xf4   : > { %v1650_v22 = vmul.f32 %v2403_v52, %v2399_v2  ;;  %v1651_v23 = vmul.f32 %v2403_v52, %v2400_v7  ;;  %v1652_v24 = vmul.f32 %v2403_v52, %v2401_v8  ;;  %v1653_v25 = vmul.f32 %v2403_v52, %v2402_v9  ;;  %v2425_v8 = vld [vmem:[%s2644_s24 + $0x1c] ss:$0 sm:$0xff]  ;;  %v2417_v9 = vld [vmem:[%s3477_s1 + $0x380] sm:$0xff] }
  0xf5   : > { %v1642_v26 = vsub.f32 %v1630_v10, %v1638_v18  ;;  %v1643_v27 = vsub.f32 %v1631_v11, %v1639_v19  ;;  %v1644_v28 = vsub.f32 %v1632_v12, %v1640_v20  ;;  %v1645_v29 = vsub.f32 %v1633_v13, %v1641_v21  ;;  %v2426_v21 = vld [vmem:[%s2644_s24 + $0x3c] ss:$0 sm:$0xff] }
  0xf6   : > { %v1654_v32 = vmul.f32 %v2404_v1, %v2395_v53  ;;  %v1655_v33 = vmul.f32 %v2404_v1, %v2396_v58  ;;  %v1656_v34 = vmul.f32 %v2404_v1, %v2397_v59  ;;  %v1657_v35 = vmul.f32 %v2404_v1, %v2398_v60 }
  0xf7   : > { %v1646_v39 = vadd.f32 %v1642_v26, %v1594_v61  ;;  %v1647_v40 = vadd.f32 %v1643_v27, %v1595_v62  ;;  %v1648_v41 = vadd.f32 %v1644_v28, %v1596_v63  ;;  %v1649_v42 = vadd.f32 %v1645_v29, %v1597_v0  ;;  %v2422_v27 = vld [vmem:[%s3477_s1 + $0x788] sm:$0xff]  ;;  %v2423_v28 = vld [vmem:[%s3477_s1 + $0x790] sm:$0xff]  ;;  %v2424_v29 = vld [vmem:[%s3477_s1 + $0x798] sm:$0xff] }
  0xf8   : > { %v1658_v45 = vadd.f32 %v1654_v32, %v1650_v22  ;;  %v1659_v46 = vadd.f32 %v1655_v33, %v1651_v23  ;;  %v1660_v47 = vadd.f32 %v1656_v34, %v1652_v24  ;;  %v1661_v48 = vadd.f32 %v1657_v35, %v1653_v25  ;;  %v2421_v22 = vld [vmem:[%s3477_s1 + $0x780] sm:$0xff] }
  0xf9   : > { %v1682_v52 = vmul.f32 %v2414_v30, %v2406_v31  ;;  %v1683_v53 = vmul.f32 %v2414_v30, %v2407_v36  ;;  %v1684_v54 = vmul.f32 %v2414_v30, %v2408_v37  ;;  %v1685_v55 = vmul.f32 %v2414_v30, %v2409_v38 }
  0xfa   : > { %v1662_v56 = vadd.f32 %v1658_v45, %v1610_v14  ;;  %v1663_v57 = vadd.f32 %v1659_v46, %v1611_v15  ;;  %v1664_v58 = vadd.f32 %v1660_v47, %v1612_v16  ;;  %v1665_v59 = vadd.f32 %v1661_v48, %v1613_v17  ;;  %v2418_v14 = vld [vmem:[%s3477_s1 + $0x388] sm:$0xff]  ;;  %v2419_v15 = vld [vmem:[%s3477_s1 + $0x390] sm:$0xff]  ;;  %v2420_v16 = vld [vmem:[%s3477_s1 + $0x398] sm:$0xff] }
  0xfb   : > { %v1690_v60 = vmul.f32 %v2415_v43, %v2410_v44  ;;  %v1691_v61 = vmul.f32 %v2415_v43, %v2411_v49  ;;  %v1692_v62 = vmul.f32 %v2415_v43, %v2412_v50  ;;  %v1693_v63 = vmul.f32 %v2415_v43, %v2413_v51 }
  0xfc   : > { %v1702_v0 = vmul.f32 %v2414_v30, %v2410_v44  ;;  %v1703_v1 = vmul.f32 %v2414_v30, %v2411_v49  ;;  %v1704_v2 = vmul.f32 %v2414_v30, %v2412_v50  ;;  %v1705_v3 = vmul.f32 %v2414_v30, %v2413_v51  ;;  %v2436_v50 = vld [vmem:[%s2644_s24 + $0x1d] ss:$0 sm:$0xff]  ;;  %v2428_v51 = vld [vmem:[%s3477_s1 + $0x3a0] sm:$0xff] }
  0xfd   : > { %v1694_v4 = vsub.f32 %v1682_v52, %v1690_v60  ;;  %v1695_v5 = vsub.f32 %v1683_v53, %v1691_v61  ;;  %v1696_v6 = vsub.f32 %v1684_v54, %v1692_v62  ;;  %v1697_v7 = vsub.f32 %v1685_v55, %v1693_v63  ;;  %v2437_v63 = vld [vmem:[%s2644_s24 + $0x3d] ss:$0 sm:$0xff] }
  0xfe   : > { %v1706_v10 = vmul.f32 %v2415_v43, %v2406_v31  ;;  %v1707_v11 = vmul.f32 %v2415_v43, %v2407_v36  ;;  %v1708_v12 = vmul.f32 %v2415_v43, %v2408_v37  ;;  %v1709_v13 = vmul.f32 %v2415_v43, %v2409_v38 }
  0xff   : > { %v1698_v17 = vadd.f32 %v1694_v4, %v1646_v39  ;;  %v1699_v18 = vadd.f32 %v1695_v5, %v1647_v40  ;;  %v1700_v19 = vadd.f32 %v1696_v6, %v1648_v41  ;;  %v1701_v20 = vadd.f32 %v1697_v7, %v1649_v42  ;;  %v2433_v5 = vld [vmem:[%s3477_s1 + $0x7a8] sm:$0xff]  ;;  %v2434_v6 = vld [vmem:[%s3477_s1 + $0x7b0] sm:$0xff]  ;;  %v2435_v7 = vld [vmem:[%s3477_s1 + $0x7b8] sm:$0xff] }
 0x100   : > { %v1710_v23 = vadd.f32 %v1706_v10, %v1702_v0  ;;  %v1711_v24 = vadd.f32 %v1707_v11, %v1703_v1  ;;  %v1712_v25 = vadd.f32 %v1708_v12, %v1704_v2  ;;  %v1713_v26 = vadd.f32 %v1709_v13, %v1705_v3  ;;  %v2432_v0 = vld [vmem:[%s3477_s1 + $0x7a0] sm:$0xff] }
 0x101   : > { %v1734_v30 = vmul.f32 %v2425_v8, %v2417_v9  ;;  %v1735_v31 = vmul.f32 %v2425_v8, %v2418_v14  ;;  %v1736_v32 = vmul.f32 %v2425_v8, %v2419_v15  ;;  %v1737_v33 = vmul.f32 %v2425_v8, %v2420_v16 }
 0x102   : > { %v1714_v34 = vadd.f32 %v1710_v23, %v1662_v56  ;;  %v1715_v35 = vadd.f32 %v1711_v24, %v1663_v57  ;;  %v1716_v36 = vadd.f32 %v1712_v25, %v1664_v58  ;;  %v1717_v37 = vadd.f32 %v1713_v26, %v1665_v59  ;;  %v2429_v56 = vld [vmem:[%s3477_s1 + $0x3a8] sm:$0xff]  ;;  %v2430_v57 = vld [vmem:[%s3477_s1 + $0x3b0] sm:$0xff]  ;;  %v2431_v58 = vld [vmem:[%s3477_s1 + $0x3b8] sm:$0xff] }
 0x103   : > { %v1742_v38 = vmul.f32 %v2426_v21, %v2421_v22  ;;  %v1743_v39 = vmul.f32 %v2426_v21, %v2422_v27  ;;  %v1744_v40 = vmul.f32 %v2426_v21, %v2423_v28  ;;  %v1745_v41 = vmul.f32 %v2426_v21, %v2424_v29 }
 0x104   : > { %v1754_v42 = vmul.f32 %v2425_v8, %v2421_v22  ;;  %v1755_v43 = vmul.f32 %v2425_v8, %v2422_v27  ;;  %v1756_v44 = vmul.f32 %v2425_v8, %v2423_v28  ;;  %v1757_v45 = vmul.f32 %v2425_v8, %v2424_v29  ;;  %v2447_v28 = vld [vmem:[%s2644_s24 + $0x1e] ss:$0 sm:$0xff]  ;;  %v2439_v29 = vld [vmem:[%s3477_s1 + $0x3c0] sm:$0xff] }
 0x105   : > { %v1746_v46 = vsub.f32 %v1734_v30, %v1742_v38  ;;  %v1747_v47 = vsub.f32 %v1735_v31, %v1743_v39  ;;  %v1748_v48 = vsub.f32 %v1736_v32, %v1744_v40  ;;  %v1749_v49 = vsub.f32 %v1737_v33, %v1745_v41  ;;  %v2448_v41 = vld [vmem:[%s2644_s24 + $0x3e] ss:$0 sm:$0xff] }
 0x106   : > { %v1758_v52 = vmul.f32 %v2426_v21, %v2417_v9  ;;  %v1759_v53 = vmul.f32 %v2426_v21, %v2418_v14  ;;  %v1760_v54 = vmul.f32 %v2426_v21, %v2419_v15  ;;  %v1761_v55 = vmul.f32 %v2426_v21, %v2420_v16 }
 0x107   : > { %v1750_v59 = vadd.f32 %v1746_v46, %v1698_v17  ;;  %v1751_v60 = vadd.f32 %v1747_v47, %v1699_v18  ;;  %v1752_v61 = vadd.f32 %v1748_v48, %v1700_v19  ;;  %v1753_v62 = vadd.f32 %v1749_v49, %v1701_v20  ;;  %v2444_v47 = vld [vmem:[%s3477_s1 + $0x7c8] sm:$0xff]  ;;  %v2445_v48 = vld [vmem:[%s3477_s1 + $0x7d0] sm:$0xff]  ;;  %v2446_v49 = vld [vmem:[%s3477_s1 + $0x7d8] sm:$0xff] }
 0x108   : > { %v1762_v1 = vadd.f32 %v1758_v52, %v1754_v42  ;;  %v1763_v2 = vadd.f32 %v1759_v53, %v1755_v43  ;;  %v1764_v3 = vadd.f32 %v1760_v54, %v1756_v44  ;;  %v1765_v4 = vadd.f32 %v1761_v55, %v1757_v45  ;;  %v2443_v42 = vld [vmem:[%s3477_s1 + $0x7c0] sm:$0xff] }
 0x109   : > { %v1786_v8 = vmul.f32 %v2436_v50, %v2428_v51  ;;  %v1787_v9 = vmul.f32 %v2436_v50, %v2429_v56  ;;  %v1788_v10 = vmul.f32 %v2436_v50, %v2430_v57  ;;  %v1789_v11 = vmul.f32 %v2436_v50, %v2431_v58 }
 0x10a   : > { %v1766_v12 = vadd.f32 %v1762_v1, %v1714_v34  ;;  %v1767_v13 = vadd.f32 %v1763_v2, %v1715_v35  ;;  %v1768_v14 = vadd.f32 %v1764_v3, %v1716_v36  ;;  %v1769_v15 = vadd.f32 %v1765_v4, %v1717_v37  ;;  %v2440_v34 = vld [vmem:[%s3477_s1 + $0x3c8] sm:$0xff]  ;;  %v2441_v35 = vld [vmem:[%s3477_s1 + $0x3d0] sm:$0xff]  ;;  %v2442_v36 = vld [vmem:[%s3477_s1 + $0x3d8] sm:$0xff] }
 0x10b   : > { %v1794_v16 = vmul.f32 %v2437_v63, %v2432_v0  ;;  %v1795_v17 = vmul.f32 %v2437_v63, %v2433_v5  ;;  %v1796_v18 = vmul.f32 %v2437_v63, %v2434_v6  ;;  %v1797_v19 = vmul.f32 %v2437_v63, %v2435_v7 }
 0x10c   : > { %v1806_v20 = vmul.f32 %v2436_v50, %v2432_v0  ;;  %v1807_v21 = vmul.f32 %v2436_v50, %v2433_v5  ;;  %v1808_v22 = vmul.f32 %v2436_v50, %v2434_v6  ;;  %v1809_v23 = vmul.f32 %v2436_v50, %v2435_v7  ;;  %v2458_v6 = vld [vmem:[%s2644_s24 + $0x1f] ss:$0 sm:$0xff]  ;;  %v2450_v7 = vld [vmem:[%s3477_s1 + $0x3e0] sm:$0xff] }
 0x10d   : > { %v1798_v24 = vsub.f32 %v1786_v8, %v1794_v16  ;;  %v1799_v25 = vsub.f32 %v1787_v9, %v1795_v17  ;;  %v1800_v26 = vsub.f32 %v1788_v10, %v1796_v18  ;;  %v1801_v27 = vsub.f32 %v1789_v11, %v1797_v19  ;;  %v2459_v19 = vld [vmem:[%s2644_s24 + $0x3f] ss:$0 sm:$0xff]  ;;  %s251_s24 = scalar_lea.vmem [#allocation3], %s2623_s4 }
 0x10e   : > { %v1810_v30 = vmul.f32 %v2437_v63, %v2428_v51  ;;  %v1811_v31 = vmul.f32 %v2437_v63, %v2429_v56  ;;  %v1812_v32 = vmul.f32 %v2437_v63, %v2430_v57  ;;  %v1813_v33 = vmul.f32 %v2437_v63, %v2431_v58 }
 0x10f   : > { %v1802_v37 = vadd.f32 %v1798_v24, %v1750_v59  ;;  %v1803_v38 = vadd.f32 %v1799_v25, %v1751_v60  ;;  %v1804_v39 = vadd.f32 %v1800_v26, %v1752_v61  ;;  %v1805_v40 = vadd.f32 %v1801_v27, %v1753_v62  ;;  %v2455_v25 = vld [vmem:[%s3477_s1 + $0x7e8] sm:$0xff]  ;;  %v2456_v26 = vld [vmem:[%s3477_s1 + $0x7f0] sm:$0xff]  ;;  %v2457_v27 = vld [vmem:[%s3477_s1 + $0x7f8] sm:$0xff] }
 0x110   : > { %v1814_v43 = vadd.f32 %v1810_v30, %v1806_v20  ;;  %v1815_v44 = vadd.f32 %v1811_v31, %v1807_v21  ;;  %v1816_v45 = vadd.f32 %v1812_v32, %v1808_v22  ;;  %v1817_v46 = vadd.f32 %v1813_v33, %v1809_v23  ;;  %v2454_v20 = vld [vmem:[%s3477_s1 + $0x7e0] sm:$0xff] }
 0x111   : > { %v1838_v50 = vmul.f32 %v2447_v28, %v2439_v29  ;;  %v1839_v51 = vmul.f32 %v2447_v28, %v2440_v34  ;;  %v1840_v52 = vmul.f32 %v2447_v28, %v2441_v35  ;;  %v1841_v53 = vmul.f32 %v2447_v28, %v2442_v36 }
 0x112   : > { %v1818_v54 = vadd.f32 %v1814_v43, %v1766_v12  ;;  %v1819_v55 = vadd.f32 %v1815_v44, %v1767_v13  ;;  %v1820_v56 = vadd.f32 %v1816_v45, %v1768_v14  ;;  %v1821_v57 = vadd.f32 %v1817_v46, %v1769_v15  ;;  %v2451_v12 = vld [vmem:[%s3477_s1 + $0x3e8] sm:$0xff]  ;;  %v2452_v13 = vld [vmem:[%s3477_s1 + $0x3f0] sm:$0xff]  ;;  %v2453_v14 = vld [vmem:[%s3477_s1 + $0x3f8] sm:$0xff] }
 0x113   : > { %v1846_v58 = vmul.f32 %v2448_v41, %v2443_v42  ;;  %v1847_v59 = vmul.f32 %v2448_v41, %v2444_v47  ;;  %v1848_v60 = vmul.f32 %v2448_v41, %v2445_v48  ;;  %v1849_v61 = vmul.f32 %v2448_v41, %v2446_v49 }
 0x114   : > { %v1858_v62 = vmul.f32 %v2447_v28, %v2443_v42  ;;  %v1859_v63 = vmul.f32 %v2447_v28, %v2444_v47  ;;  %v1860_v0 = vmul.f32 %v2447_v28, %v2445_v48  ;;  %v1861_v1 = vmul.f32 %v2447_v28, %v2446_v49 }
 0x115   : > { %v1850_v2 = vsub.f32 %v1838_v50, %v1846_v58  ;;  %v1851_v3 = vsub.f32 %v1839_v51, %v1847_v59  ;;  %v1852_v4 = vsub.f32 %v1840_v52, %v1848_v60  ;;  %v1853_v5 = vsub.f32 %v1841_v53, %v1849_v61 }
 0x116   : > { %v1862_v8 = vmul.f32 %v2448_v41, %v2439_v29  ;;  %v1863_v9 = vmul.f32 %v2448_v41, %v2440_v34  ;;  %v1864_v10 = vmul.f32 %v2448_v41, %v2441_v35  ;;  %v1865_v11 = vmul.f32 %v2448_v41, %v2442_v36 }
 0x117   : > { %v1854_v15 = vadd.f32 %v1850_v2, %v1802_v37  ;;  %v1855_v16 = vadd.f32 %v1851_v3, %v1803_v38  ;;  %v1856_v17 = vadd.f32 %v1852_v4, %v1804_v39  ;;  %v1857_v18 = vadd.f32 %v1853_v5, %v1805_v40 }
 0x118   : > { %v1866_v21 = vadd.f32 %v1862_v8, %v1858_v62  ;;  %v1867_v22 = vadd.f32 %v1863_v9, %v1859_v63  ;;  %v1868_v23 = vadd.f32 %v1864_v10, %v1860_v0  ;;  %v1869_v24 = vadd.f32 %v1865_v11, %v1861_v1 }
 0x119   : > { %v1890_v28 = vmul.f32 %v2458_v6, %v2450_v7  ;;  %v1891_v29 = vmul.f32 %v2458_v6, %v2451_v12  ;;  %v1892_v30 = vmul.f32 %v2458_v6, %v2452_v13  ;;  %v1893_v31 = vmul.f32 %v2458_v6, %v2453_v14 }
 0x11a   : > { %v1870_v32 = vadd.f32 %v1866_v21, %v1818_v54  ;;  %v1871_v33 = vadd.f32 %v1867_v22, %v1819_v55  ;;  %v1872_v34 = vadd.f32 %v1868_v23, %v1820_v56  ;;  %v1873_v35 = vadd.f32 %v1869_v24, %v1821_v57 }
 0x11b   : > { %v1898_v36 = vmul.f32 %v2459_v19, %v2454_v20  ;;  %v1899_v37 = vmul.f32 %v2459_v19, %v2455_v25  ;;  %v1900_v38 = vmul.f32 %v2459_v19, %v2456_v26  ;;  %v1901_v39 = vmul.f32 %v2459_v19, %v2457_v27 }
 0x11c   : > { %v1910_v40 = vmul.f32 %v2458_v6, %v2454_v20  ;;  %v1911_v41 = vmul.f32 %v2458_v6, %v2455_v25  ;;  %v1912_v42 = vmul.f32 %v2458_v6, %v2456_v26  ;;  %v1913_v43 = vmul.f32 %v2458_v6, %v2457_v27 }
 0x11d   : > { %v1902_v44 = vsub.f32 %v1890_v28, %v1898_v36  ;;  %v1903_v45 = vsub.f32 %v1891_v29, %v1899_v37  ;;  %v1904_v46 = vsub.f32 %v1892_v30, %v1900_v38  ;;  %v1905_v47 = vsub.f32 %v1893_v31, %v1901_v39 }
 0x11e   : > { %v1914_v48 = vmul.f32 %v2459_v19, %v2450_v7  ;;  %v1915_v49 = vmul.f32 %v2459_v19, %v2451_v12  ;;  %v1916_v50 = vmul.f32 %v2459_v19, %v2452_v13  ;;  %v1917_v51 = vmul.f32 %v2459_v19, %v2453_v14 }
 0x11f   : > { %v1906_v52 = vadd.f32 %v1902_v44, %v1854_v15  ;;  %v1907_v53 = vadd.f32 %v1903_v45, %v1855_v16  ;;  %v1908_v54 = vadd.f32 %v1904_v46, %v1856_v17  ;;  %v1909_v55 = vadd.f32 %v1905_v47, %v1857_v18 }
 0x120   : > { %v1918_v56 = vadd.f32 %v1914_v48, %v1910_v40  ;;  %v1919_v57 = vadd.f32 %v1915_v49, %v1911_v41  ;;  %v1920_v58 = vadd.f32 %v1916_v50, %v1912_v42  ;;  %v1921_v59 = vadd.f32 %v1917_v51, %v1913_v43 }
 0x121   : > { %1926 = vst [vmem:[%s251_s24] sm:$0xff] %v1906_v52  ;;  %1927 = vst [vmem:[%s251_s24 + $0x8] sm:$0xff] %v1907_v53  ;;  %1941 = sbr.rel (!%p2601_p6) target bundleno = 302 (0x12e), region = 70 }
 0x122   : > { %1928 = vst [vmem:[%s251_s24 + $0x10] sm:$0xff] %v1908_v54  ;;  %1929 = vst [vmem:[%s251_s24 + $0x18] sm:$0xff] %v1909_v55  ;;  %v1922_v60 = vadd.f32 %v1918_v56, %v1870_v32  ;;  %v1923_v61 = vadd.f32 %v1919_v57, %v1871_v33  ;;  %v1924_v62 = vadd.f32 %v1920_v58, %v1872_v34 }
 0x123   : > { %v1925_v63 = vadd.f32 %v1921_v59, %v1873_v35 }
 0x124   : > { %2460 = vst [vmem:[%s251_s24 + $0x20] sm:$0xff] %v1922_v60  ;;  %2461 = vst [vmem:[%s251_s24 + $0x28] sm:$0xff] %v1923_v61 }
 0x125   : > { %2462 = vst [vmem:[%s251_s24 + $0x30] sm:$0xff] %v1924_v62  ;;  %2463 = vst [vmem:[%s251_s24 + $0x38] sm:$0xff] %v1925_v63 }
 0x128   : > { %v1990_v0 = vld [vmem:[%s251_s24] sm:$0xff]  ;;  %v1992_v1 = vld [vmem:[%s251_s24 + $0x8] sm:$0xff] }
 0x129   : > { %v1994_v2 = vld [vmem:[%s251_s24 + $0x10] sm:$0xff]  ;;  %v1996_v3 = vld [vmem:[%s251_s24 + $0x18] sm:$0xff]  ;;  %1991 = vst [vmem:[%s1947_s29] sm:$0xff] %v1990_v0  ;;  %1993 = vst [vmem:[%s1947_s29 + $0x8] sm:$0xff] %v1992_v1 }
 0x12a   : > { %1995 = vst [vmem:[%s1947_s29 + $0x10] sm:$0xff] %v1994_v2  ;;  %1997 = vst [vmem:[%s1947_s29 + $0x18] sm:$0xff] %v1996_v3 }
 0x12b   : > { %v1998_v4 = vld [vmem:[%s251_s24 + $0x20] sm:$0xff]  ;;  %v2000_v5 = vld [vmem:[%s251_s24 + $0x28] sm:$0xff] }
 0x12c   : > { %1999 = vst [vmem:[%s1947_s29 + $0x40] sm:$0xff] %v1998_v4  ;;  %2001 = vst [vmem:[%s1947_s29 + $0x48] sm:$0xff] %v2000_v5  ;;  %v2002_v6 = vld [vmem:[%s251_s24 + $0x30] sm:$0xff]  ;;  %v2004_v7 = vld [vmem:[%s251_s24 + $0x38] sm:$0xff] }
 0x12d   : > { %2003 = vst [vmem:[%s1947_s29 + $0x50] sm:$0xff] %v2002_v6  ;;  %2005 = vst [vmem:[%s1947_s29 + $0x58] sm:$0xff] %v2004_v7 }
 0x12e PF: > { %s12_s13 = sadd.s32 1, %s2549_s13   ;;  %s3480_s9 = smov %s2537_s10 }
 0x12f   : > { %p9_p11 = scmp.ge.s32.totalorder %s12_s13, 4   ;;  %s3481_s10 = smov %s2606_s19 }
 0x130   : > { %s3482_s11 = smov %s2545_s12  ;;  %s3483_s12 = smov %s3485_s14 }
 0x131   :  { %11 = sbr.rel (!%p9_p11) target bundleno = 3 (0x3), region = 207 }

// kernel: reverse.1
= control target key start
LH: loop header
LB: loop body
LE: loop exit
PB: predicated region body
PF: predicated region fallthrough
CT: control target
= control target key end

     0   :  { %s1448_s0 = inlined_call_operand.vmem [shape: f32[2,32,32,15], index: 0, kind: input, shape index: {}]   ;;  %s1449_s1 = inlined_call_operand.vmem [shape: f32[2,32,32,15], index: 1, kind: output, shape index: {}]  }
   0x1   :  { %v480_v0 = vld [vmem:[%s1448_s0 + $0x1c0] sm:$0xff]  ;;  %v538_v30 = vld [vmem:[%s1448_s0 + $0x1c8] sm:$0xff]  ;;  %v598_v60 = vld [vmem:[%s1448_s0 + $0x1d0] sm:$0xff] }
   0x2   :  { %v481_v1 = vld [vmem:[%s1448_s0 + $0x3a0] sm:$0xff]  ;;  %4 = vst [vmem:[%s1449_s1] sm:$0xff] %v480_v0  ;;  %v540_v31 = vld [vmem:[%s1448_s0 + $0x3a8] sm:$0xff]  ;;  %539 = vst [vmem:[%s1449_s1 + $0x8] sm:$0xff] %v538_v30 }
   0x3   :  { %v483_v2 = vld [vmem:[%s1448_s0 + $0x1a0] sm:$0xff]  ;;  %482 = vst [vmem:[%s1449_s1 + $0x1e0] sm:$0xff] %v481_v1  ;;  %v542_v32 = vld [vmem:[%s1448_s0 + $0x1a8] sm:$0xff]  ;;  %541 = vst [vmem:[%s1449_s1 + $0x1e8] sm:$0xff] %v540_v31 }
   0x4   :  { %484 = vst [vmem:[%s1449_s1 + $0x20] sm:$0xff] %v483_v2  ;;  %v485_v3 = vld [vmem:[%s1448_s0 + $0x380] sm:$0xff]  ;;  %543 = vst [vmem:[%s1449_s1 + $0x28] sm:$0xff] %v542_v32  ;;  %v544_v33 = vld [vmem:[%s1448_s0 + $0x388] sm:$0xff] }
   0x5   :  { %v487_v4 = vld [vmem:[%s1448_s0 + $0x180] sm:$0xff]  ;;  %486 = vst [vmem:[%s1449_s1 + $0x200] sm:$0xff] %v485_v3  ;;  %v546_v34 = vld [vmem:[%s1448_s0 + $0x188] sm:$0xff]  ;;  %545 = vst [vmem:[%s1449_s1 + $0x208] sm:$0xff] %v544_v33 }
   0x6   :  { %v489_v5 = vld [vmem:[%s1448_s0 + $0x360] sm:$0xff]  ;;  %488 = vst [vmem:[%s1449_s1 + $0x40] sm:$0xff] %v487_v4  ;;  %v548_v35 = vld [vmem:[%s1448_s0 + $0x368] sm:$0xff]  ;;  %547 = vst [vmem:[%s1449_s1 + $0x48] sm:$0xff] %v546_v34 }
   0x7   :  { %490 = vst [vmem:[%s1449_s1 + $0x220] sm:$0xff] %v489_v5  ;;  %v491_v6 = vld [vmem:[%s1448_s0 + $0x160] sm:$0xff]  ;;  %549 = vst [vmem:[%s1449_s1 + $0x228] sm:$0xff] %v548_v35  ;;  %v550_v36 = vld [vmem:[%s1448_s0 + $0x168] sm:$0xff] }
   0x8   :  { %v493_v7 = vld [vmem:[%s1448_s0 + $0x340] sm:$0xff]  ;;  %492 = vst [vmem:[%s1449_s1 + $0x60] sm:$0xff] %v491_v6  ;;  %v552_v37 = vld [vmem:[%s1448_s0 + $0x348] sm:$0xff]  ;;  %551 = vst [vmem:[%s1449_s1 + $0x68] sm:$0xff] %v550_v36 }
   0x9   :  { %v495_v8 = vld [vmem:[%s1448_s0 + $0x140] sm:$0xff]  ;;  %494 = vst [vmem:[%s1449_s1 + $0x240] sm:$0xff] %v493_v7  ;;  %v554_v38 = vld [vmem:[%s1448_s0 + $0x148] sm:$0xff]  ;;  %553 = vst [vmem:[%s1449_s1 + $0x248] sm:$0xff] %v552_v37 }
   0xa   :  { %496 = vst [vmem:[%s1449_s1 + $0x80] sm:$0xff] %v495_v8  ;;  %v497_v9 = vld [vmem:[%s1448_s0 + $0x320] sm:$0xff]  ;;  %555 = vst [vmem:[%s1449_s1 + $0x88] sm:$0xff] %v554_v38  ;;  %v556_v39 = vld [vmem:[%s1448_s0 + $0x328] sm:$0xff] }
   0xb   :  { %v499_v10 = vld [vmem:[%s1448_s0 + $0x120] sm:$0xff]  ;;  %498 = vst [vmem:[%s1449_s1 + $0x260] sm:$0xff] %v497_v9  ;;  %v558_v40 = vld [vmem:[%s1448_s0 + $0x128] sm:$0xff]  ;;  %557 = vst [vmem:[%s1449_s1 + $0x268] sm:$0xff] %v556_v39 }
   0xc   :  { %v501_v11 = vld [vmem:[%s1448_s0 + $0x300] sm:$0xff]  ;;  %500 = vst [vmem:[%s1449_s1 + $0xa0] sm:$0xff] %v499_v10  ;;  %v560_v41 = vld [vmem:[%s1448_s0 + $0x308] sm:$0xff]  ;;  %559 = vst [vmem:[%s1449_s1 + $0xa8] sm:$0xff] %v558_v40 }
   0xd   :  { %502 = vst [vmem:[%s1449_s1 + $0x280] sm:$0xff] %v501_v11  ;;  %v503_v12 = vld [vmem:[%s1448_s0 + $0x100] sm:$0xff]  ;;  %561 = vst [vmem:[%s1449_s1 + $0x288] sm:$0xff] %v560_v41  ;;  %v562_v42 = vld [vmem:[%s1448_s0 + $0x108] sm:$0xff] }
   0xe   :  { %v505_v13 = vld [vmem:[%s1448_s0 + $0x2e0] sm:$0xff]  ;;  %504 = vst [vmem:[%s1449_s1 + $0xc0] sm:$0xff] %v503_v12  ;;  %v564_v43 = vld [vmem:[%s1448_s0 + $0x2e8] sm:$0xff]  ;;  %563 = vst [vmem:[%s1449_s1 + $0xc8] sm:$0xff] %v562_v42 }
   0xf   :  { %v507_v14 = vld [vmem:[%s1448_s0 + $0xe0] sm:$0xff]  ;;  %506 = vst [vmem:[%s1449_s1 + $0x2a0] sm:$0xff] %v505_v13  ;;  %v566_v44 = vld [vmem:[%s1448_s0 + $0xe8] sm:$0xff]  ;;  %565 = vst [vmem:[%s1449_s1 + $0x2a8] sm:$0xff] %v564_v43 }
  0x10   :  { %508 = vst [vmem:[%s1449_s1 + $0xe0] sm:$0xff] %v507_v14  ;;  %v509_v15 = vld [vmem:[%s1448_s0 + $0x2c0] sm:$0xff]  ;;  %567 = vst [vmem:[%s1449_s1 + $0xe8] sm:$0xff] %v566_v44  ;;  %v568_v45 = vld [vmem:[%s1448_s0 + $0x2c8] sm:$0xff] }
  0x11   :  { %v511_v16 = vld [vmem:[%s1448_s0 + $0xc0] sm:$0xff]  ;;  %510 = vst [vmem:[%s1449_s1 + $0x2c0] sm:$0xff] %v509_v15  ;;  %v570_v46 = vld [vmem:[%s1448_s0 + $0xc8] sm:$0xff]  ;;  %569 = vst [vmem:[%s1449_s1 + $0x2c8] sm:$0xff] %v568_v45 }
  0x12   :  { %v513_v17 = vld [vmem:[%s1448_s0 + $0x2a0] sm:$0xff]  ;;  %512 = vst [vmem:[%s1449_s1 + $0x100] sm:$0xff] %v511_v16  ;;  %v572_v47 = vld [vmem:[%s1448_s0 + $0x2a8] sm:$0xff]  ;;  %571 = vst [vmem:[%s1449_s1 + $0x108] sm:$0xff] %v570_v46 }
  0x13   :  { %514 = vst [vmem:[%s1449_s1 + $0x2e0] sm:$0xff] %v513_v17  ;;  %v515_v18 = vld [vmem:[%s1448_s0 + $0xa0] sm:$0xff]  ;;  %573 = vst [vmem:[%s1449_s1 + $0x2e8] sm:$0xff] %v572_v47  ;;  %v574_v48 = vld [vmem:[%s1448_s0 + $0xa8] sm:$0xff] }
  0x14   :  { %v517_v19 = vld [vmem:[%s1448_s0 + $0x280] sm:$0xff]  ;;  %516 = vst [vmem:[%s1449_s1 + $0x120] sm:$0xff] %v515_v18  ;;  %v576_v49 = vld [vmem:[%s1448_s0 + $0x288] sm:$0xff]  ;;  %575 = vst [vmem:[%s1449_s1 + $0x128] sm:$0xff] %v574_v48 }
  0x15   :  { %v519_v20 = vld [vmem:[%s1448_s0 + $0x80] sm:$0xff]  ;;  %518 = vst [vmem:[%s1449_s1 + $0x300] sm:$0xff] %v517_v19  ;;  %v578_v50 = vld [vmem:[%s1448_s0 + $0x88] sm:$0xff]  ;;  %577 = vst [vmem:[%s1449_s1 + $0x308] sm:$0xff] %v576_v49 }
  0x16   :  { %520 = vst [vmem:[%s1449_s1 + $0x140] sm:$0xff] %v519_v20  ;;  %v521_v21 = vld [vmem:[%s1448_s0 + $0x260] sm:$0xff]  ;;  %579 = vst [vmem:[%s1449_s1 + $0x148] sm:$0xff] %v578_v50  ;;  %v580_v51 = vld [vmem:[%s1448_s0 + $0x268] sm:$0xff] }
  0x17   :  { %v523_v22 = vld [vmem:[%s1448_s0 + $0x60] sm:$0xff]  ;;  %522 = vst [vmem:[%s1449_s1 + $0x320] sm:$0xff] %v521_v21  ;;  %v582_v52 = vld [vmem:[%s1448_s0 + $0x68] sm:$0xff]  ;;  %581 = vst [vmem:[%s1449_s1 + $0x328] sm:$0xff] %v580_v51 }
  0x18   :  { %v525_v23 = vld [vmem:[%s1448_s0 + $0x240] sm:$0xff]  ;;  %524 = vst [vmem:[%s1449_s1 + $0x160] sm:$0xff] %v523_v22  ;;  %v584_v53 = vld [vmem:[%s1448_s0 + $0x248] sm:$0xff]  ;;  %583 = vst [vmem:[%s1449_s1 + $0x168] sm:$0xff] %v582_v52 }
  0x19   :  { %526 = vst [vmem:[%s1449_s1 + $0x340] sm:$0xff] %v525_v23  ;;  %v527_v24 = vld [vmem:[%s1448_s0 + $0x40] sm:$0xff]  ;;  %585 = vst [vmem:[%s1449_s1 + $0x348] sm:$0xff] %v584_v53  ;;  %v586_v54 = vld [vmem:[%s1448_s0 + $0x48] sm:$0xff] }
  0x1a   :  { %v529_v25 = vld [vmem:[%s1448_s0 + $0x220] sm:$0xff]  ;;  %528 = vst [vmem:[%s1449_s1 + $0x180] sm:$0xff] %v527_v24  ;;  %v588_v55 = vld [vmem:[%s1448_s0 + $0x228] sm:$0xff]  ;;  %587 = vst [vmem:[%s1449_s1 + $0x188] sm:$0xff] %v586_v54 }
  0x1b   :  { %v531_v26 = vld [vmem:[%s1448_s0 + $0x20] sm:$0xff]  ;;  %530 = vst [vmem:[%s1449_s1 + $0x360] sm:$0xff] %v529_v25  ;;  %v590_v56 = vld [vmem:[%s1448_s0 + $0x28] sm:$0xff]  ;;  %589 = vst [vmem:[%s1449_s1 + $0x368] sm:$0xff] %v588_v55 }
  0x1c   :  { %532 = vst [vmem:[%s1449_s1 + $0x1a0] sm:$0xff] %v531_v26  ;;  %v533_v27 = vld [vmem:[%s1448_s0 + $0x200] sm:$0xff]  ;;  %591 = vst [vmem:[%s1449_s1 + $0x1a8] sm:$0xff] %v590_v56  ;;  %v592_v57 = vld [vmem:[%s1448_s0 + $0x208] sm:$0xff] }
  0x1d   :  { %v113_v28 = vld [vmem:[%s1448_s0] sm:$0xff]  ;;  %534 = vst [vmem:[%s1449_s1 + $0x380] sm:$0xff] %v533_v27  ;;  %v594_v58 = vld [vmem:[%s1448_s0 + $0x8] sm:$0xff]  ;;  %593 = vst [vmem:[%s1449_s1 + $0x388] sm:$0xff] %v592_v57 }
  0x1e   :  { %v536_v29 = vld [vmem:[%s1448_s0 + $0x1e0] sm:$0xff]  ;;  %535 = vst [vmem:[%s1449_s1 + $0x1c0] sm:$0xff] %v113_v28  ;;  %v596_v59 = vld [vmem:[%s1448_s0 + $0x1e8] sm:$0xff]  ;;  %595 = vst [vmem:[%s1449_s1 + $0x1c8] sm:$0xff] %v594_v58 }
  0x1f   :  { %537 = vst [vmem:[%s1449_s1 + $0x3a0] sm:$0xff] %v536_v29  ;;  %597 = vst [vmem:[%s1449_s1 + $0x3a8] sm:$0xff] %v596_v59  ;;  %v600_v61 = vld [vmem:[%s1448_s0 + $0x3b0] sm:$0xff]  ;;  %v658_v26 = vld [vmem:[%s1448_s0 + $0x1d8] sm:$0xff] }
  0x20   :  { %v602_v62 = vld [vmem:[%s1448_s0 + $0x1b0] sm:$0xff]  ;;  %599 = vst [vmem:[%s1449_s1 + $0x10] sm:$0xff] %v598_v60  ;;  %601 = vst [vmem:[%s1449_s1 + $0x1f0] sm:$0xff] %v600_v61  ;;  %v660_v27 = vld [vmem:[%s1448_s0 + $0x3b8] sm:$0xff] }
  0x21   :  { %603 = vst [vmem:[%s1449_s1 + $0x30] sm:$0xff] %v602_v62  ;;  %v604_v63 = vld [vmem:[%s1448_s0 + $0x390] sm:$0xff]  ;;  %v662_v28 = vld [vmem:[%s1448_s0 + $0x1b8] sm:$0xff]  ;;  %659 = vst [vmem:[%s1449_s1 + $0x18] sm:$0xff] %v658_v26 }
  0x22   :  { %v606_v0 = vld [vmem:[%s1448_s0 + $0x190] sm:$0xff]  ;;  %605 = vst [vmem:[%s1449_s1 + $0x210] sm:$0xff] %v604_v63  ;;  %661 = vst [vmem:[%s1449_s1 + $0x1f8] sm:$0xff] %v660_v27  ;;  %v664_v29 = vld [vmem:[%s1448_s0 + $0x398] sm:$0xff] }
  0x23   :  { %v608_v1 = vld [vmem:[%s1448_s0 + $0x370] sm:$0xff]  ;;  %607 = vst [vmem:[%s1449_s1 + $0x50] sm:$0xff] %v606_v0  ;;  %663 = vst [vmem:[%s1449_s1 + $0x38] sm:$0xff] %v662_v28  ;;  %v666_v30 = vld [vmem:[%s1448_s0 + $0x198] sm:$0xff] }
  0x24   :  { %609 = vst [vmem:[%s1449_s1 + $0x230] sm:$0xff] %v608_v1  ;;  %v610_v2 = vld [vmem:[%s1448_s0 + $0x170] sm:$0xff]  ;;  %v668_v31 = vld [vmem:[%s1448_s0 + $0x378] sm:$0xff]  ;;  %665 = vst [vmem:[%s1449_s1 + $0x218] sm:$0xff] %v664_v29 }
  0x25   :  { %v612_v3 = vld [vmem:[%s1448_s0 + $0x350] sm:$0xff]  ;;  %611 = vst [vmem:[%s1449_s1 + $0x70] sm:$0xff] %v610_v2  ;;  %667 = vst [vmem:[%s1449_s1 + $0x58] sm:$0xff] %v666_v30  ;;  %v670_v32 = vld [vmem:[%s1448_s0 + $0x178] sm:$0xff] }
  0x26   :  { %v614_v4 = vld [vmem:[%s1448_s0 + $0x150] sm:$0xff]  ;;  %613 = vst [vmem:[%s1449_s1 + $0x250] sm:$0xff] %v612_v3  ;;  %669 = vst [vmem:[%s1449_s1 + $0x238] sm:$0xff] %v668_v31  ;;  %v672_v33 = vld [vmem:[%s1448_s0 + $0x358] sm:$0xff] }
  0x27   :  { %615 = vst [vmem:[%s1449_s1 + $0x90] sm:$0xff] %v614_v4  ;;  %v616_v5 = vld [vmem:[%s1448_s0 + $0x330] sm:$0xff]  ;;  %v674_v34 = vld [vmem:[%s1448_s0 + $0x158] sm:$0xff]  ;;  %671 = vst [vmem:[%s1449_s1 + $0x78] sm:$0xff] %v670_v32 }
  0x28   :  { %v618_v6 = vld [vmem:[%s1448_s0 + $0x130] sm:$0xff]  ;;  %617 = vst [vmem:[%s1449_s1 + $0x270] sm:$0xff] %v616_v5  ;;  %673 = vst [vmem:[%s1449_s1 + $0x258] sm:$0xff] %v672_v33  ;;  %v676_v35 = vld [vmem:[%s1448_s0 + $0x338] sm:$0xff] }
  0x29   :  { %v620_v7 = vld [vmem:[%s1448_s0 + $0x310] sm:$0xff]  ;;  %619 = vst [vmem:[%s1449_s1 + $0xb0] sm:$0xff] %v618_v6  ;;  %675 = vst [vmem:[%s1449_s1 + $0x98] sm:$0xff] %v674_v34  ;;  %v678_v36 = vld [vmem:[%s1448_s0 + $0x138] sm:$0xff] }
  0x2a   :  { %621 = vst [vmem:[%s1449_s1 + $0x290] sm:$0xff] %v620_v7  ;;  %v622_v8 = vld [vmem:[%s1448_s0 + $0x110] sm:$0xff]  ;;  %v680_v37 = vld [vmem:[%s1448_s0 + $0x318] sm:$0xff]  ;;  %677 = vst [vmem:[%s1449_s1 + $0x278] sm:$0xff] %v676_v35 }
  0x2b   :  { %v624_v9 = vld [vmem:[%s1448_s0 + $0x2f0] sm:$0xff]  ;;  %623 = vst [vmem:[%s1449_s1 + $0xd0] sm:$0xff] %v622_v8  ;;  %679 = vst [vmem:[%s1449_s1 + $0xb8] sm:$0xff] %v678_v36  ;;  %v682_v38 = vld [vmem:[%s1448_s0 + $0x118] sm:$0xff] }
  0x2c   :  { %v626_v10 = vld [vmem:[%s1448_s0 + $0xf0] sm:$0xff]  ;;  %625 = vst [vmem:[%s1449_s1 + $0x2b0] sm:$0xff] %v624_v9  ;;  %681 = vst [vmem:[%s1449_s1 + $0x298] sm:$0xff] %v680_v37  ;;  %v684_v39 = vld [vmem:[%s1448_s0 + $0x2f8] sm:$0xff] }
  0x2d   :  { %627 = vst [vmem:[%s1449_s1 + $0xf0] sm:$0xff] %v626_v10  ;;  %v628_v11 = vld [vmem:[%s1448_s0 + $0x2d0] sm:$0xff]  ;;  %v686_v40 = vld [vmem:[%s1448_s0 + $0xf8] sm:$0xff]  ;;  %683 = vst [vmem:[%s1449_s1 + $0xd8] sm:$0xff] %v682_v38 }
  0x2e   :  { %v630_v12 = vld [vmem:[%s1448_s0 + $0xd0] sm:$0xff]  ;;  %629 = vst [vmem:[%s1449_s1 + $0x2d0] sm:$0xff] %v628_v11  ;;  %685 = vst [vmem:[%s1449_s1 + $0x2b8] sm:$0xff] %v684_v39  ;;  %v688_v41 = vld [vmem:[%s1448_s0 + $0x2d8] sm:$0xff] }
  0x2f   :  { %v632_v13 = vld [vmem:[%s1448_s0 + $0x2b0] sm:$0xff]  ;;  %631 = vst [vmem:[%s1449_s1 + $0x110] sm:$0xff] %v630_v12  ;;  %687 = vst [vmem:[%s1449_s1 + $0xf8] sm:$0xff] %v686_v40  ;;  %v690_v42 = vld [vmem:[%s1448_s0 + $0xd8] sm:$0xff] }
  0x30   :  { %633 = vst [vmem:[%s1449_s1 + $0x2f0] sm:$0xff] %v632_v13  ;;  %v634_v14 = vld [vmem:[%s1448_s0 + $0xb0] sm:$0xff]  ;;  %v692_v43 = vld [vmem:[%s1448_s0 + $0x2b8] sm:$0xff]  ;;  %689 = vst [vmem:[%s1449_s1 + $0x2d8] sm:$0xff] %v688_v41 }
  0x31   :  { %v636_v15 = vld [vmem:[%s1448_s0 + $0x290] sm:$0xff]  ;;  %635 = vst [vmem:[%s1449_s1 + $0x130] sm:$0xff] %v634_v14  ;;  %691 = vst [vmem:[%s1449_s1 + $0x118] sm:$0xff] %v690_v42  ;;  %v694_v44 = vld [vmem:[%s1448_s0 + $0xb8] sm:$0xff] }
  0x32   :  { %v638_v16 = vld [vmem:[%s1448_s0 + $0x90] sm:$0xff]  ;;  %637 = vst [vmem:[%s1449_s1 + $0x310] sm:$0xff] %v636_v15  ;;  %693 = vst [vmem:[%s1449_s1 + $0x2f8] sm:$0xff] %v692_v43  ;;  %v696_v45 = vld [vmem:[%s1448_s0 + $0x298] sm:$0xff] }
  0x33   :  { %639 = vst [vmem:[%s1449_s1 + $0x150] sm:$0xff] %v638_v16  ;;  %v640_v17 = vld [vmem:[%s1448_s0 + $0x270] sm:$0xff]  ;;  %v698_v46 = vld [vmem:[%s1448_s0 + $0x98] sm:$0xff]  ;;  %695 = vst [vmem:[%s1449_s1 + $0x138] sm:$0xff] %v694_v44 }
  0x34   :  { %v642_v18 = vld [vmem:[%s1448_s0 + $0x70] sm:$0xff]  ;;  %641 = vst [vmem:[%s1449_s1 + $0x330] sm:$0xff] %v640_v17  ;;  %697 = vst [vmem:[%s1449_s1 + $0x318] sm:$0xff] %v696_v45  ;;  %v700_v47 = vld [vmem:[%s1448_s0 + $0x278] sm:$0xff] }
  0x35   :  { %v644_v19 = vld [vmem:[%s1448_s0 + $0x250] sm:$0xff]  ;;  %643 = vst [vmem:[%s1449_s1 + $0x170] sm:$0xff] %v642_v18  ;;  %699 = vst [vmem:[%s1449_s1 + $0x158] sm:$0xff] %v698_v46  ;;  %v702_v48 = vld [vmem:[%s1448_s0 + $0x78] sm:$0xff] }
  0x36   :  { %645 = vst [vmem:[%s1449_s1 + $0x350] sm:$0xff] %v644_v19  ;;  %v646_v20 = vld [vmem:[%s1448_s0 + $0x50] sm:$0xff]  ;;  %v704_v49 = vld [vmem:[%s1448_s0 + $0x258] sm:$0xff]  ;;  %701 = vst [vmem:[%s1449_s1 + $0x338] sm:$0xff] %v700_v47 }
  0x37   :  { %v648_v21 = vld [vmem:[%s1448_s0 + $0x230] sm:$0xff]  ;;  %647 = vst [vmem:[%s1449_s1 + $0x190] sm:$0xff] %v646_v20  ;;  %703 = vst [vmem:[%s1449_s1 + $0x178] sm:$0xff] %v702_v48  ;;  %v706_v50 = vld [vmem:[%s1448_s0 + $0x58] sm:$0xff] }
  0x38   :  { %v650_v22 = vld [vmem:[%s1448_s0 + $0x30] sm:$0xff]  ;;  %649 = vst [vmem:[%s1449_s1 + $0x370] sm:$0xff] %v648_v21  ;;  %705 = vst [vmem:[%s1449_s1 + $0x358] sm:$0xff] %v704_v49  ;;  %v708_v51 = vld [vmem:[%s1448_s0 + $0x238] sm:$0xff] }
  0x39   :  { %651 = vst [vmem:[%s1449_s1 + $0x1b0] sm:$0xff] %v650_v22  ;;  %v652_v23 = vld [vmem:[%s1448_s0 + $0x210] sm:$0xff]  ;;  %v710_v52 = vld [vmem:[%s1448_s0 + $0x38] sm:$0xff]  ;;  %707 = vst [vmem:[%s1449_s1 + $0x198] sm:$0xff] %v706_v50 }
  0x3a   :  { %v654_v24 = vld [vmem:[%s1448_s0 + $0x10] sm:$0xff]  ;;  %653 = vst [vmem:[%s1449_s1 + $0x390] sm:$0xff] %v652_v23  ;;  %709 = vst [vmem:[%s1449_s1 + $0x378] sm:$0xff] %v708_v51  ;;  %v712_v53 = vld [vmem:[%s1448_s0 + $0x218] sm:$0xff] }
  0x3b   :  { %v656_v25 = vld [vmem:[%s1448_s0 + $0x1f0] sm:$0xff]  ;;  %655 = vst [vmem:[%s1449_s1 + $0x1d0] sm:$0xff] %v654_v24  ;;  %711 = vst [vmem:[%s1449_s1 + $0x1b8] sm:$0xff] %v710_v52  ;;  %v714_v54 = vld [vmem:[%s1448_s0 + $0x18] sm:$0xff] }
  0x3c   :  { %657 = vst [vmem:[%s1449_s1 + $0x3b0] sm:$0xff] %v656_v25  ;;  %v716_v55 = vld [vmem:[%s1448_s0 + $0x1f8] sm:$0xff]  ;;  %713 = vst [vmem:[%s1449_s1 + $0x398] sm:$0xff] %v712_v53 }
  0x3d   :  { %715 = vst [vmem:[%s1449_s1 + $0x1d8] sm:$0xff] %v714_v54  ;;  %717 = vst [vmem:[%s1449_s1 + $0x3b8] sm:$0xff] %v716_v55 }

</bundles_post_ra>
